<compile_context>
chip_gen: v7x
topology: tpu7x:2x2x1
jax: 0.10.0
libtpu: 0.0.40
codegen_flags: <defaults>
</compile_context>

<pallas_src>
import functools

import jax
import jax.numpy as jnp
from jax.experimental import pallas as pl
from jax.experimental.pallas import tpu as pltpu


# ----------------------------------------------------------------------------
# In-kernel helpers (operate on values; only well-supported Mosaic ops:
# elementwise, concatenate, static slices, 2-D matmuls, lane reductions).
# ----------------------------------------------------------------------------
def _row_shift(v, s):
    """Return w with w[r] = v[r + s] and zero fill outside [0, M); s static."""
    if s == 0:
        return v
    cols = v.shape[1]
    if s > 0:
        return jnp.concatenate([v[s:, :], jnp.zeros((s, cols), v.dtype)], axis=0)
    return jnp.concatenate([jnp.zeros((-s, cols), v.dtype), v[:s, :]], axis=0)


def _conv3x3_flat(a, w9, width, col_idx):
    """3x3, padding=1 cross-correlation on a row-major flattened (H*W, Cin) image.

    a:       (H*W, Cin) activated input
    w9:      (9*Cin, Cout) weights, tap order (kh, kw, cin)
    width:   static W (row length of the flattened image)
    col_idx: (H*W, 1) int32 = r % W, used to mask column wrap-around
    """
    m, cin = a.shape
    cout = w9.shape[1]
    acc = jnp.zeros((m, cout), jnp.float32)
    tap = 0
    for dh in (-1, 0, 1):
        for dw in (-1, 0, 1):
            shifted = _row_shift(a, dh * width + dw)
            if dw == 1:
                shifted = jnp.where(col_idx != width - 1, shifted, 0.0)
            elif dw == -1:
                shifted = jnp.where(col_idx != 0, shifted, 0.0)
            acc = acc + jnp.dot(shifted, w9[tap * cin:(tap + 1) * cin, :],
                                preferred_element_type=jnp.float32)
            tap += 1
    return acc


# ----------------------------------------------------------------------------
# Fused AttentionBlock kernel: one grid step == one batch element.
# ----------------------------------------------------------------------------
def _attn_block_kernel(x1_ref, x2_ref, cole_ref, cold_ref, sel_ref,
                       se_ref, she_ref, we_ref, be_ref,
                       sd_ref, shd_ref, wd_ref, bd_ref,
                       sa_ref, sha_ref, wa_ref, ba_ref,
                       o_ref, *, w1, w2):
    f32 = jnp.float32
    x1 = x1_ref[0].astype(f32)          # (M1, Ce) flat NHWC, one image
    x2 = x2_ref[0].astype(f32)          # (M2, Cd) raw decoder input (for gating)
    col1 = cole_ref[...]                # (M1, 1) int32: r % W1
    col2 = cold_ref[...]                # (M2, 1) int32: r % W2

    # --- encoder branch: BN -> ReLU -> conv3x3(pad=1) -> maxpool(2,2) ---
    a1 = jnp.maximum(x1 * se_ref[...] + she_ref[...], 0.0)
    enc = _conv3x3_flat(a1, we_ref[...], w1, col1)           # (M1, Co)
    m = jnp.maximum(enc, _row_shift(enc, 1))                 # pair-max along W
    m = jnp.maximum(m, _row_shift(m, w1))                    # pair-max along H
    # stride-2 selection of pooled rows done as a matmul with a 0/1 matrix
    enc = jnp.dot(sel_ref[...], m, preferred_element_type=f32) + be_ref[...]

    # --- decoder branch: BN -> ReLU -> conv3x3(pad=1) ---
    a2 = jnp.maximum(x2 * sd_ref[...] + shd_ref[...], 0.0)
    dec = _conv3x3_flat(a2, wd_ref[...], w2, col2) + bd_ref[...]

    # --- attention head: BN -> ReLU -> conv1x1 -> gate x2 ---
    a3 = jnp.maximum((enc + dec) * sa_ref[...] + sha_ref[...], 0.0)   # (M2, Co)
    attn = jnp.sum(a3 * wa_ref[...], axis=1, keepdims=True) + ba_ref[...]  # (M2, 1)
    o_ref[0] = (attn * x2).astype(o_ref.dtype)


# ----------------------------------------------------------------------------
# Module wrapper
# ----------------------------------------------------------------------------
class AttentionBlockPallas:
    """JAX/Pallas equivalent of the PyTorch AttentionBlock (inference mode)."""

    def __init__(self, input_encoder, input_decoder, output_dim, key):
        self.ce, self.cd, self.co = input_encoder, input_decoder, output_dim
        self.eps = 1e-5
        ks = jax.random.split(key, 9)

        def conv_init(kw, kb, cin, cout, ksz):
            bound = 1.0 / float(cin * ksz * ksz) ** 0.5
            w = jax.random.uniform(kw, (cout, cin, ksz, ksz),
                                   minval=-bound, maxval=bound, dtype=jnp.float32)
            b = jax.random.uniform(kb, (cout,),
                                   minval=-bound, maxval=bound, dtype=jnp.float32)
            return w, b

        def bn_init(k, c):
            k1, k2, k3, k4 = jax.random.split(k, 4)
            gamma = jax.random.uniform(k1, (c,), minval=0.5, maxval=1.5, dtype=jnp.float32)
            beta = 0.1 * jax.random.normal(k2, (c,), dtype=jnp.float32)
            mean = 0.1 * jax.random.normal(k3, (c,), dtype=jnp.float32)
            var = jax.random.uniform(k4, (c,), minval=0.5, maxval=1.5, dtype=jnp.float32)
            return gamma, beta, mean, var

        self.bn_e = bn_init(ks[0], input_encoder)
        self.w_e, self.b_e = conv_init(ks[1], ks[2], input_encoder, output_dim, 3)
        self.bn_d = bn_init(ks[3], input_decoder)
        self.w_d, self.b_d = conv_init(ks[4], ks[5], input_decoder, output_dim, 3)
        self.bn_a = bn_init(ks[6], output_dim)
        self.w_a, self.b_a = conv_init(ks[7], ks[8], output_dim, 1, 1)

    @functools.partial(jax.jit, static_argnums=0)
    def __call__(self, x1, x2):
        # x1: (N, Ce, H1, W1), x2: (N, Cd, H2, W2) with H1=2*H2, W1=2*W2 (NCHW).
        N, ce, H1, W1 = x1.shape
        n2, cd, H2, W2 = x2.shape
        co = self.co
        assert ce == self.ce and cd == self.cd and n2 == N
        assert H1 == 2 * H2 and W1 == 2 * W2 and H1 % 2 == 0 and W1 % 2 == 0
        M1, M2 = H1 * W1, H2 * W2

        # Boundary layout only: NCHW -> flat NHWC (M, C) for the kernel.
        x1f = jnp.transpose(x1, (0, 2, 3, 1)).reshape(N, M1, ce)
        x2f = jnp.transpose(x2, (0, 2, 3, 1)).reshape(N, M2, cd)

        # Fold eval-mode BatchNorm into per-channel scale/shift.
        def fold_bn(bn):
            gamma, beta, mean, var = bn
            sc = gamma * jax.lax.rsqrt(var + self.eps)
            return sc.reshape(1, -1), (beta - mean * sc).reshape(1, -1)

        se, she = fold_bn(self.bn_e)
        sd, shd = fold_bn(self.bn_d)
        sa, sha = fold_bn(self.bn_a)

        # Conv weights -> (kh, kw, cin, cout) tap-major 2-D matrices.
        we = jnp.transpose(self.w_e, (2, 3, 1, 0)).reshape(9 * ce, co)
        wd = jnp.transpose(self.w_d, (2, 3, 1, 0)).reshape(9 * cd, co)
        wa = self.w_a.reshape(1, co)
        be = self.b_e.reshape(1, co)
        bd = self.b_d.reshape(1, co)
        ba = self.b_a.reshape(1, 1)

        # Static index helpers (tiny, stay resident in VMEM across the grid).
        col1 = (jnp.arange(M1, dtype=jnp.int32) % W1).reshape(M1, 1)
        col2 = (jnp.arange(M2, dtype=jnp.int32) % W2).reshape(M2, 1)
        kk = jnp.arange(M2, dtype=jnp.int32)
        src = 2 * (kk // W2) * W1 + 2 * (kk % W2)
        sel = (jnp.arange(M1, dtype=jnp.int32)[None, :] == src[:, None]).astype(jnp.float32)

        img_map = lambda n: (n, 0, 0)
        par_map = lambda n: (0, 0)

        flops = 2 * N * (M1 * 9 * ce * co + M2 * M1 * co + M2 * 9 * cd * co + M2 * co)
        bytes_accessed = 4 * (N * (M1 * ce + 2 * M2 * cd) + M2 * M1 + M1 + M2
                              + 20 * (ce + cd + co) + 1)

        yf = pl.pallas_call(
            functools.partial(_attn_block_kernel, w1=W1, w2=W2),
            out_shape=jax.ShapeDtypeStruct((N, M2, cd), x2.dtype),
            grid_spec=pltpu.PrefetchScalarGridSpec(
                num_scalar_prefetch=0,
                grid=(N,),
                in_specs=[
                    pl.BlockSpec((1, M1, ce), img_map),     # x1 flat
                    pl.BlockSpec((1, M2, cd), img_map),     # x2 flat
                    pl.BlockSpec((M1, 1), par_map),         # col index (encoder)
                    pl.BlockSpec((M2, 1), par_map),         # col index (decoder)
                    pl.BlockSpec((M2, M1), par_map),        # maxpool selection
                    pl.BlockSpec((1, ce), par_map),         # BN-e scale
                    pl.BlockSpec((1, ce), par_map),         # BN-e shift
                    pl.BlockSpec((9 * ce, co), par_map),    # conv-e weight
                    pl.BlockSpec((1, co), par_map),         # conv-e bias
                    pl.BlockSpec((1, cd), par_map),         # BN-d scale
                    pl.BlockSpec((1, cd), par_map),         # BN-d shift
                    pl.BlockSpec((9 * cd, co), par_map),    # conv-d weight
                    pl.BlockSpec((1, co), par_map),         # conv-d bias
                    pl.BlockSpec((1, co), par_map),         # BN-a scale
                    pl.BlockSpec((1, co), par_map),         # BN-a shift
                    pl.BlockSpec((1, co), par_map),         # conv-a weight (1x1)
                    pl.BlockSpec((1, 1), par_map),          # conv-a bias
                ],
                out_specs=pl.BlockSpec((1, M2, cd), img_map),
            ),
            compiler_params=pltpu.CompilerParams(
                dimension_semantics=("parallel",),
                vmem_limit_bytes=32 * 1024 * 1024),
            cost_estimate=pl.CostEstimate(
                flops=flops, transcendentals=0, bytes_accessed=bytes_accessed),
        )(x1f, x2f, col1, col2, sel,
          se, she, we, be, sd, shd, wd, bd, sa, sha, wa, ba)

        # flat NHWC -> NCHW to match the PyTorch convention.
        return jnp.transpose(yf.reshape(N, H2, W2, cd), (0, 3, 1, 2))


# ----------------------------------------------------------------------------
# Pure-JAX reference (eval-mode BN) for validation.
# ----------------------------------------------------------------------------
def _reference(mod, x1, x2):
    eps = mod.eps

    def bn_relu(x, bn):
        gamma, beta, mean, var = bn
        y = (x - mean[None, :, None, None]) * jax.lax.rsqrt(var[None, :, None, None] + eps)
        y = y * gamma[None, :, None, None] + beta[None, :, None, None]
        return jnp.maximum(y, 0.0)

    def conv(x, w, b, pad):
        y = jax.lax.conv_general_dilated(
            x, w, window_strides=(1, 1), padding=pad,
            dimension_numbers=("NCHW", "OIHW", "NCHW"))
        return y + b[None, :, None, None]

    enc = conv(bn_relu(x1, mod.bn_e), mod.w_e, mod.b_e, ((1, 1), (1, 1)))
    enc = jax.lax.reduce_window(enc, -jnp.inf, jax.lax.max,
                                (1, 1, 2, 2), (1, 1, 2, 2), "VALID")
    dec = conv(bn_relu(x2, mod.bn_d), mod.w_d, mod.b_d, ((1, 1), (1, 1)))
    attn = conv(bn_relu(enc + dec, mod.bn_a), mod.w_a, mod.b_a, ((0, 0), (0, 0)))
    return attn * x2


if __name__ == "__main__":
    key = jax.random.PRNGKey(0)
    k_param, k_x1, k_x2 = jax.random.split(key, 3)

    input_encoder, input_decoder, output_dim = 4, 4, 8
    mod = AttentionBlockPallas(input_encoder, input_decoder, output_dim, k_param)

    x1 = jax.random.normal(k_x1, (2, input_encoder, 16, 16), dtype=jnp.float32)
    x2 = jax.random.normal(k_x2, (2, input_decoder, 8, 8), dtype=jnp.float32)

    out = jax.block_until_ready(mod(x1, x2))
    ref = _reference(mod, x1, x2)

    assert out.shape == (2, input_decoder, 8, 8), out.shape
    err = float(jnp.max(jnp.abs(out - ref)))
    assert err < 1e-4, f"max abs error {err}"

    print("KERNEL_OK")
</pallas_src>

<mosaic_0001>
module attributes {stable_mosaic.version = 11 : i64} {
  func.func @_attn_block_kernel(%arg0: i32, %arg1: memref<1x256x4xf32, #tpu.memory_space<vmem>>, %arg2: memref<1x64x4xf32, #tpu.memory_space<vmem>>, %arg3: memref<256x1xi32, #tpu.memory_space<vmem>>, %arg4: memref<64x1xi32, #tpu.memory_space<vmem>>, %arg5: memref<64x256xf32, #tpu.memory_space<vmem>>, %arg6: memref<1x4xf32, #tpu.memory_space<vmem>>, %arg7: memref<1x4xf32, #tpu.memory_space<vmem>>, %arg8: memref<36x8xf32, #tpu.memory_space<vmem>>, %arg9: memref<1x8xf32, #tpu.memory_space<vmem>>, %arg10: memref<1x4xf32, #tpu.memory_space<vmem>>, %arg11: memref<1x4xf32, #tpu.memory_space<vmem>>, %arg12: memref<36x8xf32, #tpu.memory_space<vmem>>, %arg13: memref<1x8xf32, #tpu.memory_space<vmem>>, %arg14: memref<1x8xf32, #tpu.memory_space<vmem>>, %arg15: memref<1x8xf32, #tpu.memory_space<vmem>>, %arg16: memref<1x8xf32, #tpu.memory_space<vmem>>, %arg17: memref<1x1xf32, #tpu.memory_space<vmem>>, %arg18: memref<1x64x4xf32, #tpu.memory_space<vmem>>) attributes {dimension_semantics = [#tpu.dimension_semantics<parallel>], iteration_bounds = array<i64: 2>, scalar_prefetch = 0 : i64, scratch_operands = 0 : i64, tpu.core_type = #tpu.core_type<tc>, window_params = [{transform_indices = @transform_0, window_bounds = array<i64: 1, 256, 4>}, {transform_indices = @transform_1, window_bounds = array<i64: 1, 64, 4>}, {pipeline_mode = #tpu.pipeline_mode<synchronous>, transform_indices = @transform_2, window_bounds = array<i64: 256, 1>}, {pipeline_mode = #tpu.pipeline_mode<synchronous>, transform_indices = @transform_3, window_bounds = array<i64: 64, 1>}, {pipeline_mode = #tpu.pipeline_mode<synchronous>, transform_indices = @transform_4, window_bounds = array<i64: 64, 256>}, {pipeline_mode = #tpu.pipeline_mode<synchronous>, transform_indices = @transform_5, window_bounds = array<i64: 1, 4>}, {pipeline_mode = #tpu.pipeline_mode<synchronous>, transform_indices = @transform_6, window_bounds = array<i64: 1, 4>}, {pipeline_mode = #tpu.pipeline_mode<synchronous>, transform_indices = @transform_7, window_bounds = array<i64: 36, 8>}, {pipeline_mode = #tpu.pipeline_mode<synchronous>, transform_indices = @transform_8, window_bounds = array<i64: 1, 8>}, {pipeline_mode = #tpu.pipeline_mode<synchronous>, transform_indices = @transform_9, window_bounds = array<i64: 1, 4>}, {pipeline_mode = #tpu.pipeline_mode<synchronous>, transform_indices = @transform_10, window_bounds = array<i64: 1, 4>}, {pipeline_mode = #tpu.pipeline_mode<synchronous>, transform_indices = @transform_11, window_bounds = array<i64: 36, 8>}, {pipeline_mode = #tpu.pipeline_mode<synchronous>, transform_indices = @transform_12, window_bounds = array<i64: 1, 8>}, {pipeline_mode = #tpu.pipeline_mode<synchronous>, transform_indices = @transform_13, window_bounds = array<i64: 1, 8>}, {pipeline_mode = #tpu.pipeline_mode<synchronous>, transform_indices = @transform_14, window_bounds = array<i64: 1, 8>}, {pipeline_mode = #tpu.pipeline_mode<synchronous>, transform_indices = @transform_15, window_bounds = array<i64: 1, 8>}, {pipeline_mode = #tpu.pipeline_mode<synchronous>, transform_indices = @transform_16, window_bounds = array<i64: 1, 1>}, {transform_indices = @transform_17, window_bounds = array<i64: 1, 64, 4>}]} {
    %c0 = arith.constant 0 : index
    %c0_0 = arith.constant 0 : index
    %c0_1 = arith.constant 0 : index
    %0 = vector.load %arg1[%c0, %c0_0, %c0_1] : memref<1x256x4xf32, #tpu.memory_space<vmem>>, vector<1x256x4xf32>
    %1 = vector.shape_cast %0 : vector<1x256x4xf32> to vector<256x4xf32>
    %c0_2 = arith.constant 0 : index
    %c0_3 = arith.constant 0 : index
    %c0_4 = arith.constant 0 : index
    %2 = vector.load %arg2[%c0_2, %c0_3, %c0_4] : memref<1x64x4xf32, #tpu.memory_space<vmem>>, vector<1x64x4xf32>
    %3 = vector.shape_cast %2 : vector<1x64x4xf32> to vector<64x4xf32>
    %c0_5 = arith.constant 0 : index
    %c0_6 = arith.constant 0 : index
    %4 = vector.load %arg3[%c0_5, %c0_6] : memref<256x1xi32, #tpu.memory_space<vmem>>, vector<256x1xi32>
    %c0_7 = arith.constant 0 : index
    %c0_8 = arith.constant 0 : index
    %5 = vector.load %arg4[%c0_7, %c0_8] : memref<64x1xi32, #tpu.memory_space<vmem>>, vector<64x1xi32>
    %c0_9 = arith.constant 0 : index
    %c0_10 = arith.constant 0 : index
    %6 = vector.load %arg6[%c0_9, %c0_10] : memref<1x4xf32, #tpu.memory_space<vmem>>, vector<1x4xf32>
    %7 = vector.broadcast %6 : vector<1x4xf32> to vector<256x4xf32>
    %8 = arith.mulf %1, %7 : vector<256x4xf32>
    %c0_11 = arith.constant 0 : index
    %c0_12 = arith.constant 0 : index
    %9 = vector.load %arg7[%c0_11, %c0_12] : memref<1x4xf32, #tpu.memory_space<vmem>>, vector<1x4xf32>
    %10 = vector.broadcast %9 : vector<1x4xf32> to vector<256x4xf32>
    %11 = arith.addf %8, %10 : vector<256x4xf32>
    %cst = arith.constant 0.000000e+00 : f32
    %12 = vector.broadcast %cst : f32 to vector<256x4xf32>
    %13 = arith.maximumf %11, %12 : vector<256x4xf32>
    %c0_13 = arith.constant 0 : index
    %c0_14 = arith.constant 0 : index
    %14 = vector.load %arg8[%c0_13, %c0_14] : memref<36x8xf32, #tpu.memory_space<vmem>>, vector<36x8xf32>
    %cst_15 = arith.constant 0.000000e+00 : f32
    %15 = vector.broadcast %cst_15 : f32 to vector<256x8xf32>
    %cst_16 = arith.constant 0.000000e+00 : f32
    %16 = vector.broadcast %cst_16 : f32 to vector<17x4xf32>
    %17 = vector.extract_strided_slice %13 {offsets = [0, 0], sizes = [239, 4], strides = [1, 1]} : vector<256x4xf32> to vector<239x4xf32>
    %18 = tpu.concatenate %16, %17 in 0 : vector<17x4xf32>, vector<239x4xf32> -> vector<256x4xf32>
    %c0_i32 = arith.constant 0 : i32
    %19 = vector.broadcast %c0_i32 : i32 to vector<256x1xi32>
    %20 = arith.cmpi ne, %4, %19 : vector<256x1xi32>
    %cst_17 = arith.constant 0.000000e+00 : f32
    %21 = vector.shape_cast %20 : vector<256x1xi1> to vector<256x1xi1>
    %22 = vector.broadcast %21 : vector<256x1xi1> to vector<256x4xi1>
    %23 = vector.broadcast %cst_17 : f32 to vector<256x4xf32>
    %24 = arith.select %22, %18, %23 : vector<256x4xi1>, vector<256x4xf32>
    %25 = vector.extract_strided_slice %14 {offsets = [0, 0], sizes = [4, 8], strides = [1, 1]} : vector<36x8xf32> to vector<4x8xf32>
    %cst_18 = arith.constant dense<0.000000e+00> : vector<256x8xf32>
    %26 = tpu.matmul %24, %25, %cst_18 {dimension_numbers = #tpu.dot_dimension_numbers<[1], [0], [0], [1], [0, 0, 1, 1], [], []>} : vector<256x4xf32>, vector<4x8xf32>, vector<256x8xf32> -> vector<256x8xf32>
    %27 = arith.addf %15, %26 : vector<256x8xf32>
    %cst_19 = arith.constant 0.000000e+00 : f32
    %28 = vector.broadcast %cst_19 : f32 to vector<16x4xf32>
    %29 = vector.extract_strided_slice %13 {offsets = [0, 0], sizes = [240, 4], strides = [1, 1]} : vector<256x4xf32> to vector<240x4xf32>
    %30 = tpu.concatenate %28, %29 in 0 : vector<16x4xf32>, vector<240x4xf32> -> vector<256x4xf32>
    %31 = vector.extract_strided_slice %14 {offsets = [4, 0], sizes = [4, 8], strides = [1, 1]} : vector<36x8xf32> to vector<4x8xf32>
    %cst_20 = arith.constant dense<0.000000e+00> : vector<256x8xf32>
    %32 = tpu.matmul %30, %31, %cst_20 {dimension_numbers = #tpu.dot_dimension_numbers<[1], [0], [0], [1], [0, 0, 1, 1], [], []>} : vector<256x4xf32>, vector<4x8xf32>, vector<256x8xf32> -> vector<256x8xf32>
    %33 = arith.addf %27, %32 : vector<256x8xf32>
    %cst_21 = arith.constant 0.000000e+00 : f32
    %34 = vector.broadcast %cst_21 : f32 to vector<15x4xf32>
    %35 = vector.extract_strided_slice %13 {offsets = [0, 0], sizes = [241, 4], strides = [1, 1]} : vector<256x4xf32> to vector<241x4xf32>
    %36 = tpu.concatenate %34, %35 in 0 : vector<15x4xf32>, vector<241x4xf32> -> vector<256x4xf32>
    %c15_i32 = arith.constant 15 : i32
    %37 = vector.broadcast %c15_i32 : i32 to vector<256x1xi32>
    %38 = arith.cmpi ne, %4, %37 : vector<256x1xi32>
    %cst_22 = arith.constant 0.000000e+00 : f32
    %39 = vector.shape_cast %38 : vector<256x1xi1> to vector<256x1xi1>
    %40 = vector.broadcast %39 : vector<256x1xi1> to vector<256x4xi1>
    %41 = vector.broadcast %cst_22 : f32 to vector<256x4xf32>
    %42 = arith.select %40, %36, %41 : vector<256x4xi1>, vector<256x4xf32>
    %43 = vector.extract_strided_slice %14 {offsets = [8, 0], sizes = [4, 8], strides = [1, 1]} : vector<36x8xf32> to vector<4x8xf32>
    %cst_23 = arith.constant dense<0.000000e+00> : vector<256x8xf32>
    %44 = tpu.matmul %42, %43, %cst_23 {dimension_numbers = #tpu.dot_dimension_numbers<[1], [0], [0], [1], [0, 0, 1, 1], [], []>} : vector<256x4xf32>, vector<4x8xf32>, vector<256x8xf32> -> vector<256x8xf32>
    %45 = arith.addf %33, %44 : vector<256x8xf32>
    %cst_24 = arith.constant 0.000000e+00 : f32
    %46 = vector.broadcast %cst_24 : f32 to vector<1x4xf32>
    %47 = vector.extract_strided_slice %13 {offsets = [0, 0], sizes = [255, 4], strides = [1, 1]} : vector<256x4xf32> to vector<255x4xf32>
    %48 = tpu.concatenate %46, %47 in 0 : vector<1x4xf32>, vector<255x4xf32> -> vector<256x4xf32>
    %c0_i32_25 = arith.constant 0 : i32
    %49 = vector.broadcast %c0_i32_25 : i32 to vector<256x1xi32>
    %50 = arith.cmpi ne, %4, %49 : vector<256x1xi32>
    %cst_26 = arith.constant 0.000000e+00 : f32
    %51 = vector.shape_cast %50 : vector<256x1xi1> to vector<256x1xi1>
    %52 = vector.broadcast %51 : vector<256x1xi1> to vector<256x4xi1>
    %53 = vector.broadcast %cst_26 : f32 to vector<256x4xf32>
    %54 = arith.select %52, %48, %53 : vector<256x4xi1>, vector<256x4xf32>
    %55 = vector.extract_strided_slice %14 {offsets = [12, 0], sizes = [4, 8], strides = [1, 1]} : vector<36x8xf32> to vector<4x8xf32>
    %cst_27 = arith.constant dense<0.000000e+00> : vector<256x8xf32>
    %56 = tpu.matmul %54, %55, %cst_27 {dimension_numbers = #tpu.dot_dimension_numbers<[1], [0], [0], [1], [0, 0, 1, 1], [], []>} : vector<256x4xf32>, vector<4x8xf32>, vector<256x8xf32> -> vector<256x8xf32>
    %57 = arith.addf %45, %56 : vector<256x8xf32>
    %58 = vector.extract_strided_slice %14 {offsets = [16, 0], sizes = [4, 8], strides = [1, 1]} : vector<36x8xf32> to vector<4x8xf32>
    %cst_28 = arith.constant dense<0.000000e+00> : vector<256x8xf32>
    %59 = tpu.matmul %13, %58, %cst_28 {dimension_numbers = #tpu.dot_dimension_numbers<[1], [0], [0], [1], [0, 0, 1, 1], [], []>} : vector<256x4xf32>, vector<4x8xf32>, vector<256x8xf32> -> vector<256x8xf32>
    %60 = arith.addf %57, %59 : vector<256x8xf32>
    %61 = vector.extract_strided_slice %13 {offsets = [1, 0], sizes = [255, 4], strides = [1, 1]} : vector<256x4xf32> to vector<255x4xf32>
    %cst_29 = arith.constant 0.000000e+00 : f32
    %62 = vector.broadcast %cst_29 : f32 to vector<1x4xf32>
    %63 = tpu.concatenate %61, %62 in 0 : vector<255x4xf32>, vector<1x4xf32> -> vector<256x4xf32>
    %c15_i32_30 = arith.constant 15 : i32
    %64 = vector.broadcast %c15_i32_30 : i32 to vector<256x1xi32>
    %65 = arith.cmpi ne, %4, %64 : vector<256x1xi32>
    %cst_31 = arith.constant 0.000000e+00 : f32
    %66 = vector.shape_cast %65 : vector<256x1xi1> to vector<256x1xi1>
    %67 = vector.broadcast %66 : vector<256x1xi1> to vector<256x4xi1>
    %68 = vector.broadcast %cst_31 : f32 to vector<256x4xf32>
    %69 = arith.select %67, %63, %68 : vector<256x4xi1>, vector<256x4xf32>
    %70 = vector.extract_strided_slice %14 {offsets = [20, 0], sizes = [4, 8], strides = [1, 1]} : vector<36x8xf32> to vector<4x8xf32>
    %cst_32 = arith.constant dense<0.000000e+00> : vector<256x8xf32>
    %71 = tpu.matmul %69, %70, %cst_32 {dimension_numbers = #tpu.dot_dimension_numbers<[1], [0], [0], [1], [0, 0, 1, 1], [], []>} : vector<256x4xf32>, vector<4x8xf32>, vector<256x8xf32> -> vector<256x8xf32>
    %72 = arith.addf %60, %71 : vector<256x8xf32>
    %73 = vector.extract_strided_slice %13 {offsets = [15, 0], sizes = [241, 4], strides = [1, 1]} : vector<256x4xf32> to vector<241x4xf32>
    %cst_33 = arith.constant 0.000000e+00 : f32
    %74 = vector.broadcast %cst_33 : f32 to vector<15x4xf32>
    %75 = tpu.concatenate %73, %74 in 0 : vector<241x4xf32>, vector<15x4xf32> -> vector<256x4xf32>
    %c0_i32_34 = arith.constant 0 : i32
    %76 = vector.broadcast %c0_i32_34 : i32 to vector<256x1xi32>
    %77 = arith.cmpi ne, %4, %76 : vector<256x1xi32>
    %cst_35 = arith.constant 0.000000e+00 : f32
    %78 = vector.shape_cast %77 : vector<256x1xi1> to vector<256x1xi1>
    %79 = vector.broadcast %78 : vector<256x1xi1> to vector<256x4xi1>
    %80 = vector.broadcast %cst_35 : f32 to vector<256x4xf32>
    %81 = arith.select %79, %75, %80 : vector<256x4xi1>, vector<256x4xf32>
    %82 = vector.extract_strided_slice %14 {offsets = [24, 0], sizes = [4, 8], strides = [1, 1]} : vector<36x8xf32> to vector<4x8xf32>
    %cst_36 = arith.constant dense<0.000000e+00> : vector<256x8xf32>
    %83 = tpu.matmul %81, %82, %cst_36 {dimension_numbers = #tpu.dot_dimension_numbers<[1], [0], [0], [1], [0, 0, 1, 1], [], []>} : vector<256x4xf32>, vector<4x8xf32>, vector<256x8xf32> -> vector<256x8xf32>
    %84 = arith.addf %72, %83 : vector<256x8xf32>
    %85 = vector.extract_strided_slice %13 {offsets = [16, 0], sizes = [240, 4], strides = [1, 1]} : vector<256x4xf32> to vector<240x4xf32>
    %cst_37 = arith.constant 0.000000e+00 : f32
    %86 = vector.broadcast %cst_37 : f32 to vector<16x4xf32>
    %87 = tpu.concatenate %85, %86 in 0 : vector<240x4xf32>, vector<16x4xf32> -> vector<256x4xf32>
    %88 = vector.extract_strided_slice %14 {offsets = [28, 0], sizes = [4, 8], strides = [1, 1]} : vector<36x8xf32> to vector<4x8xf32>
    %cst_38 = arith.constant dense<0.000000e+00> : vector<256x8xf32>
    %89 = tpu.matmul %87, %88, %cst_38 {dimension_numbers = #tpu.dot_dimension_numbers<[1], [0], [0], [1], [0, 0, 1, 1], [], []>} : vector<256x4xf32>, vector<4x8xf32>, vector<256x8xf32> -> vector<256x8xf32>
    %90 = arith.addf %84, %89 : vector<256x8xf32>
    %91 = vector.extract_strided_slice %13 {offsets = [17, 0], sizes = [239, 4], strides = [1, 1]} : vector<256x4xf32> to vector<239x4xf32>
    %cst_39 = arith.constant 0.000000e+00 : f32
    %92 = vector.broadcast %cst_39 : f32 to vector<17x4xf32>
    %93 = tpu.concatenate %91, %92 in 0 : vector<239x4xf32>, vector<17x4xf32> -> vector<256x4xf32>
    %c15_i32_40 = arith.constant 15 : i32
    %94 = vector.broadcast %c15_i32_40 : i32 to vector<256x1xi32>
    %95 = arith.cmpi ne, %4, %94 : vector<256x1xi32>
    %cst_41 = arith.constant 0.000000e+00 : f32
    %96 = vector.shape_cast %95 : vector<256x1xi1> to vector<256x1xi1>
    %97 = vector.broadcast %96 : vector<256x1xi1> to vector<256x4xi1>
    %98 = vector.broadcast %cst_41 : f32 to vector<256x4xf32>
    %99 = arith.select %97, %93, %98 : vector<256x4xi1>, vector<256x4xf32>
    %100 = vector.extract_strided_slice %14 {offsets = [32, 0], sizes = [4, 8], strides = [1, 1]} : vector<36x8xf32> to vector<4x8xf32>
    %cst_42 = arith.constant dense<0.000000e+00> : vector<256x8xf32>
    %101 = tpu.matmul %99, %100, %cst_42 {dimension_numbers = #tpu.dot_dimension_numbers<[1], [0], [0], [1], [0, 0, 1, 1], [], []>} : vector<256x4xf32>, vector<4x8xf32>, vector<256x8xf32> -> vector<256x8xf32>
    %102 = arith.addf %90, %101 : vector<256x8xf32>
    %103 = vector.extract_strided_slice %102 {offsets = [1, 0], sizes = [255, 8], strides = [1, 1]} : vector<256x8xf32> to vector<255x8xf32>
    %cst_43 = arith.constant 0.000000e+00 : f32
    %104 = vector.broadcast %cst_43 : f32 to vector<1x8xf32>
    %105 = tpu.concatenate %103, %104 in 0 : vector<255x8xf32>, vector<1x8xf32> -> vector<256x8xf32>
    %106 = arith.maximumf %102, %105 : vector<256x8xf32>
    %107 = vector.extract_strided_slice %106 {offsets = [16, 0], sizes = [240, 8], strides = [1, 1]} : vector<256x8xf32> to vector<240x8xf32>
    %cst_44 = arith.constant 0.000000e+00 : f32
    %108 = vector.broadcast %cst_44 : f32 to vector<16x8xf32>
    %109 = tpu.concatenate %107, %108 in 0 : vector<240x8xf32>, vector<16x8xf32> -> vector<256x8xf32>
    %110 = arith.maximumf %106, %109 : vector<256x8xf32>
    %c0_45 = arith.constant 0 : index
    %c0_46 = arith.constant 0 : index
    %111 = vector.load %arg5[%c0_45, %c0_46] : memref<64x256xf32, #tpu.memory_space<vmem>>, vector<64x256xf32>
    %cst_47 = arith.constant dense<0.000000e+00> : vector<64x8xf32>
    %112 = tpu.matmul %111, %110, %cst_47 {dimension_numbers = #tpu.dot_dimension_numbers<[1], [0], [0], [1], [0, 0, 1, 1], [], []>} : vector<64x256xf32>, vector<256x8xf32>, vector<64x8xf32> -> vector<64x8xf32>
    %c0_48 = arith.constant 0 : index
    %c0_49 = arith.constant 0 : index
    %113 = vector.load %arg9[%c0_48, %c0_49] : memref<1x8xf32, #tpu.memory_space<vmem>>, vector<1x8xf32>
    %114 = vector.broadcast %113 : vector<1x8xf32> to vector<64x8xf32>
    %115 = arith.addf %112, %114 : vector<64x8xf32>
    %c0_50 = arith.constant 0 : index
    %c0_51 = arith.constant 0 : index
    %116 = vector.load %arg10[%c0_50, %c0_51] : memref<1x4xf32, #tpu.memory_space<vmem>>, vector<1x4xf32>
    %117 = vector.broadcast %116 : vector<1x4xf32> to vector<64x4xf32>
    %118 = arith.mulf %3, %117 : vector<64x4xf32>
    %c0_52 = arith.constant 0 : index
    %c0_53 = arith.constant 0 : index
    %119 = vector.load %arg11[%c0_52, %c0_53] : memref<1x4xf32, #tpu.memory_space<vmem>>, vector<1x4xf32>
    %120 = vector.broadcast %119 : vector<1x4xf32> to vector<64x4xf32>
    %121 = arith.addf %118, %120 : vector<64x4xf32>
    %cst_54 = arith.constant 0.000000e+00 : f32
    %122 = vector.broadcast %cst_54 : f32 to vector<64x4xf32>
    %123 = arith.maximumf %121, %122 : vector<64x4xf32>
    %c0_55 = arith.constant 0 : index
    %c0_56 = arith.constant 0 : index
    %124 = vector.load %arg12[%c0_55, %c0_56] : memref<36x8xf32, #tpu.memory_space<vmem>>, vector<36x8xf32>
    %cst_57 = arith.constant 0.000000e+00 : f32
    %125 = vector.broadcast %cst_57 : f32 to vector<64x8xf32>
    %cst_58 = arith.constant 0.000000e+00 : f32
    %126 = vector.broadcast %cst_58 : f32 to vector<9x4xf32>
    %127 = vector.extract_strided_slice %123 {offsets = [0, 0], sizes = [55, 4], strides = [1, 1]} : vector<64x4xf32> to vector<55x4xf32>
    %128 = tpu.concatenate %126, %127 in 0 : vector<9x4xf32>, vector<55x4xf32> -> vector<64x4xf32>
    %c0_i32_59 = arith.constant 0 : i32
    %129 = vector.broadcast %c0_i32_59 : i32 to vector<64x1xi32>
    %130 = arith.cmpi ne, %5, %129 : vector<64x1xi32>
    %cst_60 = arith.constant 0.000000e+00 : f32
    %131 = vector.shape_cast %130 : vector<64x1xi1> to vector<64x1xi1>
    %132 = vector.broadcast %131 : vector<64x1xi1> to vector<64x4xi1>
    %133 = vector.broadcast %cst_60 : f32 to vector<64x4xf32>
    %134 = arith.select %132, %128, %133 : vector<64x4xi1>, vector<64x4xf32>
    %135 = vector.extract_strided_slice %124 {offsets = [0, 0], sizes = [4, 8], strides = [1, 1]} : vector<36x8xf32> to vector<4x8xf32>
    %cst_61 = arith.constant dense<0.000000e+00> : vector<64x8xf32>
    %136 = tpu.matmul %134, %135, %cst_61 {dimension_numbers = #tpu.dot_dimension_numbers<[1], [0], [0], [1], [0, 0, 1, 1], [], []>} : vector<64x4xf32>, vector<4x8xf32>, vector<64x8xf32> -> vector<64x8xf32>
    %137 = arith.addf %125, %136 : vector<64x8xf32>
    %cst_62 = arith.constant 0.000000e+00 : f32
    %138 = vector.broadcast %cst_62 : f32 to vector<8x4xf32>
    %139 = vector.extract_strided_slice %123 {offsets = [0, 0], sizes = [56, 4], strides = [1, 1]} : vector<64x4xf32> to vector<56x4xf32>
    %140 = tpu.concatenate %138, %139 in 0 : vector<8x4xf32>, vector<56x4xf32> -> vector<64x4xf32>
    %141 = vector.extract_strided_slice %124 {offsets = [4, 0], sizes = [4, 8], strides = [1, 1]} : vector<36x8xf32> to vector<4x8xf32>
    %cst_63 = arith.constant dense<0.000000e+00> : vector<64x8xf32>
    %142 = tpu.matmul %140, %141, %cst_63 {dimension_numbers = #tpu.dot_dimension_numbers<[1], [0], [0], [1], [0, 0, 1, 1], [], []>} : vector<64x4xf32>, vector<4x8xf32>, vector<64x8xf32> -> vector<64x8xf32>
    %143 = arith.addf %137, %142 : vector<64x8xf32>
    %cst_64 = arith.constant 0.000000e+00 : f32
    %144 = vector.broadcast %cst_64 : f32 to vector<7x4xf32>
    %145 = vector.extract_strided_slice %123 {offsets = [0, 0], sizes = [57, 4], strides = [1, 1]} : vector<64x4xf32> to vector<57x4xf32>
    %146 = tpu.concatenate %144, %145 in 0 : vector<7x4xf32>, vector<57x4xf32> -> vector<64x4xf32>
    %c7_i32 = arith.constant 7 : i32
    %147 = vector.broadcast %c7_i32 : i32 to vector<64x1xi32>
    %148 = arith.cmpi ne, %5, %147 : vector<64x1xi32>
    %cst_65 = arith.constant 0.000000e+00 : f32
    %149 = vector.shape_cast %148 : vector<64x1xi1> to vector<64x1xi1>
    %150 = vector.broadcast %149 : vector<64x1xi1> to vector<64x4xi1>
    %151 = vector.broadcast %cst_65 : f32 to vector<64x4xf32>
    %152 = arith.select %150, %146, %151 : vector<64x4xi1>, vector<64x4xf32>
    %153 = vector.extract_strided_slice %124 {offsets = [8, 0], sizes = [4, 8], strides = [1, 1]} : vector<36x8xf32> to vector<4x8xf32>
    %cst_66 = arith.constant dense<0.000000e+00> : vector<64x8xf32>
    %154 = tpu.matmul %152, %153, %cst_66 {dimension_numbers = #tpu.dot_dimension_numbers<[1], [0], [0], [1], [0, 0, 1, 1], [], []>} : vector<64x4xf32>, vector<4x8xf32>, vector<64x8xf32> -> vector<64x8xf32>
    %155 = arith.addf %143, %154 : vector<64x8xf32>
    %cst_67 = arith.constant 0.000000e+00 : f32
    %156 = vector.broadcast %cst_67 : f32 to vector<1x4xf32>
    %157 = vector.extract_strided_slice %123 {offsets = [0, 0], sizes = [63, 4], strides = [1, 1]} : vector<64x4xf32> to vector<63x4xf32>
    %158 = tpu.concatenate %156, %157 in 0 : vector<1x4xf32>, vector<63x4xf32> -> vector<64x4xf32>
    %c0_i32_68 = arith.constant 0 : i32
    %159 = vector.broadcast %c0_i32_68 : i32 to vector<64x1xi32>
    %160 = arith.cmpi ne, %5, %159 : vector<64x1xi32>
    %cst_69 = arith.constant 0.000000e+00 : f32
    %161 = vector.shape_cast %160 : vector<64x1xi1> to vector<64x1xi1>
    %162 = vector.broadcast %161 : vector<64x1xi1> to vector<64x4xi1>
    %163 = vector.broadcast %cst_69 : f32 to vector<64x4xf32>
    %164 = arith.select %162, %158, %163 : vector<64x4xi1>, vector<64x4xf32>
    %165 = vector.extract_strided_slice %124 {offsets = [12, 0], sizes = [4, 8], strides = [1, 1]} : vector<36x8xf32> to vector<4x8xf32>
    %cst_70 = arith.constant dense<0.000000e+00> : vector<64x8xf32>
    %166 = tpu.matmul %164, %165, %cst_70 {dimension_numbers = #tpu.dot_dimension_numbers<[1], [0], [0], [1], [0, 0, 1, 1], [], []>} : vector<64x4xf32>, vector<4x8xf32>, vector<64x8xf32> -> vector<64x8xf32>
    %167 = arith.addf %155, %166 : vector<64x8xf32>
    %168 = vector.extract_strided_slice %124 {offsets = [16, 0], sizes = [4, 8], strides = [1, 1]} : vector<36x8xf32> to vector<4x8xf32>
    %cst_71 = arith.constant dense<0.000000e+00> : vector<64x8xf32>
    %169 = tpu.matmul %123, %168, %cst_71 {dimension_numbers = #tpu.dot_dimension_numbers<[1], [0], [0], [1], [0, 0, 1, 1], [], []>} : vector<64x4xf32>, vector<4x8xf32>, vector<64x8xf32> -> vector<64x8xf32>
    %170 = arith.addf %167, %169 : vector<64x8xf32>
    %171 = vector.extract_strided_slice %123 {offsets = [1, 0], sizes = [63, 4], strides = [1, 1]} : vector<64x4xf32> to vector<63x4xf32>
    %cst_72 = arith.constant 0.000000e+00 : f32
    %172 = vector.broadcast %cst_72 : f32 to vector<1x4xf32>
    %173 = tpu.concatenate %171, %172 in 0 : vector<63x4xf32>, vector<1x4xf32> -> vector<64x4xf32>
    %c7_i32_73 = arith.constant 7 : i32
    %174 = vector.broadcast %c7_i32_73 : i32 to vector<64x1xi32>
    %175 = arith.cmpi ne, %5, %174 : vector<64x1xi32>
    %cst_74 = arith.constant 0.000000e+00 : f32
    %176 = vector.shape_cast %175 : vector<64x1xi1> to vector<64x1xi1>
    %177 = vector.broadcast %176 : vector<64x1xi1> to vector<64x4xi1>
    %178 = vector.broadcast %cst_74 : f32 to vector<64x4xf32>
    %179 = arith.select %177, %173, %178 : vector<64x4xi1>, vector<64x4xf32>
    %180 = vector.extract_strided_slice %124 {offsets = [20, 0], sizes = [4, 8], strides = [1, 1]} : vector<36x8xf32> to vector<4x8xf32>
    %cst_75 = arith.constant dense<0.000000e+00> : vector<64x8xf32>
    %181 = tpu.matmul %179, %180, %cst_75 {dimension_numbers = #tpu.dot_dimension_numbers<[1], [0], [0], [1], [0, 0, 1, 1], [], []>} : vector<64x4xf32>, vector<4x8xf32>, vector<64x8xf32> -> vector<64x8xf32>
    %182 = arith.addf %170, %181 : vector<64x8xf32>
    %183 = vector.extract_strided_slice %123 {offsets = [7, 0], sizes = [57, 4], strides = [1, 1]} : vector<64x4xf32> to vector<57x4xf32>
    %cst_76 = arith.constant 0.000000e+00 : f32
    %184 = vector.broadcast %cst_76 : f32 to vector<7x4xf32>
    %185 = tpu.concatenate %183, %184 in 0 : vector<57x4xf32>, vector<7x4xf32> -> vector<64x4xf32>
    %c0_i32_77 = arith.constant 0 : i32
    %186 = vector.broadcast %c0_i32_77 : i32 to vector<64x1xi32>
    %187 = arith.cmpi ne, %5, %186 : vector<64x1xi32>
    %cst_78 = arith.constant 0.000000e+00 : f32
    %188 = vector.shape_cast %187 : vector<64x1xi1> to vector<64x1xi1>
    %189 = vector.broadcast %188 : vector<64x1xi1> to vector<64x4xi1>
    %190 = vector.broadcast %cst_78 : f32 to vector<64x4xf32>
    %191 = arith.select %189, %185, %190 : vector<64x4xi1>, vector<64x4xf32>
    %192 = vector.extract_strided_slice %124 {offsets = [24, 0], sizes = [4, 8], strides = [1, 1]} : vector<36x8xf32> to vector<4x8xf32>
    %cst_79 = arith.constant dense<0.000000e+00> : vector<64x8xf32>
    %193 = tpu.matmul %191, %192, %cst_79 {dimension_numbers = #tpu.dot_dimension_numbers<[1], [0], [0], [1], [0, 0, 1, 1], [], []>} : vector<64x4xf32>, vector<4x8xf32>, vector<64x8xf32> -> vector<64x8xf32>
    %194 = arith.addf %182, %193 : vector<64x8xf32>
    %195 = vector.extract_strided_slice %123 {offsets = [8, 0], sizes = [56, 4], strides = [1, 1]} : vector<64x4xf32> to vector<56x4xf32>
    %cst_80 = arith.constant 0.000000e+00 : f32
    %196 = vector.broadcast %cst_80 : f32 to vector<8x4xf32>
    %197 = tpu.concatenate %195, %196 in 0 : vector<56x4xf32>, vector<8x4xf32> -> vector<64x4xf32>
    %198 = vector.extract_strided_slice %124 {offsets = [28, 0], sizes = [4, 8], strides = [1, 1]} : vector<36x8xf32> to vector<4x8xf32>
    %cst_81 = arith.constant dense<0.000000e+00> : vector<64x8xf32>
    %199 = tpu.matmul %197, %198, %cst_81 {dimension_numbers = #tpu.dot_dimension_numbers<[1], [0], [0], [1], [0, 0, 1, 1], [], []>} : vector<64x4xf32>, vector<4x8xf32>, vector<64x8xf32> -> vector<64x8xf32>
    %200 = arith.addf %194, %199 : vector<64x8xf32>
    %201 = vector.extract_strided_slice %123 {offsets = [9, 0], sizes = [55, 4], strides = [1, 1]} : vector<64x4xf32> to vector<55x4xf32>
    %cst_82 = arith.constant 0.000000e+00 : f32
    %202 = vector.broadcast %cst_82 : f32 to vector<9x4xf32>
    %203 = tpu.concatenate %201, %202 in 0 : vector<55x4xf32>, vector<9x4xf32> -> vector<64x4xf32>
    %c7_i32_83 = arith.constant 7 : i32
    %204 = vector.broadcast %c7_i32_83 : i32 to vector<64x1xi32>
    %205 = arith.cmpi ne, %5, %204 : vector<64x1xi32>
    %cst_84 = arith.constant 0.000000e+00 : f32
    %206 = vector.shape_cast %205 : vector<64x1xi1> to vector<64x1xi1>
    %207 = vector.broadcast %206 : vector<64x1xi1> to vector<64x4xi1>
    %208 = vector.broadcast %cst_84 : f32 to vector<64x4xf32>
    %209 = arith.select %207, %203, %208 : vector<64x4xi1>, vector<64x4xf32>
    %210 = vector.extract_strided_slice %124 {offsets = [32, 0], sizes = [4, 8], strides = [1, 1]} : vector<36x8xf32> to vector<4x8xf32>
    %cst_85 = arith.constant dense<0.000000e+00> : vector<64x8xf32>
    %211 = tpu.matmul %209, %210, %cst_85 {dimension_numbers = #tpu.dot_dimension_numbers<[1], [0], [0], [1], [0, 0, 1, 1], [], []>} : vector<64x4xf32>, vector<4x8xf32>, vector<64x8xf32> -> vector<64x8xf32>
    %212 = arith.addf %200, %211 : vector<64x8xf32>
    %c0_86 = arith.constant 0 : index
    %c0_87 = arith.constant 0 : index
    %213 = vector.load %arg13[%c0_86, %c0_87] : memref<1x8xf32, #tpu.memory_space<vmem>>, vector<1x8xf32>
    %214 = vector.broadcast %213 : vector<1x8xf32> to vector<64x8xf32>
    %215 = arith.addf %212, %214 : vector<64x8xf32>
    %216 = arith.addf %115, %215 : vector<64x8xf32>
    %c0_88 = arith.constant 0 : index
    %c0_89 = arith.constant 0 : index
    %217 = vector.load %arg14[%c0_88, %c0_89] : memref<1x8xf32, #tpu.memory_space<vmem>>, vector<1x8xf32>
    %218 = vector.broadcast %217 : vector<1x8xf32> to vector<64x8xf32>
    %219 = arith.mulf %216, %218 : vector<64x8xf32>
    %c0_90 = arith.constant 0 : index
    %c0_91 = arith.constant 0 : index
    %220 = vector.load %arg15[%c0_90, %c0_91] : memref<1x8xf32, #tpu.memory_space<vmem>>, vector<1x8xf32>
    %221 = vector.broadcast %220 : vector<1x8xf32> to vector<64x8xf32>
    %222 = arith.addf %219, %221 : vector<64x8xf32>
    %cst_92 = arith.constant 0.000000e+00 : f32
    %223 = vector.broadcast %cst_92 : f32 to vector<64x8xf32>
    %224 = arith.maximumf %222, %223 : vector<64x8xf32>
    %c0_93 = arith.constant 0 : index
    %c0_94 = arith.constant 0 : index
    %225 = vector.load %arg16[%c0_93, %c0_94] : memref<1x8xf32, #tpu.memory_space<vmem>>, vector<1x8xf32>
    %226 = vector.broadcast %225 : vector<1x8xf32> to vector<64x8xf32>
    %227 = arith.mulf %224, %226 : vector<64x8xf32>
    %cst_95 = arith.constant dense<0.000000e+00> : vector<64xf32>
    %228 = vector.multi_reduction <add>, %227, %cst_95 [1] : vector<64x8xf32> to vector<64xf32>
    %229 = vector.shape_cast %228 : vector<64xf32> to vector<64x1xf32>
    %c0_96 = arith.constant 0 : index
    %c0_97 = arith.constant 0 : index
    %230 = vector.load %arg17[%c0_96, %c0_97] : memref<1x1xf32, #tpu.memory_space<vmem>>, vector<1x1xf32>
    %231 = vector.broadcast %230 : vector<1x1xf32> to vector<64x1xf32>
    %232 = arith.addf %229, %231 : vector<64x1xf32>
    %233 = vector.broadcast %232 : vector<64x1xf32> to vector<64x4xf32>
    %234 = arith.mulf %233, %3 : vector<64x4xf32>
    %c0_98 = arith.constant 0 : index
    %c0_99 = arith.constant 0 : index
    %c0_100 = arith.constant 0 : index
    %235 = vector.load %arg18[%c0_98, %c0_99, %c0_100] : memref<1x64x4xf32, #tpu.memory_space<vmem>>, vector<1x64x4xf32>
    %236 = vector.shape_cast %235 : vector<1x64x4xf32> to vector<64x4xf32>
    %237 = vector.shape_cast %234 : vector<64x4xf32> to vector<1x64x4xf32>
    tpu.vector_store %arg18[%c0_98, %c0_99, %c0_100], %237 {strides = array<i32>} : memref<1x64x4xf32, #tpu.memory_space<vmem>>, vector<1x64x4xf32>,
    return
  }
  func.func @transform_0(%arg0: i32) -> (i32, i32, i32) {
    %c0_i32 = arith.constant 0 : i32
    %c0_i32_0 = arith.constant 0 : i32
    %c0_i32_1 = arith.constant 0 : i32
    return %arg0, %c0_i32, %c0_i32_0 : i32, i32, i32
  }
  func.func @transform_1(%arg0: i32) -> (i32, i32, i32) {
    %c0_i32 = arith.constant 0 : i32
    %c0_i32_0 = arith.constant 0 : i32
    %c0_i32_1 = arith.constant 0 : i32
    return %arg0, %c0_i32, %c0_i32_0 : i32, i32, i32
  }
  func.func @transform_2(%arg0: i32) -> (i32, i32) {
    %c0_i32 = arith.constant 0 : i32
    %c0_i32_0 = arith.constant 0 : i32
    %c0_i32_1 = arith.constant 0 : i32
    return %c0_i32, %c0_i32_0 : i32, i32
  }
  func.func @transform_3(%arg0: i32) -> (i32, i32) {
    %c0_i32 = arith.constant 0 : i32
    %c0_i32_0 = arith.constant 0 : i32
    %c0_i32_1 = arith.constant 0 : i32
    return %c0_i32, %c0_i32_0 : i32, i32
  }
  func.func @transform_4(%arg0: i32) -> (i32, i32) {
    %c0_i32 = arith.constant 0 : i32
    %c0_i32_0 = arith.constant 0 : i32
    %c0_i32_1 = arith.constant 0 : i32
    return %c0_i32, %c0_i32_0 : i32, i32
  }
  func.func @transform_5(%arg0: i32) -> (i32, i32) {
    %c0_i32 = arith.constant 0 : i32
    %c0_i32_0 = arith.constant 0 : i32
    %c0_i32_1 = arith.constant 0 : i32
    return %c0_i32, %c0_i32_0 : i32, i32
  }
  func.func @transform_6(%arg0: i32) -> (i32, i32) {
    %c0_i32 = arith.constant 0 : i32
    %c0_i32_0 = arith.constant 0 : i32
    %c0_i32_1 = arith.constant 0 : i32
    return %c0_i32, %c0_i32_0 : i32, i32
  }
  func.func @transform_7(%arg0: i32) -> (i32, i32) {
    %c0_i32 = arith.constant 0 : i32
    %c0_i32_0 = arith.constant 0 : i32
    %c0_i32_1 = arith.constant 0 : i32
    return %c0_i32, %c0_i32_0 : i32, i32
  }
  func.func @transform_8(%arg0: i32) -> (i32, i32) {
    %c0_i32 = arith.constant 0 : i32
    %c0_i32_0 = arith.constant 0 : i32
    %c0_i32_1 = arith.constant 0 : i32
    return %c0_i32, %c0_i32_0 : i32, i32
  }
  func.func @transform_9(%arg0: i32) -> (i32, i32) {
    %c0_i32 = arith.constant 0 : i32
    %c0_i32_0 = arith.constant 0 : i32
    %c0_i32_1 = arith.constant 0 : i32
    return %c0_i32, %c0_i32_0 : i32, i32
  }
  func.func @transform_10(%arg0: i32) -> (i32, i32) {
    %c0_i32 = arith.constant 0 : i32
    %c0_i32_0 = arith.constant 0 : i32
    %c0_i32_1 = arith.constant 0 : i32
    return %c0_i32, %c0_i32_0 : i32, i32
  }
  func.func @transform_11(%arg0: i32) -> (i32, i32) {
    %c0_i32 = arith.constant 0 : i32
    %c0_i32_0 = arith.constant 0 : i32
    %c0_i32_1 = arith.constant 0 : i32
    return %c0_i32, %c0_i32_0 : i32, i32
  }
  func.func @transform_12(%arg0: i32) -> (i32, i32) {
    %c0_i32 = arith.constant 0 : i32
    %c0_i32_0 = arith.constant 0 : i32
    %c0_i32_1 = arith.constant 0 : i32
    return %c0_i32, %c0_i32_0 : i32, i32
  }
  func.func @transform_13(%arg0: i32) -> (i32, i32) {
    %c0_i32 = arith.constant 0 : i32
    %c0_i32_0 = arith.constant 0 : i32
    %c0_i32_1 = arith.constant 0 : i32
    return %c0_i32, %c0_i32_0 : i32, i32
  }
  func.func @transform_14(%arg0: i32) -> (i32, i32) {
    %c0_i32 = arith.constant 0 : i32
    %c0_i32_0 = arith.constant 0 : i32
    %c0_i32_1 = arith.constant 0 : i32
    return %c0_i32, %c0_i32_0 : i32, i32
  }
  func.func @transform_15(%arg0: i32) -> (i32, i32) {
    %c0_i32 = arith.constant 0 : i32
    %c0_i32_0 = arith.constant 0 : i32
    %c0_i32_1 = arith.constant 0 : i32
    return %c0_i32, %c0_i32_0 : i32, i32
  }
  func.func @transform_16(%arg0: i32) -> (i32, i32) {
    %c0_i32 = arith.constant 0 : i32
    %c0_i32_0 = arith.constant 0 : i32
    %c0_i32_1 = arith.constant 0 : i32
    return %c0_i32, %c0_i32_0 : i32, i32
  }
  func.func @transform_17(%arg0: i32) -> (i32, i32, i32) {
    %c0_i32 = arith.constant 0 : i32
    %c0_i32_0 = arith.constant 0 : i32
    %c0_i32_1 = arith.constant 0 : i32
    return %arg0, %c0_i32, %c0_i32_0 : i32, i32, i32
  }
}

</mosaic_0001>

<bundles_post_ra>
// kernel: a_call__.1
= control target key start
LH: loop header
LB: loop body
LE: loop exit
PB: predicated region body
PF: predicated region fallthrough
CT: control target
= control target key end

     0   :  { %s8331_s26 = smov 0   ;;  %s10972_s0 = inlined_call_operand.vmem [shape: f32[2,256,4], index: 0, kind: input, shape index: {}]   ;;  %s10973_s1 = inlined_call_operand.vmem [shape: f32[2,64,4], index: 1, kind: input, shape index: {}]   ;;  %s10974_s2 = inlined_call_operand.vmem [shape: s32[256,1], index: 2, kind: input, shape index: {}]   ;;  %s10975_s3 = inlined_call_operand.vmem [shape: s32[64,1], index: 3, kind: input, shape index: {}]   ;;  %s10976_s4 = inlined_call_operand.vmem [shape: f32[64,256], index: 4, kind: input, shape index: {}]   ;;  %s10977_s5 = inlined_call_operand.vmem [shape: f32[1,4], index: 5, kind: input, shape index: {}]   ;;  %s10978_s6 = inlined_call_operand.vmem [shape: f32[1,4], index: 6, kind: input, shape index: {}]   ;;  %s10979_s7 = inlined_call_operand.vmem [shape: f32[36,8], index: 7, kind: input, shape index: {}]   ;;  %s10980_s8 = inlined_call_operand.vmem [shape: f32[1,8], index: 8, kind: input, shape index: {}]   ;;  %s10981_s9 = inlined_call_operand.vmem [shape: f32[1,4], index: 9, kind: input, shape index: {}]   ;;  %s10982_s10 = inlined_call_operand.vmem [shape: f32[1,4], index: 10, kind: input, shape index: {}]   ;;  %s10983_s11 = inlined_call_operand.vmem [shape: f32[36,8], index: 11, kind: input, shape index: {}]   ;;  %s10984_s12 = inlined_call_operand.vmem [shape: f32[1,8], index: 12, kind: input, shape index: {}]   ;;  %s10985_s13 = inlined_call_operand.vmem [shape: f32[1,8], index: 13, kind: input, shape index: {}]   ;;  %s10986_s14 = inlined_call_operand.vmem [shape: f32[1,8], index: 14, kind: input, shape index: {}]   ;;  %s10987_s15 = inlined_call_operand.vmem [shape: f32[1,8], index: 15, kind: input, shape index: {}]   ;;  %s10988_s16 = inlined_call_operand.<no memory space> [shape: f32[1,1], index: 16, kind: input, shape index: {}]   ;;  %s10989_s17 = inlined_call_operand.vmem [shape: f32[2,64,4], index: 17, kind: output, shape index: {}]  }
   0x1   :  { %11124 = sst [smem:[#allocation144_spill]] %s10972_s0  ;;  %v22_v0 = vstv %s10988_s16 }
   0x2   :  { %11125 = sst [smem:[#allocation145_spill]] %s10973_s1  ;;  %23 = vst [vmem:[#allocation2] sm:$0x1] %v22_v0 }
   0x3 LB: > { %s6455_s27 = sadd.s32 4294967295, %s8234_s26   ;;  %p6459_p0 = scmp.ge.s32.totalorder %s8234_s26, 1  ;;  %s8234_s26 = sphi %s8331_s26, %s29_s26  }
   0x4   : > { %p499_p1 = scmp.lt.s32.totalorder %s8234_s26, 3 }
   0x6   : > { %p500_p2 = pnand %p6459_p0, %p499_p1 }
   0x8   : > { %503 = sbr.rel (%p500_p2) target bundleno = 1446 (0x5a6), region = 88 }
   0xf   : > { %v8342_v1 = vld [vmem:[%s10974_s2 + $0x10] sm:$0xff]  ;;  %v8347_v2 = vld [vmem:[%s10974_s2] sm:$0xff]  ;;  %v8352_v3 = vld [vmem:[%s10974_s2 + $0x18] sm:$0xff]  ;;  %v10992_v4 = vmov 0   ;;  %v10990_v10 = vmov 0.0   ;;  %p556_p3 = scmp.lt.s32.totalorder %s6455_s27, 1 }
  0x10   : > { %8218 = vset.pattern.permute.xlu1 %v10992_v4  ;;  %8217 = vset.pattern.permute.xlu0 %v10992_v4  ;;  %vm889_vm0 = vcmp.ne.s32.totalorder %v8342_v1, 0  ;;  %vm887_vm1 = vcmp.ne.s32.totalorder %v8347_v2, 0  ;;  %vm890_vm2 = vcmp.ne.s32.totalorder %v8352_v3, 0  ;;  %v8362_v5 = vld [vmem:[%s10974_s2 + $0x8] sm:$0xff]  ;;  %v8375_v9 = vld [vmem:[%s10974_s2 + $0x20] sm:$0xff]  ;;  %v8385_v13 = vld [vmem:[%s10974_s2 + $0x38] sm:$0xff] }
  0x11   : > { %v921_v6 = vsel %vm889_vm0, 1, %v10992_v4  ;;  %v919_v7 = vsel %vm887_vm1, 1, %v10992_v4  ;;  %vm888_vm3 = vcmp.ne.s32.totalorder %v8362_v5, 0  ;;  %v8370_v8 = vld [vmem:[%s10974_s2 + $0x28] sm:$0xff]  ;;  %7281 = vmatprep.mubr.f32.mxu1 %v10990_v10  ;;  %v922_v11 = vsel %vm890_vm2, 1, %v10992_v4  ;;  %v8390_v14 = vld [vmem:[%s10974_s2 + $0x30] sm:$0xff] }
  0x12   : > { %958 = vperm.xlu1 %8218, %v921_v6   ;;  %952 = vperm.xlu0 %8217, %v919_v7   ;;  %v920_v12 = vsel %vm888_vm3, 1, %v10992_v4  ;;  %vm892_vm4 = vcmp.ne.s32.totalorder %v8370_v8, 0  ;;  %vm891_vm5 = vcmp.ne.s32.totalorder %v8375_v9, 0  ;;  %vm894_vm6 = vcmp.ne.s32.totalorder %v8385_v13, 0  ;;  %v8399_v17 = vld [vmem:[%s10974_s2 + $0x48] sm:$0xff]  ;;  %v8404_v18 = vld [vmem:[%s10974_s2 + $0x40] sm:$0xff] }
  0x13   : > { %v924_v15 = vsel %vm892_vm4, 1, %v10992_v4  ;;  %v923_v16 = vsel %vm891_vm5, 1, %v10992_v4  ;;  %vm893_vm7 = vcmp.ne.s32.totalorder %v8390_v14, 0  ;;  %v926_v19 = vsel %vm894_vm6, 1, %v10992_v4  ;;  %v8413_v21 = vld [vmem:[%s10974_s2 + $0x58] sm:$0xff]  ;;  %v8418_v22 = vld [vmem:[%s10974_s2 + $0x50] sm:$0xff] }
  0x14   : > { %v925_v20 = vsel %vm893_vm7, 1, %v10992_v4  ;;  %vm896_vm8 = vcmp.ne.s32.totalorder %v8399_v17, 0  ;;  %vm895_vm9 = vcmp.ne.s32.totalorder %v8404_v18, 0  ;;  %v761_v23 = vld [vmem:[%s10979_s7] sm:$0xff]  ;;  %vm898_vm10 = vcmp.ne.s32.totalorder %v8413_v21, 0  ;;  %v8432_v26 = vld [vmem:[%s10974_s2 + $0x68] sm:$0xff] }
  0x15   : > { %v928_v24 = vsel %vm896_vm8, 1, %v10992_v4  ;;  %v927_v25 = vsel %vm895_vm9, 1, %v10992_v4  ;;  %vm897_vm11 = vcmp.ne.s32.totalorder %v8418_v22, 0  ;;  %v8437_v27 = vld [vmem:[%s10974_s2 + $0x60] sm:$0xff]  ;;  %v1110_v28 = vrot.slane %v761_v23, 4  ;;  %s11466_s27 = smov (!%p556_p3, %s6455_s27), 1 }
  0x16   : > { %961 = vperm.xlu1 %8218, %v922_v11   ;;  %955 = vperm.xlu0 %8217, %v920_v12   ;;  %vm1175_vm12 = vcmask 1043456   ;;  %v930_v29 = vsel %vm898_vm10, 1, %v10992_v4  ;;  %v8447_v30 = vld [vmem:[%s10974_s2 + $0x78] sm:$0xff]  ;;  %s6842_s30 = sshll.u32 %s11466_s27, 8  ;;  %v8453_v31 = vld [vmem:[%s10977_s5] ss:$0 sm:$0xff] }
  0x17   : > { %v929_v32 = vsel %vm897_vm11, 1, %v10992_v4  ;;  %vm900_vm13 = vcmp.ne.s32.totalorder %v8432_v26, 0  ;;  %vm899_vm14 = vcmp.ne.s32.totalorder %v8437_v27, 0  ;;  %v8461_v33 = vld [vmem:[%s10974_s2 + $0x70] sm:$0xff]  ;;  %7279 = vmatprep.subr.msk.mxu1 %vm1175_vm12, %v1110_v28  ;;  %s11126_s23 = sld [smem:[#allocation144_spill]]  ;;  %vm902_vm15 = vcmp.ne.s32.totalorder %v8447_v30, 0 }
  0x18   : > { %v8472_v34 = vld [vmem:[%s10978_s6] ss:$0 sm:$0xff]  ;;  %7280 = vmatpush3.msk.msra.mxu1 %vm1175_vm12, %v1110_v28  ;;  %v932_v44 = vsel %vm900_vm13, 1, %v10992_v4  ;;  %v931_v45 = vsel %vm899_vm14, 1, %v10992_v4  ;;  %vm901_vm0 = vcmp.ne.s32.totalorder %v8461_v33, 0  ;;  %v8504_v52 = vld [vmem:[%s10979_s7 + $0x8] sm:$0xff] }
  0x19   : > { %7282 = vmatmul.mubr.f32.vlgmr.msra.gmra.mrb[0].mxu1 %v10990_v10  ;;  %7329 = vmatprep.subr.msk.mxu1 %vm1175_vm12, %v761_v23  ;;  %v8509_v53 = vld [vmem:[%s10974_s2 + $0x88] sm:$0xff]  ;;  %vm1111_vm1 = vcmask 31744   ;;  %v8519_v57 = vld [vmem:[%s10974_s2 + $0x80] sm:$0xff]  ;;  %v934_v0 = vsel %vm902_vm15, 1, %v10992_v4  ;;  %v933_v6 = vsel %vm901_vm0, 1, %v10992_v4  ;;  %v8543_v7 = vld [vmem:[%s10974_s2 + $0x98] sm:$0xff] }
  0x1a   : > { %967 = vperm.xlu1 %8218, %v924_v15   ;;  %964 = vperm.xlu0 %8217, %v923_v16   ;;  %vm904_vm2 = vcmp.ne.s32.totalorder %v8509_v53, 0  ;;  %vm903_vm3 = vcmp.ne.s32.totalorder %v8519_v57, 0  ;;  %v8554_v16 = vld [vmem:[%s10974_s2 + $0x90] sm:$0xff]  ;;  %vm906_vm4 = vcmp.ne.s32.totalorder %v8543_v7, 0  ;;  %s6843_s29 = sshll.u32 %s11466_s27, 6 }
  0x1b   : > { %7330 = vmatpush3.msk.msra.mxu1 %vm1175_vm12, %v761_v23  ;;  %v936_v28 = vsel %vm904_vm2, 1, %v10992_v4  ;;  %vm905_vm5 = vcmp.ne.s32.totalorder %v8554_v16, 0  ;;  %s10943_s22 = scalar_lea.vmem %s10989_s17, %s6843_s29 }
  0x1c   : > { %7379 = vmatprep.subr.msk.mxu1 %vm1175_vm12, %v8504_v52 }
  0x1d   : > { %s8467_s24 = scalar_lea.vmem %s11126_s23, %s6842_s30  ;;  %s11233_s30 = sld [smem:[#allocation145_spill]] }
  0x1e   : > { %973 = vperm.xlu1 %8218, %v926_v19   ;;  %970 = vperm.xlu0 %8217, %v925_v20   ;;  %v571_v35 = vld [vmem:[%s8467_s24] sm:$0xff]  ;;  %v572_v36 = vld [vmem:[%s8467_s24 + $0x8] sm:$0xff]  ;;  %v573_v37 = vld [vmem:[%s8467_s24 + $0x10] sm:$0xff] }
  0x1f   : > { %v658_v38 = vmul.f32 %v8453_v31, %v571_v35  ;;  %v659_v39 = vmul.f32 %v8453_v31, %v572_v36  ;;  %v660_v40 = vmul.f32 %v8453_v31, %v573_v37  ;;  %v574_v41 = vld [vmem:[%s8467_s24 + $0x18] sm:$0xff]  ;;  %v575_v42 = vld [vmem:[%s8467_s24 + $0x20] sm:$0xff]  ;;  %v576_v43 = vld [vmem:[%s8467_s24 + $0x28] sm:$0xff] }
  0x20   : > { %v661_v46 = vmul.f32 %v8453_v31, %v574_v41  ;;  %v662_v47 = vmul.f32 %v8453_v31, %v575_v42  ;;  %v577_v48 = vld [vmem:[%s8467_s24 + $0x30] sm:$0xff]  ;;  %v663_v56 = vmul.f32 %v8453_v31, %v576_v43  ;;  %v578_v62 = vld [vmem:[%s8467_s24 + $0x38] sm:$0xff]  ;;  %v579_v63 = vld [vmem:[%s8467_s24 + $0x40] sm:$0xff] }
  0x21   : > { %v697_v49 = vadd.f32 %v8472_v34, %v658_v38  ;;  %v698_v50 = vadd.f32 %v8472_v34, %v659_v39  ;;  %v699_v51 = vadd.f32 %v8472_v34, %v660_v40  ;;  %v664_v61 = vmul.f32 %v8453_v31, %v577_v48  ;;  %v8586_v38 = vld [vmem:[%s10974_s2 + $0xa0] sm:$0xff]  ;;  %v582_v42 = vld [vmem:[%s8467_s24 + $0x58] sm:$0xff] }
  0x22   : > { %979 = vperm.xlu1 %8218, %v928_v24   ;;  %976 = vperm.xlu0 %8217, %v927_v25   ;;  %v700_v54 = vadd.f32 %v8472_v34, %v661_v46  ;;  %v701_v55 = vadd.f32 %v8472_v34, %v662_v47  ;;  %v702_v12 = vadd.f32 %v8472_v34, %v663_v56  ;;  %v580_v24 = vld [vmem:[%s8467_s24 + $0x48] sm:$0xff]  ;;  %v581_v25 = vld [vmem:[%s8467_s24 + $0x50] sm:$0xff]  ;;  %v583_v43 = vld [vmem:[%s8467_s24 + $0x60] sm:$0xff]  ;;  %vm907_vm7 = vcmp.ne.s32.totalorder %v8586_v38, 0 }
  0x23   : > { %v8521_v58 = vmax.f32 %v697_v49, 0.0  ;;  %v8523_v59 = vmax.f32 %v698_v50, 0.0  ;;  %v8525_v60 = vmax.f32 %v699_v51, 0.0  ;;  %v665_v15 = vmul.f32 %v8453_v31, %v578_v62  ;;  %v8607_v46 = vld [vmem:[%s10974_s2 + $0xb8] sm:$0xff]  ;;  %v8618_v50 = vld [vmem:[%s10974_s2 + $0xb0] sm:$0xff]  ;;  %v584_v56 = vld [vmem:[%s8467_s24 + $0x68] sm:$0xff]  ;;  %s9734_s18 = scalar_lea.vmem %s11233_s30, %s6843_s29 }
  0x24   : > { %v8547_v11 = vmax.f32 %v700_v54, 0.0  ;;  %v8558_v19 = vmax.f32 %v701_v55, 0.0  ;;  %v703_v20 = vadd.f32 %v8472_v34, %v664_v61  ;;  %v666_v23 = vmul.f32 %v8453_v31, %v579_v63  ;;  %v585_v61 = vld [vmem:[%s8467_s24 + $0x70] sm:$0xff] }
  0x25   : > { %11127 = vst [vmem:[#allocation3_spill] sm:$0xff] %v8525_v60  ;;  %7284 = vmatprep.mubr.msk.f32.mxu1 %vm1111_vm1, %v8521_v58  ;;  %v8579_v35 = vmax.f32 %v702_v12, 0.0  ;;  %v704_v36 = vadd.f32 %v8472_v34, %v665_v15  ;;  %v667_v37 = vmul.f32 %v8453_v31, %v580_v24  ;;  %v668_v41 = vmul.f32 %v8453_v31, %v581_v25 }
  0x26   : > { %985 = vperm.xlu1 %8218, %v930_v29   ;;  %982 = vperm.xlu0 %8217, %v929_v32   ;;  %11128 = vst [vmem:[#allocation4_spill] sm:$0xff] %v8547_v11  ;;  %11129 = vst [vmem:[#allocation5_spill] sm:$0xff] %v8558_v19  ;;  %v935_v29 = vsel %vm903_vm3, 1, %v10992_v4  ;;  %v8575_v32 = vld [vmem:[%s10974_s2 + $0xa8] sm:$0xff]  ;;  %v8590_v39 = vmax.f32 %v703_v20, 0.0  ;;  %v705_v40 = vadd.f32 %v8472_v34, %v666_v23  ;;  %v939_v63 = vsel %vm907_vm7, 1, %v10992_v4 }
  0x27   : > { %7285 = vmatmul.mubr.msk.f32.gmra.mrb[2].mxu1 %vm1111_vm1, %v8523_v59  ;;  %11130 = vst [vmem:[#allocation6_spill] sm:$0xff] %v8579_v35  ;;  %vm908_vm6 = vcmp.ne.s32.totalorder %v8575_v32, 0  ;;  %v8611_v47 = vmax.f32 %v704_v36, 0.0  ;;  %v706_v48 = vadd.f32 %v8472_v34, %v667_v37  ;;  %v669_v49 = vmul.f32 %v8453_v31, %v582_v42  ;;  %v8650_v20 = vld [vmem:[%s10974_s2 + $0xc0] sm:$0xff] }
  0x28   : > { %7287 = vmatprep.mubr.msk.f32.mxu1 %vm1111_vm1, %v8525_v60  ;;  %11131 = vst [vmem:[#allocation7_spill] sm:$0xff] %v8590_v39  ;;  %v8622_v51 = vmax.f32 %v705_v40, 0.0  ;;  %v707_v54 = vadd.f32 %v8472_v34, %v668_v41  ;;  %v670_v55 = vmul.f32 %v8453_v31, %v583_v43  ;;  %v940_v62 = vsel %vm908_vm6, 1, %v10992_v4  ;;  %v8671_v40 = vld [vmem:[%s10974_s2 + $0xd8] sm:$0xff] }
  0x29   : > { %11132 = vst [vmem:[#allocation8_spill] sm:$0xff] %v8611_v47  ;;  %vm910_vm8 = vcmp.ne.s32.totalorder %v8607_v46, 0  ;;  %vm909_vm9 = vcmp.ne.s32.totalorder %v8618_v50, 0  ;;  %v708_v12 = vadd.f32 %v8472_v34, %v669_v49  ;;  %v671_v15 = vmul.f32 %v8453_v31, %v584_v56 }
  0x2a   : > { %991 = vperm.xlu1 %8218, %v932_v44   ;;  %988 = vperm.xlu0 %8217, %v931_v45   ;;  %v938_v44 = vsel %vm906_vm4, 1, %v10992_v4  ;;  %v937_v45 = vsel %vm905_vm5, 1, %v10992_v4  ;;  %11133 = vst [vmem:[#allocation9_spill] sm:$0xff] %v8622_v51  ;;  %v8654_v23 = vmax.f32 %v707_v54, 0.0  ;;  %v709_v24 = vadd.f32 %v8472_v34, %v670_v55  ;;  %v588_v54 = vld [vmem:[%s8467_s24 + $0x88] sm:$0xff]  ;;  %v589_v55 = vld [vmem:[%s8467_s24 + $0x90] sm:$0xff] }
  0x2b   : > { %7288 = vmatmul.mubr.msk.f32.gmra.mrb[4].mxu1 %vm1111_vm1, %v8547_v11  ;;  %v672_v25 = vmul.f32 %v8453_v31, %v585_v61  ;;  %v942_v36 = vsel %vm910_vm8, 1, %v10992_v4  ;;  %v941_v37 = vsel %vm909_vm9, 1, %v10992_v4  ;;  %vm911_vm11 = vcmp.ne.s32.totalorder %v8650_v20, 0 }
  0x2c   : > { %7290 = vmatprep.mubr.msk.f32.mxu1 %vm1111_vm1, %v8558_v19  ;;  %11135 = vst [vmem:[#allocation11_spill] sm:$0xff] %v8654_v23  ;;  %v8675_v41 = vmax.f32 %v708_v12, 0.0  ;;  %v710_v42 = vadd.f32 %v8472_v34, %v671_v15  ;;  %v943_v61 = vsel %vm911_vm11, 1, %v10992_v4  ;;  %vm914_vm13 = vcmp.ne.s32.totalorder %v8671_v40, 0 }
  0x2d   : > { %v675_v15 = vmul.f32 %v8453_v31, %v588_v54  ;;  %vm1816_vm4 = vcmp.ne.s32.totalorder %v8362_v5, 15  ;;  %vm1815_vm5 = vcmp.ne.s32.totalorder %v8347_v2, 15  ;;  %vm1818_vm6 = vcmp.ne.s32.totalorder %v8352_v3, 15 }
  0x2e   : > { %997 = vperm.xlu1 %8218, %v934_v0   ;;  %994 = vperm.xlu0 %8217, %v933_v6   ;;  %v8639_v0 = vld [vmem:[%s10974_s2 + $0xc8] sm:$0xff]  ;;  %v8643_v6 = vmax.f32 %v706_v48, 0.0  ;;  %11136 = vst [vmem:[#allocation12_spill] sm:$0xff] %v8675_v41  ;;  %v711_v48 = vadd.f32 %v8472_v34, %v672_v25  ;;  %vm1817_vm7 = vcmp.ne.s32.totalorder %v8342_v1, 15  ;;  %vm1820_vm8 = vcmp.ne.s32.totalorder %v8370_v8, 15 }
  0x2f   : > { %7291 = vmatmul.mubr.msk.f32.gmra.mrb[6].mxu1 %vm1111_vm1, %v8579_v35  ;;  %vm912_vm10 = vcmp.ne.s32.totalorder %v8639_v0, 0  ;;  %v714_v54 = vadd.f32 %v8472_v34, %v675_v15  ;;  %v593_v15 = vld [vmem:[%s8467_s24 + $0xb0] sm:$0xff]  ;;  %vm1819_vm9 = vcmp.ne.s32.totalorder %v8375_v9, 15  ;;  %vm1821_vm11 = vcmp.ne.s32.totalorder %v8390_v14, 15 }
  0x30   : > { %7293 = vmatprep.mubr.msk.f32.mxu1 %vm1111_vm1, %v8590_v39  ;;  %11134 = vst [vmem:[#allocation10_spill] sm:$0xff] %v8643_v6  ;;  %v944_v56 = vsel %vm912_vm10, 1, %v10992_v4  ;;  %v8718_v25 = vmax.f32 %v711_v48, 0.0  ;;  %v8735_v48 = vld [vmem:[%s10974_s2 + $0xf8] sm:$0xff]  ;;  %vm1822_vm10 = vcmp.ne.s32.totalorder %v8385_v13, 15 }
  0x31   : > { %vm918_vm2 = vcmp.ne.s32.totalorder %v8735_v48, 0 }
  0x32   : > { %1003 = vperm.xlu1 %8218, %v936_v28   ;;  %1000 = vperm.xlu0 %8217, %v935_v29   ;;  %v586_v28 = vld [vmem:[%s8467_s24 + $0x78] sm:$0xff]  ;;  %v587_v29 = vld [vmem:[%s8467_s24 + $0x80] sm:$0xff]  ;;  %11139 = vst [vmem:[#allocation15_spill] sm:$0xff] %v8718_v25 }
  0x33   : > { %7294 = vmatmul.mubr.msk.f32.gmra.mrb[8].mxu1 %vm1111_vm1, %v8611_v47  ;;  %v673_v43 = vmul.f32 %v8453_v31, %v586_v28  ;;  %v674_v49 = vmul.f32 %v8453_v31, %v587_v29  ;;  %v676_v29 = vmul.f32 %v8453_v31, %v589_v55 }
  0x34   : > { %7296 = vmatprep.mubr.msk.f32.mxu1 %vm1111_vm1, %v8622_v51 }
  0x35   : > { %v712_v12 = vadd.f32 %v8472_v34, %v673_v43  ;;  %v713_v28 = vadd.f32 %v8472_v34, %v674_v49  ;;  %v715_v10 = vadd.f32 %v8472_v34, %v676_v29 }
  0x36   : > { %1009 = vperm.xlu1 %8218, %v938_v44   ;;  %1006 = vperm.xlu0 %8217, %v937_v45   ;;  %v8682_v44 = vld [vmem:[%s10974_s2 + $0xd0] sm:$0xff]  ;;  %v8686_v45 = vmax.f32 %v709_v24, 0.0  ;;  %v8714_v24 = vld [vmem:[%s10974_s2 + $0xe0] sm:$0xff] }
  0x37   : > { %7297 = vmatmul.mubr.msk.f32.gmra.mrb[10].mxu1 %vm1111_vm1, %v8643_v6  ;;  %vm913_vm14 = vcmp.ne.s32.totalorder %v8682_v44, 0  ;;  %vm915_vm0 = vcmp.ne.s32.totalorder %v8714_v24, 0  ;;  %v8739_v49 = vmax.f32 %v712_v12, 0.0  ;;  %v592_v12 = vld [vmem:[%s8467_s24 + $0xa8] sm:$0xff] }
  0x38   : > { %7299 = vmatprep.mubr.msk.f32.mxu1 %vm1111_vm1, %v8654_v23  ;;  %11137 = vst [vmem:[#allocation13_spill] sm:$0xff] %v8686_v45  ;;  %v945_v43 = vsel %vm913_vm14, 1, %v10992_v4  ;;  %v596_v23 = vld [vmem:[%s8467_s24 + $0xc8] sm:$0xff]  ;;  %vm1823_vm14 = vcmp.ne.s32.totalorder %v8404_v18, 15 }
  0x39   : > { %11140 = vst [vmem:[#allocation16_spill] sm:$0xff] %v8739_v49  ;;  %v683_v5 = vmul.f32 %v8453_v31, %v596_v23 }
  0x3a   : > { %1015 = vperm.xlu1 %8218, %v940_v62   ;;  %1012 = vperm.xlu0 %8217, %v939_v63   ;;  %v8703_v62 = vld [vmem:[%s10974_s2 + $0xe8] sm:$0xff]  ;;  %v8707_v63 = vmax.f32 %v710_v42, 0.0  ;;  %v946_v42 = vsel %vm914_vm13, 1, %v10992_v4  ;;  %vm1824_vm13 = vcmp.ne.s32.totalorder %v8399_v17, 15 }
  0x3b   : > { %7300 = vmatmul.mubr.msk.f32.gmra.mrb[12].mxu1 %vm1111_vm1, %v8675_v41  ;;  %vm916_vm15 = vcmp.ne.s32.totalorder %v8703_v62, 0  ;;  %v594_v41 = vld [vmem:[%s8467_s24 + $0xb8] sm:$0xff] }
  0x3c   : > { %11138 = vst [vmem:[#allocation14_spill] sm:$0xff] %v8707_v63  ;;  %7302 = vmatprep.mubr.msk.f32.mxu1 %vm1111_vm1, %v8686_v45  ;;  %v680_v45 = vmul.f32 %v8453_v31, %v593_v15 }
  0x3e   : > { %1021 = vperm.xlu1 %8218, %v942_v36   ;;  %1018 = vperm.xlu0 %8217, %v941_v37   ;;  %v590_v36 = vld [vmem:[%s8467_s24 + $0x98] sm:$0xff]  ;;  %v591_v37 = vld [vmem:[%s8467_s24 + $0xa0] sm:$0xff]  ;;  %v719_v15 = vadd.f32 %v8472_v34, %v680_v45 }
  0x3f   : > { %7303 = vmatmul.mubr.msk.f32.gmra.mrb[14].mxu1 %vm1111_vm1, %v8707_v63  ;;  %v677_v55 = vmul.f32 %v8453_v31, %v590_v36  ;;  %v678_v4 = vmul.f32 %v8453_v31, %v591_v37  ;;  %v11142_v36 = vmov 0   ;;  %v679_v37 = vmul.f32 %v8453_v31, %v592_v12 }
  0x40   : > { %7305 = vmatprep.mubr.msk.f32.mxu1 %vm1111_vm1, %v8718_v25  ;;  %v948_v63 = vsel %vm916_vm15, 1, %v11142_v36  ;;  %v947_v25 = vsel %vm915_vm0, 1, %v11142_v36  ;;  %v2430_v12 = vrot.slane %v8504_v52, 4  ;;  %v1847_v45 = vsel %vm1815_vm5, 1, %v11142_v36 }
  0x41   : > { %v716_v29 = vadd.f32 %v8472_v34, %v677_v55  ;;  %v8822_v2 = vmax.f32 %v719_v15, 0.0  ;;  %v1850_v23 = vsel %vm1818_vm6, 1, %v11142_v36  ;;  %v1852_v9 = vsel %vm1820_vm8, 1, %v11142_v36 }
  0x42   : > { %1027 = vperm.xlu1 %8218, %v944_v56   ;;  %1024 = vperm.xlu0 %8217, %v943_v61   ;;  %v8746_v56 = vld [vmem:[%s10974_s2 + $0xf0] sm:$0xff]  ;;  %v8750_v61 = vmax.f32 %v713_v28, 0.0  ;;  %v8766_v28 = vmax.f32 %v714_v54, 0.0  ;;  %v950_v54 = vsel %vm918_vm2, 1, %v11142_v36  ;;  %v1854_v13 = vsel %vm1822_vm10, 1, %v11142_v36 }
  0x43   : > { %vm917_vm3 = vcmp.ne.s32.totalorder %v8746_v56, 0  ;;  %7306 = vmatmul.mubr.msk.f32.gmra.mrb[16].mxu1 %vm1111_vm1, %v8739_v49  ;;  %v595_v49 = vld [vmem:[%s8467_s24 + $0xc0] sm:$0xff]  ;;  %7429 = vmatprep.subr.msk.mxu0 %vm1175_vm12, %v2430_v12  ;;  %11148 = vst [vmem:[#allocation23_spill] sm:$0xff] %v8822_v2  ;;  %v1853_v14 = vsel %vm1821_vm11, 1, %v11142_v36  ;;  %v1856_v18 = vsel %vm1824_vm13, 1, %v11142_v36  ;;  %vm1826_vm15 = vcmp.ne.s32.totalorder %v8413_v21, 15 }
  0x44   : > { %11141 = vst [vmem:[#allocation17_spill] sm:$0xff] %v8750_v61  ;;  %11143 = vst [vmem:[#allocation18_spill] sm:$0xff] %v8766_v28  ;;  %7308 = vmatprep.mubr.msk.f32.mxu1 %vm1111_vm1, %v8750_v61  ;;  %v949_v55 = vsel %vm917_vm3, 1, %v11142_v36  ;;  %v682_v61 = vmul.f32 %v8453_v31, %v595_v49  ;;  %7430 = vmatpush3.msk.msra.mxu0 %vm1175_vm12, %v2430_v12  ;;  %v599_v12 = vld [vmem:[%s8467_s24 + $0xe0] sm:$0xff]  ;;  %vm1825_vm0 = vcmp.ne.s32.totalorder %v8418_v22, 15  ;;  %v1858_v21 = vsel %vm1826_vm15, 1, %v11142_v36 }
  0x45   : > { %v686_v8 = vmul.f32 %v8453_v31, %v599_v12  ;;  %v601_v12 = vld [vmem:[%s8467_s24 + $0xf0] sm:$0xff]  ;;  %v1857_v22 = vsel %vm1825_vm0, 1, %v11142_v36  ;;  %vm1828_vm2 = vcmp.ne.s32.totalorder %v8432_v26, 15  ;;  %vm1827_vm3 = vcmp.ne.s32.totalorder %v8437_v27, 15 }
  0x46   : > { %1033 = vperm.xlu1 %8218, %v946_v42   ;;  %1030 = vperm.xlu0 %8217, %v945_v43   ;;  %v8772_v42 = vmax.f32 %v715_v10, 0.0  ;;  %v717_v43 = vadd.f32 %v8472_v34, %v678_v4  ;;  %v8785_v4 = vmax.f32 %v716_v29, 0.0  ;;  %v718_v10 = vadd.f32 %v8472_v34, %v679_v37  ;;  %v8800_v29 = vld [vmem:[%s10979_s7 + $0x10] sm:$0xff] }
  0x47   : > { %7309 = vmatmul.mubr.msk.f32.gmra.mrb[18].mxu1 %vm1111_vm1, %v8766_v28  ;;  %v1848_v37 = vsel %vm1816_vm4, 1, %v11142_v36  ;;  %7479 = vmatprep.subr.msk.mxu0 %vm1175_vm12, %v8800_v29  ;;  %vm1830_vm4 = vcmp.ne.s32.totalorder %v8447_v30, 15  ;;  %vm1829_vm5 = vcmp.ne.s32.totalorder %v8461_v33, 15  ;;  %vm1832_vm6 = vcmp.ne.s32.totalorder %v8509_v53, 15 }
  0x48   : > { %11144 = vst [vmem:[#allocation19_spill] sm:$0xff] %v8772_v42  ;;  %11145 = vst [vmem:[#allocation20_spill] sm:$0xff] %v8785_v4  ;;  %7311 = vmatprep.mubr.msk.f32.mxu1 %vm1111_vm1, %v8772_v42  ;;  %v8814_v49 = vmax.f32 %v718_v10, 0.0  ;;  %v1849_v10 = vsel %vm1817_vm7, 1, %v11142_v36  ;;  %v1862_v26 = vsel %vm1830_vm4, 1, %v11142_v36  ;;  %v1861_v27 = vsel %vm1829_vm5, 1, %v11142_v36 }
  0x49   : > { %vm1831_vm7 = vcmp.ne.s32.totalorder %v8519_v57, 15  ;;  %v1864_v30 = vsel %vm1832_vm6, 1, %v11142_v36  ;;  %vm1834_vm8 = vcmp.ne.s32.totalorder %v8543_v7, 15  ;;  %vm1836_vm10 = vcmp.ne.s32.totalorder %v8575_v32, 15 }
  0x4a   : > { %1039 = vperm.xlu1 %8218, %v948_v63   ;;  %1036 = vperm.xlu0 %8217, %v947_v25   ;;  %v681_v63 = vmul.f32 %v8453_v31, %v594_v41  ;;  %v8791_v25 = vmax.f32 %v717_v43, 0.0  ;;  %v597_v41 = vld [vmem:[%s8467_s24 + $0xd0] sm:$0xff]  ;;  %11147 = vst [vmem:[#allocation22_spill] sm:$0xff] %v8814_v49  ;;  %v1863_v33 = vsel %vm1831_vm7, 1, %v11142_v36  ;;  %vm1835_vm11 = vcmp.ne.s32.totalorder %v8586_v38, 15 }
  0x4b   : > { %7312 = vmatmul.mubr.msk.f32.gmra.mrb[20].mxu1 %vm1111_vm1, %v8785_v4  ;;  %v684_v1 = vmul.f32 %v8453_v31, %v597_v41  ;;  %v1868_v53 = vsel %vm1836_vm10, 1, %v11142_v36  ;;  %v1867_v57 = vsel %vm1835_vm11, 1, %v11142_v36  ;;  %vm1838_vm13 = vcmp.ne.s32.totalorder %v8607_v46, 15 }
  0x4c   : > { %11146 = vst [vmem:[#allocation21_spill] sm:$0xff] %v8791_v25  ;;  %v720_v43 = vadd.f32 %v8472_v34, %v681_v63  ;;  %7314 = vmatprep.mubr.msk.f32.mxu1 %vm1111_vm1, %v8791_v25  ;;  %v722_v63 = vadd.f32 %v8472_v34, %v683_v5  ;;  %v1870_v7 = vsel %vm1838_vm13, 1, %v11142_v36  ;;  %vm1840_vm15 = vcmp.ne.s32.totalorder %v8639_v0, 15 }
  0x4d   : > { %v723_v41 = vadd.f32 %v8472_v34, %v684_v1  ;;  %vm1839_vm0 = vcmp.ne.s32.totalorder %v8650_v20, 15  ;;  %v1872_v32 = vsel %vm1840_vm15, 1, %v11142_v36  ;;  %vm1844_vm4 = vcmp.ne.s32.totalorder %v8703_v62, 15 }
  0x4e   : > { %1045 = vperm.xlu1 %8218, %v950_v54   ;;  %1042 = vperm.xlu0 %8217, %v949_v55   ;;  %v721_v54 = vadd.f32 %v8472_v34, %v682_v61  ;;  %v598_v55 = vld [vmem:[%s8467_s24 + $0xd8] sm:$0xff]  ;;  %v8836_v61 = vmax.f32 %v720_v43, 0.0  ;;  %v8853_v43 = vmax.f32 %v722_v63, 0.0  ;;  %v1871_v38 = vsel %vm1839_vm0, 1, %v11142_v36 }
  0x4f   : > { %7315 = vmatmul.mubr.msk.f32.gmra.mrb[22].mxu1 %vm1111_vm1, %v8814_v49  ;;  %v685_v15 = vmul.f32 %v8453_v31, %v598_v55  ;;  %v8859_v1 = vmax.f32 %v723_v41, 0.0  ;;  %v725_v55 = vadd.f32 %v8472_v34, %v686_v8  ;;  %v688_v41 = vmul.f32 %v8453_v31, %v601_v12  ;;  %v8967_v12 = vld [vmem:[%s10975_s3 + $0x18] sm:$0xff] }
  0x50   : > { %11149 = vst [vmem:[#allocation24_spill] sm:$0xff] %v8836_v61  ;;  %7317 = vmatprep.mubr.msk.f32.mxu1 %vm1111_vm1, %v8822_v2  ;;  %v8842_v3 = vmax.f32 %v721_v54, 0.0  ;;  %11151 = vst [vmem:[#allocation26_spill] sm:$0xff] %v8853_v43  ;;  %v1855_v8 = vsel %vm1823_vm14, 1, %v11142_v36  ;;  %vm1837_vm14 = vcmp.ne.s32.totalorder %v8618_v50, 15  ;;  %vm1843_vm5 = vcmp.ne.s32.totalorder %v8714_v24, 15 }
  0x51   : > { %v724_v5 = vadd.f32 %v8472_v34, %v685_v15  ;;  %11152 = vst [vmem:[#allocation27_spill] sm:$0xff] %v8859_v1  ;;  %v8875_v15 = vmax.f32 %v725_v55, 0.0  ;;  %v1876_v0 = vsel %vm1844_vm4, 1, %v11142_v36  ;;  %v1875_v20 = vsel %vm1843_vm5, 1, %v11142_v36  ;;  %v8958_v55 = vld [vmem:[%s10975_s3 + $0x20] sm:$0xff] }
  0x52   : > { %1883 = vperm.xlu1 %8218, %v1848_v37   ;;  %1880 = vperm.xlu0 %8217, %v1847_v45   ;;  %11150 = vst [vmem:[#allocation25_spill] sm:$0xff] %v8842_v3  ;;  %v600_v37 = vld [vmem:[%s8467_s24 + $0xe8] sm:$0xff]  ;;  %v1851_v45 = vsel %vm1819_vm9, 1, %v11142_v36  ;;  %vm1833_vm9 = vcmp.ne.s32.totalorder %v8554_v16, 15  ;;  %v1869_v16 = vsel %vm1837_vm14, 1, %v11142_v36  ;;  %vm1846_vm6 = vcmp.ne.s32.totalorder %v8735_v48, 15 }
  0x53   : > { %7318 = vmatmul.mubr.msk.f32.gmra.mrb[24].mxu1 %vm1111_vm1, %v8836_v61  ;;  %v687_v54 = vmul.f32 %v8453_v31, %v600_v37  ;;  %11154 = vst [vmem:[#allocation29_spill] sm:$0xff] %v8875_v15  ;;  %vm1845_vm7 = vcmp.ne.s32.totalorder %v8746_v56, 15  ;;  %v1878_v62 = vsel %vm1846_vm6, 1, %v11142_v36  ;;  %v798_v48 = vrot.slane %v8523_v59, 7 }
  0x54   : > { %7320 = vmatprep.mubr.msk.f32.mxu1 %vm1111_vm1, %v8842_v3  ;;  %v1877_v24 = vsel %vm1845_vm7, 1, %v11142_v36  ;;  %v800_v56 = vrot.slane %v8525_v60, 7  ;;  %vm796_vm10 = vcmask 1040384   ;;  %vm4864_vm11 = vcmp.ne.s32.totalorder %v8958_v55, 0 }
  0x55   : > { %v726_v63 = vadd.f32 %v8472_v34, %v687_v54  ;;  %v1865_v54 = vsel %vm1833_vm9, 1, %v11142_v36  ;;  %vm4863_vm13 = vcmp.ne.s32.totalorder %v8967_v12, 0 }
  0x56   : > { %1889 = vperm.xlu1 %8218, %v1850_v23   ;;  %1886 = vperm.xlu0 %8217, %v1849_v10   ;;  %v602_v23 = vld [vmem:[%s8467_s24 + $0xf8] sm:$0xff]  ;;  %v8870_v10 = vmax.f32 %v724_v5, 0.0  ;;  %v1859_v5 = vsel %vm1827_vm3, 1, %v11142_v36  ;;  %vm1841_vm3 = vcmp.ne.s32.totalorder %v8682_v44, 15  ;;  %v8949_v44 = vld [vmem:[%s10975_s3 + $0x8] sm:$0xff] }
  0x57   : > { %7321 = vmatmul.mubr.msk.f32.gmra.mrb[26].mxu1 %vm1111_vm1, %v8853_v43  ;;  %v689_v17 = vmul.f32 %v8453_v31, %v602_v23  ;;  %v8885_v37 = vmax.f32 %v726_v63, 0.0  ;;  %v11156_v31 = vmov 0.0   ;;  %v1873_v50 = vsel %vm1841_vm3, 1, %v11142_v36 }
  0x58   : > { %11153 = vst [vmem:[#allocation28_spill] sm:$0xff] %v8870_v10  ;;  %7323 = vmatprep.mubr.msk.f32.mxu1 %vm1111_vm1, %v8859_v1  ;;  %vm4861_vm9 = vcmp.ne.s32.totalorder %v8949_v44, 0  ;;  %v797_v23 = vrot.slane %v8521_v58, 7  ;;  %v806_v63 = vrot.slane %v8579_v35, 7 }
  0x59   : > { %11155 = vst [vmem:[#allocation30_spill] sm:$0xff] %v8885_v37 }
  0x5a   : > { %1895 = vperm.xlu1 %8218, %v1852_v9   ;;  %1892 = vperm.xlu0 %8217, %v1851_v45   ;;  %v8888_v9 = vadd.f32 %v8472_v34, %v688_v41  ;;  %v8891_v45 = vadd.f32 %v8472_v34, %v689_v17  ;;  %v1860_v34 = vsel %vm1828_vm2, 1, %v11142_v36  ;;  %vm1842_vm2 = vcmp.ne.s32.totalorder %v8671_v40, 15  ;;  %v8944_v40 = vld [vmem:[%s10975_s3 + $0x10] sm:$0xff] }
  0x5b   : > { %7324 = vmatmul.mubr.msk.f32.gmra.mrb[28].mxu1 %vm1111_vm1, %v8870_v10  ;;  %v1874_v46 = vsel %vm1842_vm2, 1, %v11142_v36  ;;  %v4869_v17 = vsel %vm4861_vm9, 1, %v11142_v36  ;;  %vm5193_vm7 = vcmp.ne.s32.totalorder %v8944_v40, 7 }
  0x5c   : > { %7326 = vmatprep.mubr.msk.f32.mxu1 %vm1111_vm1, %v8875_v15 }
  0x5e   : > { %1901 = vperm.xlu1 %8218, %v1854_v13   ;;  %1898 = vperm.xlu0 %8217, %v1853_v14   ;;  %v802_v13 = vrot.slane %v8547_v11, 7  ;;  %v804_v14 = vrot.slane %v8558_v19, 7 }
  0x5f   : > { %7327 = vmatmul.mubr.msk.f32.gmra.mrb[30].mxu1 %vm1111_vm1, %v8885_v37 }
  0x60   : > { %7331 = vmatprep.mubr.f32.mxu1 %v11156_v31 }
  0x62   : > { %1907 = vperm.xlu1 %8218, %v1856_v18   ;;  %1904 = vperm.xlu0 %8217, %v1855_v8   ;;  %v8978_v18 = vld [vmem:[%s10975_s3 + $0x30] sm:$0xff]  ;;  %v8981_v8 = vsel %vm796_vm10, %v798_v48, %v800_v56 }
  0x63   : > { %7332 = vmatmul.mubr.f32.vlgmr.msra.gmra.mrb[0].mxu1 %v11156_v31  ;;  %vm4866_vm0 = vcmp.ne.s32.totalorder %v8978_v18, 0 }
  0x64   : > { %7380 = vmatpush3.msk.msra.mxu1 %vm1175_vm12, %v8504_v52  ;;  %v1866_v52 = vsel %vm1834_vm8, 1, %v11142_v36  ;;  %vm4862_vm8 = vcmp.ne.s32.totalorder %v8944_v40, 0 }
  0x65   : > { %v4870_v41 = vsel %vm4862_vm8, 1, %v11142_v36 }
  0x66   : > { %1913 = vperm.xlu1 %8218, %v1858_v21   ;;  %1910 = vperm.xlu0 %8217, %v1857_v22   ;;  %v8984_v21 = vsel %vm796_vm10, %v802_v13, %v804_v14  ;;  %v803_v22 = vsel %vm796_vm10, %v800_v56, %v802_v13 }
  0x6a   : > { %1919 = vperm.xlu1 %8218, %v1860_v34   ;;  %1916 = vperm.xlu0 %8217, %v1859_v5   ;;  %v808_v34 = vrot.slane %v8590_v39, 7 }
  0x6e   : > { %1925 = vperm.xlu1 %8218, %v1862_v26   ;;  %1922 = vperm.xlu0 %8217, %v1861_v27   ;;  %v886_v27 = vsel %vm796_vm10, 0.0, %v797_v23 }
  0x72   : > { %1931 = vperm.xlu1 %8218, %v1864_v30   ;;  %1928 = vperm.xlu0 %8217, %v1863_v33   ;;  %v8990_v30 = vsel %vm796_vm10, %v804_v14, %v806_v63  ;;  %v799_v33 = vsel %vm796_vm10, %v797_v23, %v798_v48  ;;  %v4874_v48 = vsel %vm4866_vm0, 1, %v11142_v36  ;;  %vm5194_vm0 = vcmp.ne.s32.totalorder %v8967_v12, 7 }
  0x76   : > { %1937 = vperm.xlu1 %8218, %v1866_v52   ;;  %1934 = vperm.xlu0 %8217, %v1865_v54   ;;  %v4872_v52 = vsel %vm4864_vm11, 1, %v11142_v36  ;;  %v8997_v54 = vld [vmem:[%s10975_s3 + $0x28] sm:$0xff]  ;;  %vm5192_vm11 = vcmp.ne.s32.totalorder %v8949_v44, 7 }
  0x77   : > { %vm4865_vm2 = vcmp.ne.s32.totalorder %v8997_v54, 0 }
  0x7a   : > { %1943 = vperm.xlu1 %8218, %v1868_v53   ;;  %1940 = vperm.xlu0 %8217, %v1867_v57   ;;  %v4871_v53 = vsel %vm4863_vm13, 1, %v11142_v36  ;;  %v9006_v57 = vld [vmem:[%s10975_s3] sm:$0xff] }
  0x7b   : > { %vm5191_vm3 = vcmp.ne.s32.totalorder %v9006_v57, 7 }
  0x7e   : > { %1949 = vperm.xlu1 %8218, %v1870_v7   ;;  %1946 = vperm.xlu0 %8217, %v1869_v16  }
  0x82   : > { %1955 = vperm.xlu1 %8218, %v1872_v32   ;;  %1952 = vperm.xlu0 %8217, %v1871_v38   ;;  %v810_v38 = vrot.slane %v8611_v47, 7 }
  0x86   : > { %1961 = vperm.xlu1 %8218, %v1874_v46   ;;  %1958 = vperm.xlu0 %8217, %v1873_v50   ;;  %v9020_v46 = vld [vmem:[%s10975_s3 + $0x38] sm:$0xff] }
  0x87   : > { %vm4867_vm6 = vcmp.ne.s32.totalorder %v9020_v46, 0 }
  0x8a   : > { %1967 = vperm.xlu1 %8218, %v1876_v0   ;;  %1964 = vperm.xlu0 %8217, %v1875_v20   ;;  %v812_v0 = vrot.slane %v8622_v51, 7  ;;  %v11008_v20 = vrot.slane %v8643_v6, 7 }
  0x8e   : > { %1973 = vperm.xlu1 %8218, %v1878_v62   ;;  %1970 = vperm.xlu0 %8217, %v1877_v24  }
  0x91   : > { %v959_v5 = vpop.permute.xlu1 %958  ;;  %v953_v26 = vpop.permute.xlu0 %952 }
  0x92   : > { %vm1049_vm14 = vcmp.eq.s32.totalorder %v959_v5, 1  ;;  %vm1047_vm15 = vcmp.eq.s32.totalorder %v953_v26, 1  ;;  %4883 = vperm.xlu1 %8218, %v4870_v41   ;;  %4880 = vperm.xlu0 %8217, %v4869_v17   ;;  %v4873_v41 = vsel %vm4865_vm2, 1, %v11142_v36  ;;  %v9044_v5 = vsel %vm796_vm10, %v808_v34, %v810_v38 }
  0x93   : > { %v9010_v7 = vsel %vm1049_vm14, %v8984_v21, 0.0  ;;  %v9013_v16 = vsel %vm1047_vm15, %v8981_v8, 0.0  ;;  %v1079_v32 = vsel %vm1049_vm14, %v886_v27, 0.0  ;;  %v2398_v50 = vsel %vm1047_vm15, %v886_v27, 0.0 }
  0x94   : > { %11157 = vst [vmem:[#allocation31_spill] sm:$0xff] %v9010_v7  ;;  %11158 = vst [vmem:[#allocation32_spill] sm:$0xff] %v9013_v16  ;;  %7334 = vmatprep.mubr.msk.f32.mxu1 %vm1111_vm1, %v1079_v32  ;;  %7431 = vmatprep.mubr.msk.f32.mxu0 %vm1111_vm1, %v2398_v50  ;;  %v2400_v56 = vsel %vm1049_vm14, %v8981_v8, 0.0  ;;  %v9047_v26 = vsel %vm796_vm10, %v806_v63, %v808_v34  ;;  %v9052_v27 = vsel %vm796_vm10, %v812_v0, %v11008_v20  ;;  %v11165_v20 = vld [vmem:[#allocation13_spill] sm:$0xff]  ;;  %v11166_v34 = vld [vmem:[#allocation14_spill] sm:$0xff] }
  0x95   : > { %v962_v62 = vpop.permute.xlu1 %961  ;;  %v956_v24 = vpop.permute.xlu0 %955  ;;  %v5199_v32 = vsel %vm5191_vm3, 1, %v11142_v36  ;;  %v4875_v63 = vsel %vm4867_vm6, 1, %v11142_v36  ;;  %vm5195_vm15 = vcmp.ne.s32.totalorder %v8958_v55, 7 }
  0x96   : > { %vm1050_vm4 = vcmp.eq.s32.totalorder %v962_v62, 1  ;;  %vm1048_vm5 = vcmp.eq.s32.totalorder %v956_v24, 1  ;;  %4889 = vperm.xlu1 %8218, %v4872_v52   ;;  %4886 = vperm.xlu0 %8217, %v4871_v53   ;;  %v11163_v62 = vld [vmem:[#allocation11_spill] sm:$0xff] }
  0x97   : > { %v9034_v13 = vsel %vm1050_vm4, %v8990_v30, 0.0  ;;  %v2399_v14 = vsel %vm1048_vm5, %v799_v33, 0.0  ;;  %v9036_v23 = vsel %vm1048_vm5, %v803_v22, 0.0  ;;  %v1080_v17 = vsel %vm1050_vm4, %v799_v33, 0.0 }
  0x98   : > { %11159 = vst [vmem:[#allocation33_spill] sm:$0xff] %v9034_v13  ;;  %11160 = vst [vmem:[#allocation34_spill] sm:$0xff] %v9036_v23  ;;  %7432 = vmatmul.mubr.msk.f32.vlgmr.msra.gmra.mrb[0].mxu0 %vm1111_vm1, %v2399_v14  ;;  %7335 = vmatmul.mubr.msk.f32.gmra.mrb[2].mxu1 %vm1111_vm1, %v1080_v17  ;;  %v9057_v33 = vsel %vm796_vm10, %v810_v38, %v812_v0  ;;  %v2401_v38 = vsel %vm1050_vm4, %v803_v22, 0.0  ;;  %v11164_v14 = vld [vmem:[#allocation12_spill] sm:$0xff]  ;;  %vm5197_vm4 = vcmp.ne.s32.totalorder %v8978_v18, 7  ;;  %vm5196_vm5 = vcmp.ne.s32.totalorder %v8997_v54, 7 }
  0x99   : > { %v968_v52 = vpop.permute.xlu1 %967  ;;  %v965_v53 = vpop.permute.xlu0 %964  ;;  %7434 = vmatprep.mubr.msk.f32.mxu0 %vm1111_vm1, %v2400_v56  ;;  %7480 = vmatpush3.msk.msra.mxu0 %vm1175_vm12, %v8800_v29 }
  0x9a   : > { %vm1052_vm8 = vcmp.eq.s32.totalorder %v968_v52, 1  ;;  %vm1051_vm9 = vcmp.eq.s32.totalorder %v965_v53, 1  ;;  %4895 = vperm.xlu1 %8218, %v4874_v48   ;;  %4892 = vperm.xlu0 %8217, %v4873_v41   ;;  %v818_v41 = vrot.slane %v11164_v14, 7  ;;  %v11170_v52 = vrot.slane %v8643_v6, 7 }
  0x9b   : > { %v1082_v50 = vsel %vm1052_vm8, %v803_v22, 0.0  ;;  %v9072_v0 = vsel %vm1052_vm8, %v9044_v5, 0.0  ;;  %v1081_v24 = vsel %vm1051_vm9, %v8981_v8, 0.0  ;;  %v2402_v48 = vsel %vm1051_vm9, %v8984_v21, 0.0 }
  0x9c   : > { %11161 = vst [vmem:[#allocation35_spill] sm:$0xff] %v9072_v0  ;;  %v9079_v56 = vsel %vm1051_vm9, %v9047_v26, 0.0  ;;  %7337 = vmatprep.mubr.msk.f32.mxu1 %vm1111_vm1, %v1081_v24  ;;  %7435 = vmatmul.mubr.msk.f32.gmra.mrb[2].mxu0 %vm1111_vm1, %v2401_v38  ;;  %v816_v22 = vrot.slane %v11163_v62, 7  ;;  %v5201_v8 = vsel %vm5193_vm7, 1, %v11142_v36  ;;  %v5200_v24 = vsel %vm5192_vm11, 1, %v11142_v36 }
  0x9d   : > { %11162 = vst [vmem:[#allocation36_spill] sm:$0xff] %v9079_v56  ;;  %v974_v17 = vpop.permute.xlu1 %973  ;;  %v971_v53 = vpop.permute.xlu0 %970  ;;  %7338 = vmatmul.mubr.msk.f32.gmra.mrb[4].mxu1 %vm1111_vm1, %v1082_v50  ;;  %7437 = vmatprep.mubr.msk.f32.mxu0 %vm1111_vm1, %v2402_v48  ;;  %v820_v38 = vrot.slane %v11165_v20, 7  ;;  %v2403_v40 = vsel %vm1052_vm8, %v8990_v30, 0.0  ;;  %vm4860_vm8 = vcmp.ne.s32.totalorder %v9006_v57, 0  ;;  %vm5198_vm9 = vcmp.ne.s32.totalorder %v9020_v46, 7 }
  0x9e   : > { %vm1054_vm13 = vcmp.eq.s32.totalorder %v974_v17, 1  ;;  %vm1053_vm14 = vcmp.eq.s32.totalorder %v971_v53, 1  ;;  %5208 = vperm.xlu1 %8218, %v5199_v32   ;;  %4898 = vperm.xlu0 %8217, %v4875_v63   ;;  %v11168_v53 = vrot.slane %v8800_v29, 4  ;;  %v9119_v0 = vsel %vm796_vm10, %v11170_v52, %v816_v22 }
  0x9f   : > { %v1084_v50 = vsel %vm1054_vm13, %v8990_v30, 0.0  ;;  %v9103_v44 = vsel %vm1054_vm13, %v9052_v27, 0.0  ;;  %v1083_v48 = vsel %vm1053_vm14, %v8984_v21, 0.0  ;;  %v2404_v32 = vsel %vm1053_vm14, %v9047_v26, 0.0 }
  0xa0   : > { %11167 = vst [vmem:[#allocation37_spill] sm:$0xff] %v9103_v44  ;;  %7529 = vmatprep.subr.msk.mxu0 %vm1175_vm12, %v11168_v53  ;;  %v9111_v63 = vsel %vm1053_vm14, %v9057_v33, 0.0  ;;  %7340 = vmatprep.mubr.msk.f32.mxu1 %vm1111_vm1, %v1083_v48  ;;  %v819_v30 = vsel %vm796_vm10, %v816_v22, %v818_v41  ;;  %v11171_v53 = vrot.slane %v11166_v34, 7  ;;  %v5203_v48 = vsel %vm5195_vm15, 1, %v11142_v36 }
  0xa1   : > { %11169 = vst [vmem:[#allocation38_spill] sm:$0xff] %v9111_v63  ;;  %7438 = vmatmul.mubr.msk.f32.gmra.mrb[4].mxu0 %vm1111_vm1, %v2403_v40  ;;  %v980_v21 = vpop.permute.xlu1 %979  ;;  %v977_v44 = vpop.permute.xlu0 %976  ;;  %7341 = vmatmul.mubr.msk.f32.gmra.mrb[6].mxu1 %vm1111_vm1, %v1084_v50  ;;  %v9129_v40 = vsel %vm796_vm10, %v818_v41, %v820_v38  ;;  %v5202_v22 = vsel %vm5194_vm0, 1, %v11142_v36  ;;  %v2405_v41 = vsel %vm1054_vm13, %v9044_v5, 0.0  ;;  %v832_v57 = vrot.slane %v8772_v42, 7 }
  0xa2   : > { %7440 = vmatprep.mubr.msk.f32.mxu0 %vm1111_vm1, %v2404_v32  ;;  %v9126_v63 = vsel %vm796_vm10, %v820_v38, %v11171_v53  ;;  %vm1056_vm2 = vcmp.eq.s32.totalorder %v980_v21, 1  ;;  %vm1055_vm3 = vcmp.eq.s32.totalorder %v977_v44, 1  ;;  %5214 = vperm.xlu1 %8218, %v5201_v8   ;;  %v11175_v44 = vld [vmem:[#allocation16_spill] sm:$0xff]  ;;  %v5204_v53 = vsel %vm5196_vm5, 1, %v11142_v36 }
  0xa3   : > { %5211 = vperm.xlu0 %8217, %v5200_v24   ;;  %v1086_v38 = vsel %vm1056_vm2, %v9044_v5, 0.0  ;;  %v9144_v55 = vsel %vm1056_vm2, %v819_v30, 0.0  ;;  %v1085_v12 = vsel %vm1055_vm3, %v9047_v26, 0.0  ;;  %v2406_v50 = vsel %vm1055_vm3, %v9057_v33, 0.0  ;;  %v11174_v24 = vld [vmem:[#allocation15_spill] sm:$0xff] }
  0xa4   : > { %11172 = vst [vmem:[#allocation39_spill] sm:$0xff] %v9144_v55  ;;  %v9149_v8 = vsel %vm1055_vm3, %v9119_v0, 0.0  ;;  %7343 = vmatprep.mubr.msk.f32.mxu1 %vm1111_vm1, %v1085_v12  ;;  %v824_v17 = vrot.slane %v11174_v24, 7  ;;  %v826_v32 = vrot.slane %v11175_v44, 7  ;;  %v5205_v26 = vsel %vm5197_vm4, 1, %v11142_v36  ;;  %v11176_v12 = vld [vmem:[#allocation17_spill] sm:$0xff] }
  0xa5   : > { %11173 = vst [vmem:[#allocation40_spill] sm:$0xff] %v9149_v8  ;;  %7441 = vmatmul.mubr.msk.f32.gmra.mrb[6].mxu0 %vm1111_vm1, %v2405_v41  ;;  %v986_v52 = vpop.permute.xlu1 %985  ;;  %v983_v5 = vpop.permute.xlu0 %982  ;;  %7344 = vmatmul.mubr.msk.f32.gmra.mrb[8].mxu1 %vm1111_vm1, %v1086_v38  ;;  %v828_v41 = vrot.slane %v11176_v12, 7  ;;  %v830_v55 = vrot.slane %v8766_v28, 7  ;;  %v2407_v18 = vsel %vm1056_vm2, %v9052_v27, 0.0 }
  0xa6   : > { %7443 = vmatprep.mubr.msk.f32.mxu0 %vm1111_vm1, %v2406_v50  ;;  %vm1058_vm6 = vcmp.eq.s32.totalorder %v986_v52, 1  ;;  %vm1057_vm7 = vcmp.eq.s32.totalorder %v983_v5, 1  ;;  %5220 = vperm.xlu1 %8218, %v5203_v48   ;;  %v827_v21 = vsel %vm796_vm10, %v824_v17, %v826_v32 }
  0xa7   : > { %5217 = vperm.xlu0 %8217, %v5202_v22   ;;  %v1088_v38 = vsel %vm1058_vm6, %v9052_v27, 0.0  ;;  %v9173_v54 = vsel %vm1058_vm6, %v9126_v63, 0.0  ;;  %v1087_v50 = vsel %vm1057_vm7, %v9057_v33, 0.0  ;;  %v2408_v5 = vsel %vm1057_vm7, %v9119_v0, 0.0 }
  0xa8   : > { %11177 = vst [vmem:[#allocation41_spill] sm:$0xff] %v9173_v54  ;;  %v9178_v48 = vsel %vm1057_vm7, %v9129_v40, 0.0  ;;  %7346 = vmatprep.mubr.msk.f32.mxu1 %vm1111_vm1, %v1087_v50  ;;  %v11179_v27 = vrot.slane %v11166_v34, 7  ;;  %v9189_v33 = vsel %vm796_vm10, %v828_v41, %v830_v55  ;;  %v5206_v50 = vsel %vm5198_vm9, 1, %v11142_v36 }
  0xa9   : > { %11178 = vst [vmem:[#allocation42_spill] sm:$0xff] %v9178_v48  ;;  %7444 = vmatmul.mubr.msk.f32.gmra.mrb[8].mxu0 %vm1111_vm1, %v2407_v18  ;;  %v992_v22 = vpop.permute.xlu1 %991  ;;  %v989_v8 = vpop.permute.xlu0 %988  ;;  %7347 = vmatmul.mubr.msk.f32.gmra.mrb[10].mxu1 %vm1111_vm1, %v1088_v38  ;;  %v4868_v18 = vsel %vm4860_vm8, 1, %v11142_v36  ;;  %v834_v36 = vrot.slane %v8785_v4, 7 }
  0xaa   : > { %v825_v56 = vsel %vm796_vm10, %v11179_v27, %v824_v17  ;;  %7446 = vmatprep.mubr.msk.f32.mxu0 %vm1111_vm1, %v2408_v5  ;;  %vm1060_vm11 = vcmp.eq.s32.totalorder %v992_v22, 1  ;;  %vm1059_vm13 = vcmp.eq.s32.totalorder %v989_v8, 1  ;;  %5226 = vperm.xlu1 %8218, %v5205_v26   ;;  %v2409_v17 = vsel %vm1058_vm6, %v819_v30, 0.0 }
  0xab   : > { %5223 = vperm.xlu0 %8217, %v5204_v53   ;;  %v1090_v38 = vsel %vm1060_vm11, %v819_v30, 0.0  ;;  %v9200_v5 = vsel %vm1060_vm11, %v827_v21, 0.0  ;;  %v1089_v27 = vsel %vm1059_vm13, %v9119_v0, 0.0  ;;  %v2410_v8 = vsel %vm1059_vm13, %v9129_v40, 0.0 }
  0xac   : > { %11180 = vst [vmem:[#allocation43_spill] sm:$0xff] %v9200_v5  ;;  %v9204_v26 = vsel %vm1059_vm13, %v825_v56, 0.0  ;;  %7349 = vmatprep.mubr.msk.f32.mxu1 %vm1111_vm1, %v1089_v27  ;;  %v829_v30 = vsel %vm796_vm10, %v826_v32, %v828_v41  ;;  %v836_v0 = vrot.slane %v8791_v25, 7  ;;  %v2411_v53 = vsel %vm1060_vm11, %v9126_v63, 0.0 }
  0xad   : > { %11181 = vst [vmem:[#allocation44_spill] sm:$0xff] %v9204_v26  ;;  %7447 = vmatmul.mubr.msk.f32.gmra.mrb[10].mxu0 %vm1111_vm1, %v2409_v17  ;;  %v998_v46 = vpop.permute.xlu1 %997  ;;  %v995_v52 = vpop.permute.xlu0 %994  ;;  %7350 = vmatmul.mubr.msk.f32.gmra.mrb[12].mxu1 %vm1111_vm1, %v1090_v38  ;;  %v838_v22 = vrot.slane %v8814_v49, 7 }
  0xae   : > { %7449 = vmatprep.mubr.msk.f32.mxu0 %vm1111_vm1, %v2410_v8  ;;  %vm1062_vm14 = vcmp.eq.s32.totalorder %v998_v46, 1  ;;  %vm1061_vm15 = vcmp.eq.s32.totalorder %v995_v52, 1  ;;  %4877 = vperm.xlu1 %8218, %v4868_v18   ;;  %v835_v18 = vsel %vm796_vm10, %v832_v57, %v834_v36 }
  0xaf   : > { %5229 = vperm.xlu0 %8217, %v5206_v50   ;;  %v1092_v17 = vsel %vm1062_vm14, %v9126_v63, 0.0  ;;  %v9220_v27 = vsel %vm1062_vm14, %v9189_v33, 0.0  ;;  %v1091_v32 = vsel %vm1061_vm15, %v9129_v40, 0.0  ;;  %v2412_v41 = vsel %vm1061_vm15, %v825_v56, 0.0 }
  0xb0   : > { %11182 = vst [vmem:[#allocation45_spill] sm:$0xff] %v9220_v27  ;;  %v9223_v38 = vsel %vm1061_vm15, %v829_v30, 0.0  ;;  %7352 = vmatprep.mubr.msk.f32.mxu1 %vm1111_vm1, %v1091_v32  ;;  %v833_v63 = vsel %vm796_vm10, %v830_v55, %v832_v57  ;;  %v840_v40 = vrot.slane %v8822_v2, 7  ;;  %v2413_v52 = vsel %vm1062_vm14, %v827_v21, 0.0 }
  0xb1   : > { %11183 = vst [vmem:[#allocation46_spill] sm:$0xff] %v9223_v38  ;;  %7450 = vmatmul.mubr.msk.f32.gmra.mrb[12].mxu0 %vm1111_vm1, %v2411_v53  ;;  %v1004_v50 = vpop.permute.xlu1 %1003  ;;  %v1001_v8 = vpop.permute.xlu0 %1000  ;;  %7353 = vmatmul.mubr.msk.f32.gmra.mrb[14].mxu1 %vm1111_vm1, %v1092_v17  ;;  %v839_v55 = vsel %vm796_vm10, %v836_v0, %v838_v22  ;;  %v842_v57 = vrot.slane %v8836_v61, 7 }
  0xb2   : > { %7452 = vmatprep.mubr.msk.f32.mxu0 %vm1111_vm1, %v2412_v41  ;;  %vm1064_vm0 = vcmp.eq.s32.totalorder %v1004_v50, 1  ;;  %vm1063_vm2 = vcmp.eq.s32.totalorder %v1001_v8, 1  ;;  %v837_v41 = vsel %vm796_vm10, %v834_v36, %v836_v0 }
  0xb3   : > { %v1094_v53 = vsel %vm1064_vm0, %v827_v21, 0.0  ;;  %v9236_v32 = vsel %vm1064_vm0, %v835_v18, 0.0  ;;  %v1093_v27 = vsel %vm1063_vm2, %v825_v56, 0.0  ;;  %v2414_v38 = vsel %vm1063_vm2, %v829_v30, 0.0 }
  0xb4   : > { %11184 = vst [vmem:[#allocation47_spill] sm:$0xff] %v9236_v32  ;;  %v9238_v5 = vsel %vm1063_vm2, %v833_v63, 0.0  ;;  %7355 = vmatprep.mubr.msk.f32.mxu1 %vm1111_vm1, %v1093_v27  ;;  %v844_v56 = vrot.slane %v8842_v3, 7  ;;  %v2415_v21 = vsel %vm1064_vm0, %v9189_v33, 0.0  ;;  %v843_v0 = vsel %vm796_vm10, %v840_v40, %v842_v57 }
  0xb5   : > { %11185 = vst [vmem:[#allocation48_spill] sm:$0xff] %v9238_v5  ;;  %7453 = vmatmul.mubr.msk.f32.gmra.mrb[14].mxu0 %vm1111_vm1, %v2413_v52  ;;  %v1010_v17 = vpop.permute.xlu1 %1009  ;;  %v1007_v46 = vpop.permute.xlu0 %1006  ;;  %7356 = vmatmul.mubr.msk.f32.gmra.mrb[16].mxu1 %vm1111_vm1, %v1094_v53  ;;  %vm11123_vm2 = vcmask 1046528  }
  0xb6   : > { %7455 = vmatprep.mubr.msk.f32.mxu0 %vm1111_vm1, %v2414_v38  ;;  %vm1066_vm3 = vcmp.eq.s32.totalorder %v1010_v17, 1  ;;  %vm1065_vm4 = vcmp.eq.s32.totalorder %v1007_v46, 1  ;;  %v846_v38 = vrot.slane %v8853_v43, 7  ;;  %v841_v46 = vsel %vm796_vm10, %v838_v22, %v840_v40 }
  0xb7   : > { %v1096_v27 = vsel %vm1066_vm3, %v9189_v33, 0.0  ;;  %v9253_v8 = vsel %vm1066_vm3, %v839_v55, 0.0  ;;  %v1095_v52 = vsel %vm1065_vm4, %v829_v30, 0.0  ;;  %v2416_v32 = vsel %vm1065_vm4, %v833_v63, 0.0 }
  0xb8   : > { %11186 = vst [vmem:[#allocation49_spill] sm:$0xff] %v9253_v8  ;;  %v9255_v36 = vsel %vm1065_vm4, %v837_v41, 0.0  ;;  %7358 = vmatprep.mubr.msk.f32.mxu1 %vm1111_vm1, %v1095_v52  ;;  %v848_v33 = vrot.slane %v8859_v1, 7  ;;  %v2417_v30 = vsel %vm1066_vm3, %v835_v18, 0.0  ;;  %v847_v22 = vsel %vm796_vm10, %v844_v56, %v846_v38 }
  0xb9   : > { %11187 = vst [vmem:[#allocation50_spill] sm:$0xff] %v9255_v36  ;;  %7456 = vmatmul.mubr.msk.f32.gmra.mrb[16].mxu0 %vm1111_vm1, %v2415_v21  ;;  %v1016_v50 = vpop.permute.xlu1 %1015  ;;  %v1013_v53 = vpop.permute.xlu0 %1012  ;;  %7359 = vmatmul.mubr.msk.f32.gmra.mrb[18].mxu1 %vm1111_vm1, %v1096_v27  ;;  %v850_v40 = vrot.slane %v8870_v10, 7  ;;  %v845_v27 = vsel %vm796_vm10, %v842_v57, %v844_v56  ;;  %v854_v56 = vrot.slane %v8885_v37, 7 }
  0xba   : > { %7458 = vmatprep.mubr.msk.f32.mxu0 %vm1111_vm1, %v2416_v32  ;;  %vm1068_vm5 = vcmp.eq.s32.totalorder %v1016_v50, 1  ;;  %vm1067_vm6 = vcmp.eq.s32.totalorder %v1013_v53, 1 }
  0xbb   : > { %v1098_v21 = vsel %vm1068_vm5, %v835_v18, 0.0  ;;  %v9268_v52 = vsel %vm1068_vm5, %v843_v0, 0.0  ;;  %v1097_v8 = vsel %vm1067_vm6, %v833_v63, 0.0  ;;  %v2418_v36 = vsel %vm1067_vm6, %v837_v41, 0.0 }
  0xbc   : > { %11188 = vst [vmem:[#allocation51_spill] sm:$0xff] %v9268_v52  ;;  %v9270_v5 = vsel %vm1067_vm6, %v841_v46, 0.0  ;;  %7361 = vmatprep.mubr.msk.f32.mxu1 %vm1111_vm1, %v1097_v8  ;;  %v852_v18 = vrot.slane %v8875_v15, 7  ;;  %v2419_v63 = vsel %vm1068_vm5, %v839_v55, 0.0  ;;  %v851_v57 = vsel %vm796_vm10, %v848_v33, %v850_v40 }
  0xbd   : > { %11189 = vst [vmem:[#allocation52_spill] sm:$0xff] %v9270_v5  ;;  %7459 = vmatmul.mubr.msk.f32.gmra.mrb[18].mxu0 %vm1111_vm1, %v2417_v30  ;;  %v1022_v32 = vpop.permute.xlu1 %1021  ;;  %v1019_v17 = vpop.permute.xlu0 %1018  ;;  %7362 = vmatmul.mubr.msk.f32.gmra.mrb[20].mxu1 %vm1111_vm1, %v1098_v21  ;;  %v849_v21 = vsel %vm796_vm10, %v846_v38, %v848_v33 }
  0xbe   : > { %7461 = vmatprep.mubr.msk.f32.mxu0 %vm1111_vm1, %v2418_v36  ;;  %vm1070_vm7 = vcmp.eq.s32.totalorder %v1022_v32, 1  ;;  %vm1069_vm8 = vcmp.eq.s32.totalorder %v1019_v17, 1  ;;  %v853_v32 = vsel %vm796_vm10, %v850_v40, %v852_v18 }
  0xbf   : > { %v1100_v8 = vsel %vm1070_vm7, %v839_v55, 0.0  ;;  %v9283_v53 = vsel %vm1070_vm7, %v847_v22, 0.0  ;;  %v1099_v30 = vsel %vm1069_vm8, %v837_v41, 0.0  ;;  %v2420_v52 = vsel %vm1069_vm8, %v841_v46, 0.0 }
  0xc0   : > { %11190 = vst [vmem:[#allocation53_spill] sm:$0xff] %v9283_v53  ;;  %v9285_v5 = vsel %vm1069_vm8, %v845_v27, 0.0  ;;  %7364 = vmatprep.mubr.msk.f32.mxu1 %vm1111_vm1, %v1099_v30  ;;  %v9295_v55 = vmax.f32 %v8888_v9, 0.0  ;;  %v9298_v41 = vmax.f32 %v8891_v45, 0.0  ;;  %v2421_v17 = vsel %vm1070_vm7, %v843_v0, 0.0 }
  0xc1   : > { %11191 = vst [vmem:[#allocation54_spill] sm:$0xff] %v9285_v5  ;;  %7462 = vmatmul.mubr.msk.f32.gmra.mrb[20].mxu0 %vm1111_vm1, %v2419_v63  ;;  %v1028_v36 = vpop.permute.xlu1 %1027  ;;  %v1025_v50 = vpop.permute.xlu0 %1024  ;;  %7365 = vmatmul.mubr.msk.f32.gmra.mrb[22].mxu1 %vm1111_vm1, %v1100_v8  ;;  %v855_v9 = vsel %vm796_vm10, %v852_v18, %v854_v56 }
  0xc2   : > { %7464 = vmatprep.mubr.msk.f32.mxu0 %vm1111_vm1, %v2420_v52  ;;  %vm1072_vm9 = vcmp.eq.s32.totalorder %v1028_v36, 1  ;;  %vm1071_vm11 = vcmp.eq.s32.totalorder %v1025_v50, 1 }
  0xc3   : > { %v1102_v63 = vsel %vm1072_vm9, %v843_v0, 0.0  ;;  %v9303_v30 = vsel %vm1072_vm9, %v851_v57, 0.0  ;;  %v1101_v38 = vsel %vm1071_vm11, %v841_v46, 0.0  ;;  %v2422_v33 = vsel %vm1071_vm11, %v845_v27, 0.0 }
  0xc4   : > { %11192 = vst [vmem:[#allocation55_spill] sm:$0xff] %v9303_v30  ;;  %v9305_v8 = vsel %vm1071_vm11, %v849_v21, 0.0  ;;  %7367 = vmatprep.mubr.msk.f32.mxu1 %vm1111_vm1, %v1101_v38  ;;  %v2392_v0 = vrot.slane %v9295_v55, 7  ;;  %v2394_v46 = vrot.slane %v9298_v41, 7  ;;  %v2423_v50 = vsel %vm1072_vm9, %v847_v22, 0.0 }
  0xc5   : > { %11193 = vst [vmem:[#allocation56_spill] sm:$0xff] %v9305_v8  ;;  %7465 = vmatmul.mubr.msk.f32.gmra.mrb[22].mxu0 %vm1111_vm1, %v2421_v17  ;;  %v1034_v45 = vpop.permute.xlu1 %1033  ;;  %v1031_v52 = vpop.permute.xlu0 %1030  ;;  %7368 = vmatmul.mubr.msk.f32.gmra.mrb[24].mxu1 %vm1111_vm1, %v1102_v63 }
  0xc6   : > { %7467 = vmatprep.mubr.msk.f32.mxu0 %vm1111_vm1, %v2422_v33  ;;  %vm1074_vm13 = vcmp.eq.s32.totalorder %v1034_v45, 1  ;;  %vm1073_vm14 = vcmp.eq.s32.totalorder %v1031_v52, 1  ;;  %v2393_v33 = vsel %vm796_vm10, %v854_v56, %v2392_v0  ;;  %v1727_v56 = vrot.slane %v8547_v11, 1 }
  0xc7   : > { %v1104_v17 = vsel %vm1074_vm13, %v847_v22, 0.0  ;;  %v9318_v38 = vsel %vm1074_vm13, %v855_v9, 0.0  ;;  %v1103_v30 = vsel %vm1073_vm14, %v845_v27, 0.0  ;;  %v2424_v8 = vsel %vm1073_vm14, %v849_v21, 0.0 }
  0xc8   : > { %11194 = vst [vmem:[#allocation57_spill] sm:$0xff] %v9318_v38  ;;  %v9320_v40 = vsel %vm1073_vm14, %v853_v32, 0.0  ;;  %7370 = vmatprep.mubr.msk.f32.mxu1 %vm1111_vm1, %v1103_v30  ;;  %v2395_v22 = vsel %vm796_vm10, %v2392_v0, %v2394_v46  ;;  %v1722_v27 = vrot.slane %v8521_v58, 1  ;;  %v2425_v36 = vsel %vm1074_vm13, %v851_v57, 0.0 }
  0xc9   : > { %11195 = vst [vmem:[#allocation58_spill] sm:$0xff] %v9320_v40  ;;  %7468 = vmatmul.mubr.msk.f32.gmra.mrb[24].mxu0 %vm1111_vm1, %v2423_v50  ;;  %v1040_v18 = vpop.permute.xlu1 %1039  ;;  %v1037_v63 = vpop.permute.xlu0 %1036  ;;  %7371 = vmatmul.mubr.msk.f32.gmra.mrb[26].mxu1 %vm1111_vm1, %v1104_v17 }
  0xca   : > { %7470 = vmatprep.mubr.msk.f32.mxu0 %vm1111_vm1, %v2424_v8  ;;  %vm1076_vm15 = vcmp.eq.s32.totalorder %v1040_v18, 1  ;;  %vm1075_vm0 = vcmp.eq.s32.totalorder %v1037_v63, 1  ;;  %v1729_v8 = vrot.slane %v8558_v19, 1  ;;  %v3444_v63 = vsel %vm796_vm10, %v2394_v46, 0.0 }
  0xcb   : > { %v1106_v30 = vsel %vm1076_vm15, %v851_v57, 0.0  ;;  %v1105_v52 = vsel %vm1075_vm0, %v849_v21, 0.0  ;;  %v2426_v50 = vsel %vm1075_vm0, %v853_v32, 0.0  ;;  %v9331_v38 = vsel %vm1075_vm0, %v2393_v33, 0.0 }
  0xcc   : > { %11196 = vst [vmem:[#allocation59_spill] sm:$0xff] %v9331_v38  ;;  %7373 = vmatprep.mubr.msk.f32.mxu1 %vm1111_vm1, %v1105_v52  ;;  %v9338_v0 = vsel %vm1076_vm15, %v2395_v22, 0.0  ;;  %v1725_v57 = vrot.slane %v8525_v60, 1  ;;  %v1731_v21 = vrot.slane %v8579_v35, 1  ;;  %v9352_v46 = vsel %vm11123_vm2, %v1727_v56, %v1729_v8 }
  0xcd   : > { %7471 = vmatmul.mubr.msk.f32.gmra.mrb[26].mxu0 %vm1111_vm1, %v2425_v36  ;;  %11197 = vst [vmem:[#allocation60_spill] sm:$0xff] %v9338_v0  ;;  %v1046_v17 = vpop.permute.xlu1 %1045  ;;  %v1043_v45 = vpop.permute.xlu0 %1042  ;;  %7374 = vmatmul.mubr.msk.f32.gmra.mrb[28].mxu1 %vm1111_vm1, %v1106_v30  ;;  %v2427_v36 = vsel %vm1076_vm15, %v855_v9, 0.0  ;;  %v1814_v30 = vsel %vm11123_vm2, 0.0, %v1722_v27 }
  0xce   : > { %7473 = vmatprep.mubr.msk.f32.mxu0 %vm1111_vm1, %v2426_v50  ;;  %vm1078_vm3 = vcmp.eq.s32.totalorder %v1046_v17, 1  ;;  %vm1077_vm4 = vcmp.eq.s32.totalorder %v1043_v45, 1  ;;  %v1733_v50 = vrot.slane %v8590_v39, 1  ;;  %v1737_v17 = vrot.slane %v8622_v51, 1 }
  0xcf   : > { %v1108_v52 = vsel %vm1078_vm3, %v855_v9, 0.0  ;;  %v1107_v0 = vsel %vm1077_vm4, %v853_v32, 0.0  ;;  %v2428_v38 = vsel %vm1077_vm4, %v2393_v33, 0.0  ;;  %v9347_v40 = vsel %vm1077_vm4, %v3444_v63, 0.0 }
  0xd0   : > { %11198 = vst [vmem:[#allocation61_spill] sm:$0xff] %v9347_v40  ;;  %7376 = vmatprep.mubr.msk.f32.mxu1 %vm1111_vm1, %v1107_v0  ;;  %v9361_v9 = vsel %vm11123_vm2, %v1725_v57, %v1727_v56  ;;  %v1723_v32 = vrot.slane %v8523_v59, 1  ;;  %v2429_v33 = vsel %vm1078_vm3, %v2395_v22, 0.0  ;;  %v9384_v63 = vsel %vm11123_vm2, %v1731_v21, %v1733_v50 }
  0xd1   : > { %7474 = vmatmul.mubr.msk.f32.gmra.mrb[28].mxu0 %vm1111_vm1, %v2427_v36  ;;  %v9356_v45 = vpop.permute.xlu1 %1883  ;;  %v9358_v18 = vpop.permute.xlu0 %1880  ;;  %7377 = vmatmul.mubr.msk.f32.gmra.mrb[30].mxu1 %vm1111_vm1, %v1108_v52  ;;  %v1735_v22 = vrot.slane %v8611_v47, 1 }
  0xd2   : > { %7476 = vmatprep.mubr.msk.f32.mxu0 %vm1111_vm1, %v2428_v38  ;;  %vm1976_vm5 = vcmp.eq.s32.totalorder %v9356_v45, 1  ;;  %vm1975_vm6 = vcmp.eq.s32.totalorder %v9358_v18, 1  ;;  %7381 = vmatprep.mubr.f32.mxu1 %v11156_v31  ;;  %v610_v45 = vld [vmem:[%s9734_s18 + $0x38] sm:$0xff] }
  0xd3   : > { %v2007_v0 = vsel %vm1976_vm5, %v1814_v30, 0.0  ;;  %v9375_v56 = vsel %vm1976_vm5, %v9352_v46, 0.0  ;;  %v9380_v38 = vsel %vm1975_vm6, %v9361_v9, 0.0  ;;  %v9393_v30 = vsel %vm11123_vm2, %v1729_v8, %v1731_v21 }
  0xd4   : > { %11199 = vst [vmem:[#allocation62_spill] sm:$0xff] %v9375_v56  ;;  %11200 = vst [vmem:[#allocation63_spill] sm:$0xff] %v9380_v38  ;;  %v9402_v56 = vsel %vm11123_vm2, %v1722_v27, %v1723_v32 }
  0xd5   : > { %7477 = vmatmul.mubr.msk.f32.gmra.mrb[30].mxu0 %vm1111_vm1, %v2429_v33  ;;  %v9388_v36 = vpop.permute.xlu1 %1889  ;;  %v9390_v52 = vpop.permute.xlu0 %1886  ;;  %7382 = vmatmul.mubr.msk.f32.vlgmr.msra.gmra.mrb[0].mxu1 %vm1111_vm1, %v2007_v0  ;;  %v9399_v33 = vsel %vm11123_vm2, %v1723_v32, %v1725_v57  ;;  %v9426_v57 = vsel %vm11123_vm2, %v1735_v22, %v1737_v17  ;;  %v1739_v32 = vrot.slane %v8643_v6, 1  ;;  %v1741_v0 = vrot.slane %v11163_v62, 1 }
  0xd6   : > { %7481 = vmatprep.mubr.msk.f32.mxu0 %vm1111_vm1, %v8521_v58  ;;  %vm1978_vm7 = vcmp.eq.s32.totalorder %v9388_v36, 1  ;;  %vm1977_vm8 = vcmp.eq.s32.totalorder %v9390_v52, 1 }
  0xd7   : > { %v2009_v8 = vsel %vm1978_vm7, %v9399_v33, 0.0  ;;  %v9412_v21 = vsel %vm1978_vm7, %v9384_v63, 0.0  ;;  %v2008_v58 = vsel %vm1977_vm8, %v9402_v56, 0.0  ;;  %v9420_v27 = vsel %vm1977_vm8, %v9393_v30, 0.0 }
  0xd8   : > { %11201 = vst [vmem:[#allocation64_spill] sm:$0xff] %v9412_v21  ;;  %11202 = vst [vmem:[#allocation65_spill] sm:$0xff] %v9420_v27  ;;  %7384 = vmatprep.mubr.msk.f32.mxu1 %vm1111_vm1, %v2008_v58  ;;  %v9433_v21 = vld [vmem:[%s10979_s7 + $0x18] sm:$0xff]  ;;  %v9440_v58 = vsel %vm11123_vm2, %v1733_v50, %v1735_v22  ;;  %v9481_v53 = vsel %vm11123_vm2, %v1737_v17, %v1739_v32  ;;  %v3057_v18 = vsel %vm1977_vm8, %v9361_v9, 0.0  ;;  %v3058_v52 = vsel %vm1978_vm7, %v9352_v46, 0.0 }
  0xd9   : > { %7482 = vmatmul.mubr.msk.f32.vlgmr.msra.gmra.mrb[0].mxu0 %vm1111_vm1, %v8523_v59  ;;  %v9435_v38 = vpop.permute.xlu1 %1895  ;;  %v9437_v27 = vpop.permute.xlu0 %1892  ;;  %7385 = vmatmul.mubr.msk.f32.gmra.mrb[2].mxu1 %vm1111_vm1, %v2009_v8  ;;  %v11203_v59 = vrot.slane %v8800_v29, 4  ;;  %v9472_v8 = vsel %vm11123_vm2, %v1739_v32, %v1741_v0 }
  0xda   : > { %7484 = vmatprep.mubr.msk.f32.mxu0 %vm1111_vm1, %v8525_v60  ;;  %vm1980_vm9 = vcmp.eq.s32.totalorder %v9435_v38, 1  ;;  %vm1979_vm11 = vcmp.eq.s32.totalorder %v9437_v27, 1 }
  0xdb   : > { %7530 = vmatpush3.msk.msra.mxu0 %vm1175_vm12, %v11203_v59  ;;  %v2011_v31 = vsel %vm1980_vm9, %v9352_v46, 0.0  ;;  %v9456_v50 = vsel %vm1980_vm9, %v9426_v57, 0.0  ;;  %v2010_v22 = vsel %vm1979_vm11, %v9361_v9, 0.0  ;;  %v9466_v29 = vsel %vm1979_vm11, %v9440_v58, 0.0 }
  0xdc   : > { %11204 = vst [vmem:[#allocation66_spill] sm:$0xff] %v9456_v50  ;;  %7579 = vmatprep.subr.msk.mxu0 %vm1175_vm12, %v9433_v21  ;;  %11205 = vst [vmem:[#allocation67_spill] sm:$0xff] %v9466_v29  ;;  %7387 = vmatprep.mubr.msk.f32.mxu1 %vm1111_vm1, %v2010_v22  ;;  %v1743_v59 = vrot.slane %v11164_v14, 1  ;;  %v1745_v50 = vrot.slane %v11165_v20, 1  ;;  %v11264_v9 = vrot.slane %v9433_v21, 4 }
  0xdd   : > { %7485 = vmatmul.mubr.msk.f32.gmra.mrb[2].mxu0 %vm1111_vm1, %v8547_v11  ;;  %v9476_v60 = vpop.permute.xlu1 %1901  ;;  %v9478_v40 = vpop.permute.xlu0 %1898  ;;  %7388 = vmatmul.mubr.msk.f32.gmra.mrb[4].mxu1 %vm1111_vm1, %v2011_v31 }
  0xde   : > { %7487 = vmatprep.mubr.msk.f32.mxu0 %vm1111_vm1, %v8558_v19  ;;  %vm1982_vm13 = vcmp.eq.s32.totalorder %v9476_v60, 1  ;;  %vm1981_vm14 = vcmp.eq.s32.totalorder %v9478_v40, 1  ;;  %v9508_v32 = vsel %vm11123_vm2, %v1743_v59, %v1745_v50  ;;  %v1747_v19 = vrot.slane %v11166_v34, 1 }
  0xdf   : > { %v2013_v22 = vsel %vm1982_vm13, %v9384_v63, 0.0  ;;  %v9494_v29 = vsel %vm1982_vm13, %v9472_v8, 0.0  ;;  %v2012_v31 = vsel %vm1981_vm14, %v9393_v30, 0.0  ;;  %v9502_v17 = vsel %vm1981_vm14, %v9481_v53, 0.0 }
  0xe0   : > { %11206 = vst [vmem:[#allocation68_spill] sm:$0xff] %v9494_v29  ;;  %11207 = vst [vmem:[#allocation69_spill] sm:$0xff] %v9502_v17  ;;  %7390 = vmatprep.mubr.msk.f32.mxu1 %vm1111_vm1, %v2012_v31  ;;  %v1749_v29 = vrot.slane %v11174_v24, 1  ;;  %v9517_v26 = vsel %vm11123_vm2, %v1741_v0, %v1743_v59  ;;  %v9553_v48 = vsel %vm11123_vm2, %v1745_v50, %v1747_v19  ;;  %v3062_v40 = vsel %vm1982_vm13, %v9426_v57, 0.0 }
  0xe1   : > { %7488 = vmatmul.mubr.msk.f32.gmra.mrb[4].mxu0 %vm1111_vm1, %v8579_v35  ;;  %v9512_v11 = vpop.permute.xlu1 %1907  ;;  %v9514_v5 = vpop.permute.xlu0 %1904  ;;  %7391 = vmatmul.mubr.msk.f32.gmra.mrb[6].mxu1 %vm1111_vm1, %v2013_v22 }
  0xe2   : > { %7490 = vmatprep.mubr.msk.f32.mxu0 %vm1111_vm1, %v8590_v39  ;;  %vm11076_vm15 = vcmp.eq.s32.totalorder %v9512_v11, 1  ;;  %vm1983_vm0 = vcmp.eq.s32.totalorder %v9514_v5, 1  ;;  %v9544_v22 = vsel %vm11123_vm2, %v1747_v19, %v1749_v29  ;;  %v1751_v39 = vrot.slane %v11175_v44, 1 }
  0xe3   : > { %v2015_v31 = vsel %vm11076_vm15, %v9426_v57, 0.0  ;;  %v9530_v17 = vsel %vm11076_vm15, %v9508_v32, 0.0  ;;  %v2014_v0 = vsel %vm1983_vm0, %v9440_v58, 0.0  ;;  %v9538_v59 = vsel %vm1983_vm0, %v9517_v26, 0.0 }
  0xe4   : > { %11208 = vst [vmem:[#allocation70_spill] sm:$0xff] %v9530_v17  ;;  %11209 = vst [vmem:[#allocation71_spill] sm:$0xff] %v9538_v59  ;;  %7393 = vmatprep.mubr.msk.f32.mxu1 %vm1111_vm1, %v2014_v0  ;;  %v1753_v17 = vrot.slane %v11176_v12, 1  ;;  %v9589_v7 = vsel %vm11123_vm2, %v1749_v29, %v1751_v39 }
  0xe5   : > { %7491 = vmatmul.mubr.msk.f32.gmra.mrb[6].mxu0 %vm1111_vm1, %v8611_v47  ;;  %v9548_v35 = vpop.permute.xlu1 %1913  ;;  %v9550_v54 = vpop.permute.xlu0 %1910  ;;  %7394 = vmatmul.mubr.msk.f32.gmra.mrb[8].mxu1 %vm1111_vm1, %v2015_v31 }
  0xe6   : > { %7493 = vmatprep.mubr.msk.f32.mxu0 %vm1111_vm1, %v8622_v51  ;;  %vm11017_vm3 = vcmp.eq.s32.totalorder %v9548_v35, 1  ;;  %vm11018_vm4 = vcmp.eq.s32.totalorder %v9550_v54, 1  ;;  %v9580_v31 = vsel %vm11123_vm2, %v1751_v39, %v1753_v17  ;;  %v1755_v51 = vrot.slane %v8766_v28, 1 }
  0xe7   : > { %v2017_v0 = vsel %vm11017_vm3, %v9472_v8, 0.0  ;;  %v9566_v59 = vsel %vm11017_vm3, %v9544_v22, 0.0  ;;  %v2016_v19 = vsel %vm11018_vm4, %v9481_v53, 0.0  ;;  %v9574_v50 = vsel %vm11018_vm4, %v9553_v48, 0.0 }
  0xe8   : > { %11210 = vst [vmem:[#allocation72_spill] sm:$0xff] %v9566_v59  ;;  %11211 = vst [vmem:[#allocation73_spill] sm:$0xff] %v9574_v50  ;;  %7396 = vmatprep.mubr.msk.f32.mxu1 %vm1111_vm1, %v2016_v19  ;;  %v1757_v59 = vrot.slane %v8772_v42, 1  ;;  %v9625_v16 = vsel %vm11123_vm2, %v1753_v17, %v1755_v51 }
  0xe9   : > { %7494 = vmatmul.mubr.msk.f32.gmra.mrb[8].mxu0 %vm1111_vm1, %v8643_v6  ;;  %v9584_v47 = vpop.permute.xlu1 %1919  ;;  %v9586_v13 = vpop.permute.xlu0 %1916  ;;  %7397 = vmatmul.mubr.msk.f32.gmra.mrb[10].mxu1 %vm1111_vm1, %v2017_v0  ;;  %11217 = vst [vmem:[#allocation79_spill] sm:$0xff] %v9625_v16 }
  0xea   : > { %7496 = vmatprep.mubr.msk.f32.mxu0 %vm1111_vm1, %v11163_v62  ;;  %vm11021_vm3 = vcmp.eq.s32.totalorder %v9584_v47, 1  ;;  %vm11022_vm4 = vcmp.eq.s32.totalorder %v9586_v13, 1  ;;  %v9616_v0 = vsel %vm11123_vm2, %v1755_v51, %v1757_v59  ;;  %v1759_v62 = vrot.slane %v8785_v4, 1 }
  0xeb   : > { %v2019_v19 = vsel %vm11021_vm3, %v9508_v32, 0.0  ;;  %v9602_v50 = vsel %vm11021_vm3, %v9580_v31, 0.0  ;;  %v2018_v39 = vsel %vm11022_vm4, %v9517_v26, 0.0  ;;  %v9610_v29 = vsel %vm11022_vm4, %v9589_v7, 0.0  ;;  %11214 = vst [vmem:[#allocation76_spill] sm:$0xff] %v9616_v0 }
  0xec   : > { %11212 = vst [vmem:[#allocation74_spill] sm:$0xff] %v9602_v50  ;;  %11213 = vst [vmem:[#allocation75_spill] sm:$0xff] %v9610_v29  ;;  %7399 = vmatprep.mubr.msk.f32.mxu1 %vm1111_vm1, %v2018_v39  ;;  %v1761_v50 = vrot.slane %v8791_v25, 1 }
  0xed   : > { %7497 = vmatmul.mubr.msk.f32.gmra.mrb[10].mxu0 %vm1111_vm1, %v11164_v14  ;;  %v9620_v6 = vpop.permute.xlu1 %1925  ;;  %v9622_v23 = vpop.permute.xlu0 %1922  ;;  %7400 = vmatmul.mubr.msk.f32.gmra.mrb[12].mxu1 %vm1111_vm1, %v2019_v19 }
  0xee   : > { %11215 = vst [vmem:[#allocation77_spill] sm:$0xff] %v9620_v6  ;;  %11216 = vst [vmem:[#allocation78_spill] sm:$0xff] %v9622_v23  ;;  %7499 = vmatprep.mubr.msk.f32.mxu0 %vm1111_vm1, %v11165_v20  ;;  %vm11027_vm3 = vcmp.eq.s32.totalorder %v9620_v6, 1  ;;  %vm11028_vm4 = vcmp.eq.s32.totalorder %v9622_v23, 1  ;;  %v9652_v19 = vsel %vm11123_vm2, %v1759_v62, %v1761_v50  ;;  %v1763_v20 = vrot.slane %v8814_v49, 1 }
  0xef   : > { %v2021_v39 = vsel %vm11027_vm3, %v9544_v22, 0.0  ;;  %v9638_v29 = vsel %vm11027_vm3, %v9616_v0, 0.0  ;;  %v2020_v51 = vsel %vm11028_vm4, %v9553_v48, 0.0  ;;  %v9646_v17 = vsel %vm11028_vm4, %v9625_v16, 0.0  ;;  %11220 = vst [vmem:[#allocation82_spill] sm:$0xff] %v9652_v19 }
  0xf0   : > { %11218 = vst [vmem:[#allocation80_spill] sm:$0xff] %v9638_v29  ;;  %11219 = vst [vmem:[#allocation81_spill] sm:$0xff] %v9646_v17  ;;  %7402 = vmatprep.mubr.msk.f32.mxu1 %vm1111_vm1, %v2020_v51  ;;  %v1765_v29 = vrot.slane %v8822_v2, 1  ;;  %v9661_v23 = vsel %vm11123_vm2, %v1757_v59, %v1759_v62 }
  0xf1   : > { %7500 = vmatmul.mubr.msk.f32.gmra.mrb[12].mxu0 %vm1111_vm1, %v11166_v34  ;;  %v9656_v14 = vpop.permute.xlu1 %1931  ;;  %v9658_v6 = vpop.permute.xlu0 %1928  ;;  %11223 = vst [vmem:[#allocation85_spill] sm:$0xff] %v9661_v23  ;;  %7403 = vmatmul.mubr.msk.f32.gmra.mrb[14].mxu1 %vm1111_vm1, %v2021_v39 }
  0xf2   : > { %11221 = vst [vmem:[#allocation83_spill] sm:$0xff] %v9656_v14  ;;  %11222 = vst [vmem:[#allocation84_spill] sm:$0xff] %v9658_v6  ;;  %7502 = vmatprep.mubr.msk.f32.mxu0 %vm1111_vm1, %v11174_v24  ;;  %vm11033_vm3 = vcmp.eq.s32.totalorder %v9656_v14, 1  ;;  %vm11034_vm4 = vcmp.eq.s32.totalorder %v9658_v6, 1  ;;  %v9688_v39 = vsel %vm11123_vm2, %v1763_v20, %v1765_v29  ;;  %v1767_v24 = vrot.slane %v8836_v61, 1 }
  0xf3   : > { %v2023_v51 = vsel %vm11033_vm3, %v9580_v31, 0.0  ;;  %v9674_v17 = vsel %vm11033_vm3, %v9652_v19, 0.0  ;;  %v2022_v62 = vsel %vm11034_vm4, %v9589_v7, 0.0  ;;  %v9682_v59 = vsel %vm11034_vm4, %v9661_v23, 0.0  ;;  %11226 = vst [vmem:[#allocation88_spill] sm:$0xff] %v9688_v39 }
  0xf4   : > { %11224 = vst [vmem:[#allocation86_spill] sm:$0xff] %v9674_v17  ;;  %11225 = vst [vmem:[#allocation87_spill] sm:$0xff] %v9682_v59  ;;  %7405 = vmatprep.mubr.msk.f32.mxu1 %vm1111_vm1, %v2022_v62  ;;  %v1769_v17 = vrot.slane %v8842_v3, 1  ;;  %v9697_v6 = vsel %vm11123_vm2, %v1761_v50, %v1763_v20 }
  0xf5   : > { %7503 = vmatmul.mubr.msk.f32.gmra.mrb[14].mxu0 %vm1111_vm1, %v11175_v44  ;;  %v9692_v34 = vpop.permute.xlu1 %1937  ;;  %v9694_v14 = vpop.permute.xlu0 %1934  ;;  %11229 = vst [vmem:[#allocation91_spill] sm:$0xff] %v9697_v6  ;;  %7406 = vmatmul.mubr.msk.f32.gmra.mrb[16].mxu1 %vm1111_vm1, %v2023_v51 }
  0xf6   : > { %11227 = vst [vmem:[#allocation89_spill] sm:$0xff] %v9692_v34  ;;  %11228 = vst [vmem:[#allocation90_spill] sm:$0xff] %v9694_v14  ;;  %7505 = vmatprep.mubr.msk.f32.mxu0 %vm1111_vm1, %v11176_v12  ;;  %vm11037_vm3 = vcmp.eq.s32.totalorder %v9692_v34, 1  ;;  %vm11038_vm4 = vcmp.eq.s32.totalorder %v9694_v14, 1  ;;  %v9725_v51 = vsel %vm11123_vm2, %v1767_v24, %v1769_v17  ;;  %v1771_v12 = vrot.slane %v8853_v43, 1  ;;  %v606_v14 = vld [vmem:[%s9734_s18 + $0x18] sm:$0xff] }
  0xf7   : > { %v2025_v62 = vsel %vm11037_vm3, %v9616_v0, 0.0  ;;  %v9711_v59 = vsel %vm11037_vm3, %v9688_v39, 0.0  ;;  %v2024_v20 = vsel %vm11038_vm4, %v9625_v16, 0.0  ;;  %v9719_v50 = vsel %vm11038_vm4, %v9697_v6, 0.0  ;;  %11232 = vst [vmem:[#allocation94_spill] sm:$0xff] %v9725_v51 }
  0xf8   : > { %11230 = vst [vmem:[#allocation92_spill] sm:$0xff] %v9711_v59  ;;  %11231 = vst [vmem:[#allocation93_spill] sm:$0xff] %v9719_v50  ;;  %7408 = vmatprep.mubr.msk.f32.mxu1 %vm1111_vm1, %v2024_v20  ;;  %v1773_v59 = vrot.slane %v8859_v1, 1 }
  0xf9   : > { %7506 = vmatmul.mubr.msk.f32.gmra.mrb[16].mxu0 %vm1111_vm1, %v8766_v28  ;;  %v9736_v50 = vpop.permute.xlu1 %1943  ;;  %v9738_v20 = vpop.permute.xlu0 %1940  ;;  %v9741_v28 = vsel %vm11123_vm2, %v1765_v29, %v1767_v24  ;;  %7409 = vmatmul.mubr.msk.f32.gmra.mrb[18].mxu1 %vm1111_vm1, %v2025_v62  ;;  %v9762_v29 = vld [vmem:[%s10981_s9] ss:$0 sm:$0xff]  ;;  %v605_v62 = vld [vmem:[%s9734_s18 + $0x10] sm:$0xff] }
  0xfa   : > { %11234 = vst [vmem:[#allocation95_spill] sm:$0xff] %v9736_v50  ;;  %11235 = vst [vmem:[#allocation96_spill] sm:$0xff] %v9738_v20  ;;  %7508 = vmatprep.mubr.msk.f32.mxu0 %vm1111_vm1, %v8772_v42  ;;  %vm11048_vm3 = vcmp.eq.s32.totalorder %v9736_v50, 1  ;;  %vm11049_vm4 = vcmp.eq.s32.totalorder %v9738_v20, 1  ;;  %v1775_v50 = vrot.slane %v8870_v10, 1  ;;  %v9784_v20 = vsel %vm11123_vm2, %v1769_v17, %v1771_v12 }
  0xfb   : > { %v2027_v44 = vsel %vm11048_vm3, %v9652_v19, 0.0  ;;  %v9754_v34 = vsel %vm11048_vm3, %v9725_v51, 0.0  ;;  %v2026_v24 = vsel %vm11049_vm4, %v9661_v23, 0.0  ;;  %v9768_v42 = vsel %vm11049_vm4, %v9741_v28, 0.0  ;;  %v9807_v17 = vld [vmem:[%s10982_s10] ss:$0 sm:$0xff] }
  0xfc   : > { %11236 = vst [vmem:[#allocation97_spill] sm:$0xff] %v9754_v34  ;;  %11237 = vst [vmem:[#allocation98_spill] sm:$0xff] %v9768_v42  ;;  %7411 = vmatprep.mubr.msk.f32.mxu1 %vm1111_vm1, %v2026_v24  ;;  %v9774_v34 = vsel %vm11123_vm2, %v1771_v12, %v1773_v59  ;;  %v1777_v19 = vrot.slane %v8875_v15, 1  ;;  %v604_v24 = vld [vmem:[%s9734_s18 + $0x8] sm:$0xff]  ;;  %v4798_v42 = vmul.f32 %v9762_v29, %v605_v62 }
  0xfd   : > { %7509 = vmatmul.mubr.msk.f32.gmra.mrb[18].mxu0 %vm1111_vm1, %v8785_v4  ;;  %v9779_v23 = vpop.permute.xlu1 %1949  ;;  %v9781_v0 = vpop.permute.xlu0 %1946  ;;  %7412 = vmatmul.mubr.msk.f32.gmra.mrb[20].mxu1 %vm1111_vm1, %v2027_v44  ;;  %v4799_v62 = vmul.f32 %v9762_v29, %v606_v14 }
  0xfe   : > { %11238 = vst [vmem:[#allocation99_spill] sm:$0xff] %v9779_v23  ;;  %11239 = vst [vmem:[#allocation100_spill] sm:$0xff] %v9781_v0  ;;  %7511 = vmatprep.mubr.msk.f32.mxu0 %vm1111_vm1, %v8791_v25  ;;  %vm11057_vm3 = vcmp.eq.s32.totalorder %v9779_v23, 1  ;;  %vm11058_vm4 = vcmp.eq.s32.totalorder %v9781_v0, 1  ;;  %v1779_v23 = vrot.slane %v8885_v37, 1  ;;  %v9828_v0 = vsel %vm11123_vm2, %v1773_v59, %v1775_v50 }
  0xff   : > { %v2029_v4 = vsel %vm11057_vm3, %v9688_v39, 0.0  ;;  %v9799_v12 = vsel %vm11057_vm3, %v9774_v34, 0.0  ;;  %v2028_v44 = vsel %vm11058_vm4, %v9697_v6, 0.0  ;;  %v9813_v25 = vsel %vm11058_vm4, %v9784_v20, 0.0 }
 0x100   : > { %11240 = vst [vmem:[#allocation101_spill] sm:$0xff] %v9799_v12  ;;  %11241 = vst [vmem:[#allocation102_spill] sm:$0xff] %v9813_v25  ;;  %7414 = vmatprep.mubr.msk.f32.mxu1 %vm1111_vm1, %v2028_v44  ;;  %v9819_v12 = vsel %vm11123_vm2, %v1775_v50, %v1777_v19  ;;  %v1781_v39 = vrot.slane %v9295_v55, 1  ;;  %v4797_v44 = vmul.f32 %v9762_v29, %v604_v24  ;;  %v607_v25 = vld [vmem:[%s9734_s18 + $0x20] sm:$0xff] }
 0x101   : > { %7512 = vmatmul.mubr.msk.f32.gmra.mrb[20].mxu0 %vm1111_vm1, %v8814_v49  ;;  %11242 = vst [vmem:[#allocation103_spill] sm:$0xff] %v9819_v12  ;;  %v9823_v6 = vpop.permute.xlu1 %1955  ;;  %v9825_v14 = vpop.permute.xlu0 %1952  ;;  %7415 = vmatmul.mubr.msk.f32.gmra.mrb[22].mxu1 %vm1111_vm1, %v2029_v4  ;;  %v608_v49 = vld [vmem:[%s9734_s18 + $0x28] sm:$0xff]  ;;  %v4813_v16 = vadd.f32 %v9807_v17, %v4798_v42  ;;  %v4814_v24 = vadd.f32 %v9807_v17, %v4799_v62 }
 0x102   : > { %11243 = vst [vmem:[#allocation104_spill] sm:$0xff] %v9823_v6  ;;  %11244 = vst [vmem:[#allocation105_spill] sm:$0xff] %v9825_v14  ;;  %7514 = vmatprep.mubr.msk.f32.mxu0 %vm1111_vm1, %v8822_v2  ;;  %vm11064_vm3 = vcmp.eq.s32.totalorder %v9823_v6, 1  ;;  %vm11065_vm4 = vcmp.eq.s32.totalorder %v9825_v14, 1  ;;  %v9860_v42 = vsel %vm11123_vm2, %v1779_v23, %v1781_v39  ;;  %v4801_v6 = vmul.f32 %v9762_v29, %v608_v49  ;;  %v609_v49 = vld [vmem:[%s9734_s18 + $0x30] sm:$0xff] }
 0x103   : > { %v2031_v59 = vsel %vm11064_vm3, %v9725_v51, 0.0  ;;  %v9845_v4 = vsel %vm11064_vm3, %v9819_v12, 0.0  ;;  %v2030_v50 = vsel %vm11065_vm4, %v9741_v28, 0.0  ;;  %v9854_v2 = vsel %vm11065_vm4, %v9828_v0, 0.0 }
 0x104   : > { %11245 = vst [vmem:[#allocation106_spill] sm:$0xff] %v9845_v4  ;;  %11246 = vst [vmem:[#allocation107_spill] sm:$0xff] %v9854_v2  ;;  %7417 = vmatprep.mubr.msk.f32.mxu1 %vm1111_vm1, %v2030_v50  ;;  %v4800_v4 = vmul.f32 %v9762_v29, %v607_v25  ;;  %v9869_v14 = vsel %vm11123_vm2, %v1777_v19, %v1779_v23  ;;  %v3050_v50 = vrot.slane %v9298_v41, 1  ;;  %v9878_v25 = vmax.f32 %v4813_v16, 0.0 }
 0x105   : > { %7515 = vmatmul.mubr.msk.f32.gmra.mrb[22].mxu0 %vm1111_vm1, %v8836_v61  ;;  %v9864_v51 = vpop.permute.xlu1 %1961  ;;  %v9866_v62 = vpop.permute.xlu0 %1958  ;;  %7418 = vmatmul.mubr.msk.f32.gmra.mrb[24].mxu1 %vm1111_vm1, %v2031_v59  ;;  %v4812_v2 = vadd.f32 %v9807_v17, %v4797_v44  ;;  %v9892_v59 = vmax.f32 %v4814_v24, 0.0 }
 0x106   : > { %11247 = vst [vmem:[#allocation108_spill] sm:$0xff] %v9864_v51  ;;  %11248 = vst [vmem:[#allocation109_spill] sm:$0xff] %v9866_v62  ;;  %7517 = vmatprep.mubr.msk.f32.mxu0 %vm1111_vm1, %v8842_v3  ;;  %vm11069_vm3 = vcmp.eq.s32.totalorder %v9864_v51, 1  ;;  %vm11070_vm4 = vcmp.eq.s32.totalorder %v9866_v62, 1  ;;  %v4815_v3 = vadd.f32 %v9807_v17, %v4800_v4  ;;  %v9912_v24 = vsel %vm11123_vm2, %v3050_v50, 0.0 }
 0x107   : > { %v2033_v23 = vsel %vm11069_vm3, %v9774_v34, 0.0  ;;  %v9887_v19 = vsel %vm11069_vm3, %v9860_v42, 0.0  ;;  %v2032_v44 = vsel %vm11070_vm4, %v9784_v20, 0.0  ;;  %v9897_v16 = vsel %vm11070_vm4, %v9869_v14, 0.0 }
 0x108   : > { %11249 = vst [vmem:[#allocation110_spill] sm:$0xff] %v9887_v19  ;;  %11250 = vst [vmem:[#allocation111_spill] sm:$0xff] %v9897_v16  ;;  %7420 = vmatprep.mubr.msk.f32.mxu1 %vm1111_vm1, %v2032_v44  ;;  %v4816_v19 = vadd.f32 %v9807_v17, %v4801_v6  ;;  %v3051_v44 = vsel %vm11123_vm2, %v1781_v39, %v3050_v50  ;;  %v9915_v16 = vmax.f32 %v4812_v2, 0.0  ;;  %v4844_v39 = vrot.slane %v9892_v59, 7 }
 0x109   : > { %7518 = vmatmul.mubr.msk.f32.gmra.mrb[24].mxu0 %vm1111_vm1, %v8853_v43  ;;  %v9904_v61 = vpop.permute.xlu1 %1967  ;;  %v9906_v51 = vpop.permute.xlu0 %1964  ;;  %7421 = vmatmul.mubr.msk.f32.gmra.mrb[26].mxu1 %vm1111_vm1, %v2033_v23  ;;  %v4802_v4 = vmul.f32 %v9762_v29, %v609_v49  ;;  %v9931_v2 = vmax.f32 %v4815_v3, 0.0  ;;  %v5172_v46 = vrot.slane %v9892_v59, 1 }
 0x10a   : > { %7520 = vmatprep.mubr.msk.f32.mxu0 %vm1111_vm1, %v8859_v1  ;;  %vm2004_vm3 = vcmp.eq.s32.totalorder %v9904_v61, 1  ;;  %vm11075_vm4 = vcmp.eq.s32.totalorder %v9906_v51, 1  ;;  %v4842_v1 = vrot.slane %v9878_v25, 7  ;;  %v9933_v50 = vmax.f32 %v4816_v19, 0.0  ;;  %v11331_v61 = vld [vmem:[#allocation34_spill] sm:$0xff] }
 0x10b   : > { %v2035_v6 = vsel %vm2004_vm3, %v9819_v12, 0.0  ;;  %v2034_v23 = vsel %vm11075_vm4, %v9828_v0, 0.0  ;;  %v9937_v49 = vsel %vm11075_vm4, %v3051_v44, 0.0  ;;  %v9942_v43 = vsel %vm2004_vm3, %v9912_v24, 0.0 }
 0x10c   : > { %7423 = vmatprep.mubr.msk.f32.mxu1 %vm1111_vm1, %v2034_v23  ;;  %11251 = vst [vmem:[#allocation112_spill] sm:$0xff] %v9937_v49  ;;  %11252 = vst [vmem:[#allocation113_spill] sm:$0xff] %v9942_v43  ;;  %v4817_v19 = vadd.f32 %v9807_v17, %v4802_v4  ;;  %v4846_v4 = vrot.slane %v9931_v2, 7  ;;  %v5174_v36 = vrot.slane %v9931_v2, 1 }
 0x10d   : > { %7521 = vmatmul.mubr.msk.f32.gmra.mrb[26].mxu0 %vm1111_vm1, %v8870_v10  ;;  %v9944_v12 = vpop.permute.xlu1 %1973  ;;  %v1971_v62 = vpop.permute.xlu0 %1970  ;;  %7424 = vmatmul.mubr.msk.f32.gmra.mrb[28].mxu1 %vm1111_vm1, %v2035_v6  ;;  %v9962_v6 = vsel %vm796_vm10, %v4842_v1, %v4844_v39 }
 0x10e   : > { %7523 = vmatprep.mubr.msk.f32.mxu0 %vm1111_vm1, %v8875_v15  ;;  %vm11079_vm4 = vcmp.eq.s32.totalorder %v9944_v12, 1  ;;  %vm2005_vm15 = vcmp.eq.s32.totalorder %v1971_v62, 1  ;;  %11253 = vst [vmem:[#allocation114_spill] sm:$0xff] %v9962_v6  ;;  %v4848_v62 = vrot.slane %v9933_v50, 7  ;;  %v11254_v15 = vrot.slane %v9915_v16, 7 }
 0x10f   : > { %v2037_v23 = vsel %vm11079_vm4, %v9860_v42, 0.0  ;;  %v2036_v43 = vsel %vm2005_vm15, %v9869_v14, 0.0  ;;  %v9956_v49 = vsel %vm2005_vm15, %v3051_v44, 0.0 }
 0x110   : > { %7426 = vmatprep.mubr.msk.f32.mxu1 %vm1111_vm1, %v2036_v43  ;;  %v9971_v10 = vsel %vm796_vm10, %v11254_v15, %v4842_v1  ;;  %v9978_v43 = vmax.f32 %v4817_v19, 0.0  ;;  %v3055_v1 = vsel %vm1975_vm6, %v9402_v56, 0.0  ;;  %v9998_v19 = vsel %vm796_vm10, %v4846_v4, %v4848_v62 }
 0x111   : > { %7524 = vmatmul.mubr.msk.f32.gmra.mrb[28].mxu0 %vm1111_vm1, %v8885_v37  ;;  %v9966_v3 = vpop.permute.xlu1 %4883  ;;  %v9973_v44 = vpop.permute.xlu0 %4880  ;;  %7427 = vmatmul.mubr.msk.f32.gmra.mrb[30].mxu1 %vm1111_vm1, %v2037_v23  ;;  %11257 = vst [vmem:[#allocation117_spill] sm:$0xff] %v9998_v19 }
 0x112   : > { %7526 = vmatprep.mubr.msk.f32.mxu0 %vm1111_vm1, %v9295_v55  ;;  %vm11083_vm15 = vcmp.eq.s32.totalorder %v9966_v3, 1  ;;  %vm4901_vm4 = vcmp.eq.s32.totalorder %v9973_v44, 1  ;;  %v5178_v38 = vrot.slane %v9978_v43, 1 }
 0x113   : > { %v9985_v37 = vsel %vm11083_vm15, %v9962_v6, 0.0  ;;  %v9993_v15 = vsel %vm4901_vm4, %v9971_v10, 0.0 }
 0x114   : > { %11255 = vst [vmem:[#allocation115_spill] sm:$0xff] %v9985_v37  ;;  %11256 = vst [vmem:[#allocation116_spill] sm:$0xff] %v9993_v15  ;;  %v10003_v37 = vsel %vm796_vm10, %v4844_v39, %v4846_v4  ;;  %v3056_v15 = vsel %vm1976_vm5, %v9399_v33, 0.0 }
 0x115   : > { %7527 = vmatmul.mubr.msk.f32.gmra.mrb[30].mxu0 %vm1111_vm1, %v9298_v41  ;;  %v10000_v23 = vpop.permute.xlu1 %4889  ;;  %11258 = vst [vmem:[#allocation118_spill] sm:$0xff] %v10003_v37  ;;  %v10005_v6 = vpop.permute.xlu0 %4886 }
 0x116   : > { %7531 = vmatprep.mubr.msk.f32.mxu0 %vm1111_vm1, %v3055_v1  ;;  %vm4904_vm6 = vcmp.eq.s32.totalorder %v10000_v23, 1  ;;  %vm4903_vm15 = vcmp.eq.s32.totalorder %v10005_v6, 1  ;;  %v5170_v1 = vrot.slane %v9878_v25, 1  ;;  %v11448_v6 = vrot.slane %v9978_v43, 7 }
 0x117   : > { %v10018_v39 = vsel %vm4904_vm6, %v9998_v19, 0.0  ;;  %v10028_v56 = vsel %vm4903_vm15, %v10003_v37, 0.0 }
 0x118   : > { %11259 = vst [vmem:[#allocation119_spill] sm:$0xff] %v10018_v39  ;;  %11260 = vst [vmem:[#allocation120_spill] sm:$0xff] %v10028_v56  ;;  %v11261_v39 = vrot.slane %v9978_v43, 7 }
 0x119   : > { %7532 = vmatmul.mubr.msk.f32.vlgmr.msra.gmra.mrb[0].mxu0 %vm1111_vm1, %v3056_v15  ;;  %v10032_v33 = vpop.permute.xlu1 %4895  ;;  %v10039_v19 = vpop.permute.xlu0 %4892  ;;  %v11265_v15 = vrot.slane %v9915_v16, 1 }
 0x11a   : > { %v10037_v4 = vsel %vm796_vm10, %v4848_v62, %v11261_v39  ;;  %11263 = vst [vmem:[#allocation122_spill] sm:$0xff] %v10039_v19  ;;  %7534 = vmatprep.mubr.msk.f32.mxu0 %vm1111_vm1, %v3057_v18  ;;  %7580 = vmatpush3.msk.msra.mxu0 %vm1175_vm12, %v9433_v21  ;;  %vm4905_vm5 = vcmp.eq.s32.totalorder %v10039_v19, 1  ;;  %v4803_v62 = vmul.f32 %v9762_v29, %v610_v45  ;;  %v3059_v18 = vsel %vm1979_vm11, %v9393_v30, 0.0 }
 0x11b   : > { %11262 = vst [vmem:[#allocation121_spill] sm:$0xff] %v10037_v4  ;;  %7629 = vmatprep.subr.msk.mxu0 %vm1175_vm12, %v11264_v9  ;;  %v10055_v39 = vsel %vm11123_vm2, %v11265_v15, %v5170_v1  ;;  %v10063_v56 = vsel %vm4905_vm5, %v10037_v4, 0.0  ;;  %v3060_v30 = vsel %vm1980_vm9, %v9384_v63, 0.0  ;;  %v10088_v15 = vsel %vm11123_vm2, %v5172_v46, %v5174_v36 }
 0x11c   : > { %11266 = vst [vmem:[#allocation123_spill] sm:$0xff] %v10055_v39  ;;  %11267 = vst [vmem:[#allocation124_spill] sm:$0xff] %v10063_v56  ;;  %v4818_v27 = vadd.f32 %v9807_v17, %v4803_v62  ;;  %v10095_v17 = vsel %vm11123_vm2, %v5170_v1, %v5172_v46  ;;  %v3063_v1 = vsel %vm1983_vm0, %v9481_v53, 0.0  ;;  %vm11284_vm0 = vcmp.eq.s32.totalorder %v9550_v54, 1  ;;  %v11396_v56 = vld [vmem:[#allocation66_spill] sm:$0xff] }
 0x11d   : > { %7535 = vmatmul.mubr.msk.f32.gmra.mrb[2].mxu0 %vm1111_vm1, %v3058_v52  ;;  %v10068_v29 = vpop.permute.xlu1 %5208  ;;  %v10070_v45 = vpop.permute.xlu0 %4898  ;;  %v3061_v52 = vsel %vm1981_vm14, %v9440_v58, 0.0  ;;  %11271 = vst [vmem:[#allocation128_spill] sm:$0xff] %v10088_v15  ;;  %11273 = vst [vmem:[#allocation130_spill] sm:$0xff] %v10095_v17  ;;  %vm11282_vm14 = vcmp.eq.s32.totalorder %v9512_v11, 1 }
 0x11e   : > { %11268 = vst [vmem:[#allocation125_spill] sm:$0xff] %v10068_v29  ;;  %11269 = vst [vmem:[#allocation126_spill] sm:$0xff] %v10070_v45  ;;  %7537 = vmatprep.mubr.msk.f32.mxu0 %vm1111_vm1, %v3059_v18  ;;  %vm5231_vm7 = vcmp.eq.s32.totalorder %v10068_v29, 1  ;;  %v5176_v18 = vrot.slane %v9933_v50, 1  ;;  %v10105_v58 = vmax.f32 %v4818_v27, 0.0  ;;  %v3064_v53 = vsel %vm11282_vm14, %v9472_v8, 0.0 }
 0x11f   : > { %v10081_v9 = vsel %vm5231_vm7, %v10055_v39, 0.0 }
 0x120   : > { %11270 = vst [vmem:[#allocation127_spill] sm:$0xff] %v10081_v9  ;;  %11275 = vst [vmem:[#allocation132_spill] sm:$0xff] %v10105_v58  ;;  %v10122_v60 = vsel %vm11123_vm2, %v5176_v18, %v5178_v38  ;;  %v10127_v27 = vsel %vm11123_vm2, %v5174_v36, %v5176_v18  ;;  %v11089_v5 = vrot.slane %v10105_v58, 1  ;;  %v3065_v36 = vsel %vm11284_vm0, %v9517_v26, 0.0  ;;  %v11395_v9 = vld [vmem:[#allocation67_spill] sm:$0xff]  ;;  %v11397_v58 = vld [vmem:[#allocation69_spill] sm:$0xff] }
 0x121   : > { %7538 = vmatmul.mubr.msk.f32.gmra.mrb[4].mxu0 %vm1111_vm1, %v3060_v30  ;;  %v10092_v63 = vpop.permute.xlu1 %5214  ;;  %11278 = vst [vmem:[#allocation135_spill] sm:$0xff] %v10122_v60  ;;  %11280 = vst [vmem:[#allocation137_spill] sm:$0xff] %v10127_v27  ;;  %vm11288_vm0 = vcmp.eq.s32.totalorder %v9548_v35, 1  ;;  %v11292_v35 = vld [vmem:[#allocation78_spill] sm:$0xff] }
 0x122   : > { %11272 = vst [vmem:[#allocation129_spill] sm:$0xff] %v10092_v63  ;;  %v10097_v62 = vpop.permute.xlu0 %5211  ;;  %7540 = vmatprep.mubr.msk.f32.mxu0 %vm1111_vm1, %v3061_v52  ;;  %vm5233_vm8 = vcmp.eq.s32.totalorder %v10092_v63, 1  ;;  %v10155_v11 = vsel %vm11123_vm2, %v5178_v38, %v11089_v5  ;;  %v3066_v54 = vsel %vm11288_vm0, %v9508_v32, 0.0  ;;  %vm11293_vm0 = vcmp.eq.s32.totalorder %v11292_v35, 1 }
 0x123   : > { %11274 = vst [vmem:[#allocation131_spill] sm:$0xff] %v10097_v62  ;;  %vm5232_vm9 = vcmp.eq.s32.totalorder %v10097_v62, 1  ;;  %v10110_v30 = vsel %vm5233_vm8, %v10088_v15, 0.0  ;;  %11286 = vst [vmem:[#allocation141_spill] sm:$0xff] %v10155_v11  ;;  %v3069_v32 = vsel %vm11293_vm0, %v9589_v7, 0.0 }
 0x124   : > { %11276 = vst [vmem:[#allocation133_spill] sm:$0xff] %v10110_v30  ;;  %v10118_v46 = vsel %vm5232_vm9, %v10095_v17, 0.0  ;;  %v11394_v30 = vld [vmem:[#allocation64_spill] sm:$0xff] }
 0x125   : > { %11277 = vst [vmem:[#allocation134_spill] sm:$0xff] %v10118_v46  ;;  %7541 = vmatmul.mubr.msk.f32.gmra.mrb[6].mxu0 %vm1111_vm1, %v3062_v40  ;;  %v10124_v57 = vpop.permute.xlu1 %5220 }
 0x126   : > { %11279 = vst [vmem:[#allocation136_spill] sm:$0xff] %v10124_v57  ;;  %v10129_v52 = vpop.permute.xlu0 %5217  ;;  %7543 = vmatprep.mubr.msk.f32.mxu0 %vm1111_vm1, %v3063_v1  ;;  %vm11086_vm11 = vcmp.eq.s32.totalorder %v10124_v57, 1  ;;  %v11406_v57 = vld [vmem:[#allocation80_spill] sm:$0xff] }
 0x127   : > { %11281 = vst [vmem:[#allocation138_spill] sm:$0xff] %v10129_v52  ;;  %vm11087_vm13 = vcmp.eq.s32.totalorder %v10129_v52, 1  ;;  %v10141_v40 = vsel %vm11086_vm11, %v10122_v60, 0.0  ;;  %vm11289_vm11 = vcmp.eq.s32.totalorder %v9586_v13, 1  ;;  %v11294_v13 = vld [vmem:[#allocation77_spill] sm:$0xff]  ;;  %v11399_v60 = vld [vmem:[#allocation71_spill] sm:$0xff] }
 0x128   : > { %11283 = vst [vmem:[#allocation139_spill] sm:$0xff] %v10141_v40  ;;  %v10149_v18 = vsel %vm11087_vm13, %v10127_v27, 0.0  ;;  %v3067_v26 = vsel %vm11289_vm11, %v9553_v48, 0.0  ;;  %vm11291_vm13 = vcmp.eq.s32.totalorder %v9584_v47, 1  ;;  %vm11295_vm11 = vcmp.eq.s32.totalorder %v11294_v13, 1  ;;  %v11299_v47 = vld [vmem:[#allocation76_spill] sm:$0xff] }
 0x129   : > { %11285 = vst [vmem:[#allocation140_spill] sm:$0xff] %v10149_v18  ;;  %7544 = vmatmul.mubr.msk.f32.gmra.mrb[8].mxu0 %vm1111_vm1, %v3064_v53  ;;  %v3068_v38 = vsel %vm11291_vm13, %v9544_v22, 0.0  ;;  %v3070_v48 = vsel %vm11295_vm11, %v9580_v31, 0.0  ;;  %v11296_v53 = vld [vmem:[#allocation79_spill] sm:$0xff]  ;;  %v11305_v31 = vld [vmem:[#allocation82_spill] sm:$0xff] }
 0x12a   : > { %v10157_v8 = vpop.permute.xlu0 %5223  ;;  %7546 = vmatprep.mubr.msk.f32.mxu0 %vm1111_vm1, %v3065_v36  ;;  %v11297_v36 = vld [vmem:[#allocation84_spill] sm:$0xff]  ;;  %v11300_v22 = vld [vmem:[#allocation83_spill] sm:$0xff]  ;;  %v11404_v27 = vld [vmem:[#allocation74_spill] sm:$0xff] }
 0x12b   : > { %11287 = vst [vmem:[#allocation142_spill] sm:$0xff] %v10157_v8  ;;  %vm11088_vm14 = vcmp.eq.s32.totalorder %v10157_v8, 1  ;;  %vm11301_vm13 = vcmp.eq.s32.totalorder %v11300_v22, 1  ;;  %v11401_v8 = vld [vmem:[#allocation73_spill] sm:$0xff] }
 0x12c   : > { %v10170_v1 = vsel %vm11088_vm14, %v10155_v11, 0.0  ;;  %vm11298_vm14 = vcmp.eq.s32.totalorder %v11297_v36, 1  ;;  %v3072_v7 = vsel %vm11301_vm13, %v11299_v47, 0.0  ;;  %v11312_v47 = vld [vmem:[#allocation95_spill] sm:$0xff]  ;;  %v11398_v11 = vld [vmem:[#allocation68_spill] sm:$0xff] }
 0x12d   : > { %11290 = vst [vmem:[#allocation143_spill] sm:$0xff] %v10170_v1  ;;  %7547 = vmatmul.mubr.msk.f32.gmra.mrb[10].mxu0 %vm1111_vm1, %v3066_v54  ;;  %v3071_v54 = vsel %vm11298_vm14, %v11296_v53, 0.0  ;;  %v11308_v53 = vld [vmem:[#allocation91_spill] sm:$0xff]  ;;  %vm11313_vm13 = vcmp.eq.s32.totalorder %v11312_v47, 1  ;;  %v11326_v47 = vld [vmem:[#allocation108_spill] sm:$0xff] }
 0x12e   : > { %7549 = vmatprep.mubr.msk.f32.mxu0 %vm1111_vm1, %v3067_v26  ;;  %v11302_v26 = vld [vmem:[#allocation85_spill] sm:$0xff] }
 0x131   : > { %7550 = vmatmul.mubr.msk.f32.gmra.mrb[12].mxu0 %vm1111_vm1, %v3068_v38  ;;  %v11303_v38 = vld [vmem:[#allocation90_spill] sm:$0xff] }
 0x132   : > { %7552 = vmatprep.mubr.msk.f32.mxu0 %vm1111_vm1, %v3069_v32  ;;  %vm11304_vm0 = vcmp.eq.s32.totalorder %v11303_v38, 1  ;;  %v11306_v32 = vld [vmem:[#allocation89_spill] sm:$0xff]  ;;  %v11316_v38 = vld [vmem:[#allocation94_spill] sm:$0xff] }
 0x133   : > { %v3073_v35 = vsel %vm11304_vm0, %v11302_v26, 0.0  ;;  %vm11307_vm11 = vcmp.eq.s32.totalorder %v11306_v32, 1  ;;  %v11319_v32 = vld [vmem:[#allocation105_spill] sm:$0xff] }
 0x134   : > { %v3074_v13 = vsel %vm11307_vm11, %v11305_v31, 0.0 }
 0x135   : > { %7553 = vmatmul.mubr.msk.f32.gmra.mrb[14].mxu0 %vm1111_vm1, %v3070_v48  ;;  %v11309_v48 = vld [vmem:[#allocation96_spill] sm:$0xff] }
 0x136   : > { %7555 = vmatprep.mubr.msk.f32.mxu0 %vm1111_vm1, %v3071_v54  ;;  %vm11310_vm14 = vcmp.eq.s32.totalorder %v11309_v48, 1  ;;  %v11311_v54 = vld [vmem:[#allocation88_spill] sm:$0xff]  ;;  %v11323_v48 = vld [vmem:[#allocation109_spill] sm:$0xff] }
 0x137   : > { %v3075_v36 = vsel %vm11310_vm14, %v11308_v53, 0.0  ;;  %v3076_v22 = vsel %vm11313_vm13, %v11311_v54, 0.0  ;;  %vm11320_vm14 = vcmp.eq.s32.totalorder %v11319_v32, 1  ;;  %v11321_v53 = vld [vmem:[#allocation104_spill] sm:$0xff]  ;;  %v11325_v54 = vld [vmem:[#allocation103_spill] sm:$0xff]  ;;  %v11342_v32 = vld [vmem:[#allocation41_spill] sm:$0xff] }
 0x138   : > { %vm11322_vm13 = vcmp.eq.s32.totalorder %v11321_v53, 1  ;;  %v11344_v53 = vld [vmem:[#allocation43_spill] sm:$0xff] }
 0x139   : > { %7556 = vmatmul.mubr.msk.f32.gmra.mrb[16].mxu0 %vm1111_vm1, %v3072_v7  ;;  %v11314_v7 = vld [vmem:[#allocation100_spill] sm:$0xff] }
 0x13a   : > { %7558 = vmatprep.mubr.msk.f32.mxu0 %vm1111_vm1, %v3073_v35  ;;  %vm11315_vm0 = vcmp.eq.s32.totalorder %v11314_v7, 1  ;;  %v11317_v35 = vld [vmem:[#allocation99_spill] sm:$0xff] }
 0x13b   : > { %v3077_v26 = vsel %vm11315_vm0, %v9741_v28, 0.0  ;;  %vm11318_vm11 = vcmp.eq.s32.totalorder %v11317_v35, 1  ;;  %v3080_v28 = vsel %vm11322_vm13, %v9774_v34, 0.0  ;;  %vm11324_vm0 = vcmp.eq.s32.totalorder %v11323_v48, 1  ;;  %v11336_v7 = vld [vmem:[#allocation35_spill] sm:$0xff]  ;;  %v11346_v48 = vld [vmem:[#allocation45_spill] sm:$0xff] }
 0x13c   : > { %v3078_v31 = vsel %vm11318_vm11, %v11316_v38, 0.0  ;;  %vm11327_vm11 = vcmp.eq.s32.totalorder %v11326_v47, 1  ;;  %v3084_v34 = vsel %vm2004_vm3, %v9860_v42, 0.0  ;;  %vm11329_vm13 = vcmp.eq.s32.totalorder %v9944_v12, 1  ;;  %v11332_v42 = vld [vmem:[#allocation31_spill] sm:$0xff]  ;;  %v11334_v12 = vld [vmem:[#allocation33_spill] sm:$0xff] }
 0x13d   : > { %7559 = vmatmul.mubr.msk.f32.gmra.mrb[18].mxu0 %vm1111_vm1, %v3074_v13  ;;  %v3079_v13 = vsel %vm11320_vm14, %v9784_v20, 0.0  ;;  %v3082_v20 = vsel %vm11327_vm11, %v11325_v54, 0.0  ;;  %vm11328_vm14 = vcmp.eq.s32.totalorder %v9906_v51, 1  ;;  %v11330_v51 = vld [vmem:[#allocation32_spill] sm:$0xff]  ;;  %v11338_v38 = vld [vmem:[#allocation37_spill] sm:$0xff]  ;;  %v11340_v35 = vld [vmem:[#allocation39_spill] sm:$0xff] }
 0x13e   : > { %7561 = vmatprep.mubr.msk.f32.mxu0 %vm1111_vm1, %v3075_v36  ;;  %v3081_v36 = vsel %vm11324_vm0, %v9828_v0, 0.0  ;;  %v3086_v0 = vsel %vm11329_vm13, %v9912_v24, 0.0  ;;  %v11335_v24 = vld [vmem:[#allocation36_spill] sm:$0xff]  ;;  %v11348_v54 = vld [vmem:[#allocation47_spill] sm:$0xff]  ;;  %v11349_v47 = vld [vmem:[#allocation50_spill] sm:$0xff]  ;;  %vm11423_vm3 = vcmp.eq.s32.totalorder %v9966_v3, 1 }
 0x13f   : > { %vm4906_vm0 = vcmp.eq.s32.totalorder %v10032_v33, 1 }
 0x141   : > { %7562 = vmatmul.mubr.msk.f32.gmra.mrb[20].mxu0 %vm1111_vm1, %v3076_v22  ;;  %v3083_v22 = vsel %vm11328_vm14, %v9869_v14, 0.0  ;;  %v765_v14 = vld [vmem:[%s10979_s7 + $0x20] sm:$0xf] }
 0x142   : > { %7564 = vmatprep.mubr.msk.f32.mxu0 %vm1111_vm1, %v3077_v26  ;;  %v11337_v26 = vld [vmem:[#allocation38_spill] sm:$0xff] }
 0x145   : > { %7565 = vmatmul.mubr.msk.f32.gmra.mrb[22].mxu0 %vm1111_vm1, %v3078_v31  ;;  %v11341_v31 = vld [vmem:[#allocation42_spill] sm:$0xff] }
 0x146   : > { %7567 = vmatprep.mubr.msk.f32.mxu0 %vm1111_vm1, %v3079_v13  ;;  %v11343_v13 = vld [vmem:[#allocation44_spill] sm:$0xff] }
 0x149   : > { %7568 = vmatmul.mubr.msk.f32.gmra.mrb[24].mxu0 %vm1111_vm1, %v3080_v28  ;;  %v11345_v28 = vld [vmem:[#allocation46_spill] sm:$0xff] }
 0x14a   : > { %7570 = vmatprep.mubr.msk.f32.mxu0 %vm1111_vm1, %v3081_v36  ;;  %v11347_v36 = vld [vmem:[#allocation48_spill] sm:$0xff] }
 0x14d   : > { %7571 = vmatmul.mubr.msk.f32.gmra.mrb[26].mxu0 %vm1111_vm1, %v3082_v20  ;;  %v11350_v20 = vld [vmem:[#allocation49_spill] sm:$0xff] }
 0x14e   : > { %7573 = vmatprep.mubr.msk.f32.mxu0 %vm1111_vm1, %v3083_v22  ;;  %v11351_v22 = vld [vmem:[#allocation52_spill] sm:$0xff] }
 0x151   : > { %7574 = vmatmul.mubr.msk.f32.gmra.mrb[28].mxu0 %vm1111_vm1, %v3084_v34  ;;  %v11352_v34 = vld [vmem:[#allocation51_spill] sm:$0xff] }
 0x152   : > { %7576 = vmatprep.mubr.msk.f32.mxu0 %vm1111_vm1, %v9956_v49  ;;  %v11333_v49 = vrot.slane %v9433_v21, 4  ;;  %v11339_v21 = vld [vmem:[#allocation40_spill] sm:$0xff] }
 0x155   : > { %7577 = vmatmul.mubr.msk.f32.gmra.mrb[30].mxu0 %vm1111_vm1, %v3086_v0  ;;  %v11353_v0 = vld [vmem:[#allocation54_spill] sm:$0xff] }
 0x156   : > { %7581 = vmatprep.mubr.msk.f32.mxu0 %vm1111_vm1, %v11330_v51  ;;  %v11354_v51 = vld [vmem:[#allocation53_spill] sm:$0xff] }
 0x159   : > { %7582 = vmatmul.mubr.msk.f32.vlgmr.msra.gmra.mrb[0].mxu0 %vm1111_vm1, %v11331_v61  ;;  %v11355_v61 = vld [vmem:[#allocation56_spill] sm:$0xff] }
 0x15a   : > { %7584 = vmatprep.mubr.msk.f32.mxu0 %vm1111_vm1, %v11332_v42  ;;  %7630 = vmatpush3.msk.msra.mxu0 %vm1175_vm12, %v11333_v49  ;;  %v11356_v42 = vld [vmem:[#allocation55_spill] sm:$0xff]  ;;  %v11357_v49 = vld [vmem:[#allocation58_spill] sm:$0xff] }
 0x15b   : > { %7679 = vmatprep.subr.msk.mxu0 %vm1175_vm12, %v765_v14 }
 0x15d   : > { %7585 = vmatmul.mubr.msk.f32.gmra.mrb[2].mxu0 %vm1111_vm1, %v11334_v12  ;;  %v11358_v12 = vld [vmem:[#allocation57_spill] sm:$0xff] }
 0x15e   : > { %7587 = vmatprep.mubr.msk.f32.mxu0 %vm1111_vm1, %v11335_v24  ;;  %v11359_v24 = vld [vmem:[#allocation59_spill] sm:$0xff] }
 0x161   : > { %7588 = vmatmul.mubr.msk.f32.gmra.mrb[4].mxu0 %vm1111_vm1, %v11336_v7  ;;  %v11360_v7 = vld [vmem:[#allocation60_spill] sm:$0xff] }
 0x162   : > { %7590 = vmatprep.mubr.msk.f32.mxu0 %vm1111_vm1, %v11337_v26  ;;  %v11361_v26 = vld [vmem:[#allocation61_spill] sm:$0xff] }
 0x165   : > { %7591 = vmatmul.mubr.msk.f32.gmra.mrb[6].mxu0 %vm1111_vm1, %v11338_v38  ;;  %v11362_v38 = vmov 0.0  }
 0x166   : > { %7593 = vmatprep.mubr.msk.f32.mxu0 %vm1111_vm1, %v11339_v21  ;;  %v11363_v21 = vld [vmem:[#allocation3_spill] sm:$0xff] }
 0x169   : > { %7594 = vmatmul.mubr.msk.f32.gmra.mrb[8].mxu0 %vm1111_vm1, %v11340_v35  ;;  %v11364_v35 = vld [vmem:[#allocation4_spill] sm:$0xff] }
 0x16a   : > { %7596 = vmatprep.mubr.msk.f32.mxu0 %vm1111_vm1, %v11341_v31  ;;  %v11365_v31 = vld [vmem:[#allocation5_spill] sm:$0xff] }
 0x16d   : > { %7597 = vmatmul.mubr.msk.f32.gmra.mrb[10].mxu0 %vm1111_vm1, %v11342_v32  ;;  %v11366_v32 = vld [vmem:[#allocation6_spill] sm:$0xff] }
 0x16e   : > { %7599 = vmatprep.mubr.msk.f32.mxu0 %vm1111_vm1, %v11343_v13  ;;  %v11367_v13 = vld [vmem:[#allocation7_spill] sm:$0xff] }
 0x171   : > { %7600 = vmatmul.mubr.msk.f32.gmra.mrb[12].mxu0 %vm1111_vm1, %v11344_v53  ;;  %v11368_v53 = vld [vmem:[#allocation8_spill] sm:$0xff] }
 0x172   : > { %7602 = vmatprep.mubr.msk.f32.mxu0 %vm1111_vm1, %v11345_v28  ;;  %v11369_v28 = vld [vmem:[#allocation9_spill] sm:$0xff] }
 0x175   : > { %7603 = vmatmul.mubr.msk.f32.gmra.mrb[14].mxu0 %vm1111_vm1, %v11346_v48  ;;  %v11370_v48 = vld [vmem:[#allocation10_spill] sm:$0xff] }
 0x176   : > { %7605 = vmatprep.mubr.msk.f32.mxu0 %vm1111_vm1, %v11347_v36  ;;  %v11371_v36 = vld [vmem:[#allocation11_spill] sm:$0xff] }
 0x179   : > { %7606 = vmatmul.mubr.msk.f32.gmra.mrb[16].mxu0 %vm1111_vm1, %v11348_v54 }
 0x17a   : > { %7608 = vmatprep.mubr.msk.f32.mxu0 %vm1111_vm1, %v11349_v47 }
 0x17d   : > { %7609 = vmatmul.mubr.msk.f32.gmra.mrb[18].mxu0 %vm1111_vm1, %v11350_v20  ;;  %v11373_v20 = vld [vmem:[#allocation13_spill] sm:$0xff] }
 0x17e   : > { %7611 = vmatprep.mubr.msk.f32.mxu0 %vm1111_vm1, %v11351_v22 }
 0x181   : > { %7612 = vmatmul.mubr.msk.f32.gmra.mrb[20].mxu0 %vm1111_vm1, %v11352_v34  ;;  %v11374_v34 = vld [vmem:[#allocation14_spill] sm:$0xff] }
 0x182   : > { %7614 = vmatprep.mubr.msk.f32.mxu0 %vm1111_vm1, %v11353_v0 }
 0x185   : > { %7615 = vmatmul.mubr.msk.f32.gmra.mrb[22].mxu0 %vm1111_vm1, %v11354_v51  ;;  %v11375_v51 = vld [vmem:[#allocation15_spill] sm:$0xff] }
 0x186   : > { %7617 = vmatprep.mubr.msk.f32.mxu0 %vm1111_vm1, %v11355_v61 }
 0x189   : > { %7618 = vmatmul.mubr.msk.f32.gmra.mrb[24].mxu0 %vm1111_vm1, %v11356_v42  ;;  %v11376_v42 = vld [vmem:[#allocation16_spill] sm:$0xff] }
 0x18a   : > { %7620 = vmatprep.mubr.msk.f32.mxu0 %vm1111_vm1, %v11357_v49 }
 0x18d   : > { %7621 = vmatmul.mubr.msk.f32.gmra.mrb[26].mxu0 %vm1111_vm1, %v11358_v12  ;;  %v11377_v12 = vld [vmem:[#allocation17_spill] sm:$0xff] }
 0x18e   : > { %7623 = vmatprep.mubr.msk.f32.mxu0 %vm1111_vm1, %v11359_v24 }
 0x191   : > { %7624 = vmatmul.mubr.msk.f32.gmra.mrb[28].mxu0 %vm1111_vm1, %v11360_v7  ;;  %v11378_v7 = vld [vmem:[#allocation18_spill] sm:$0xff] }
 0x192   : > { %7626 = vmatprep.mubr.msk.f32.mxu0 %vm1111_vm1, %v11361_v26 }
 0x195   : > { %7627 = vmatmul.mubr.f32.gmra.mrb[30].mxu0 %v11362_v38 }
 0x196   : > { %7631 = vmatprep.mubr.msk.f32.mxu0 %vm1111_vm1, %v11363_v21  ;;  %v11379_v21 = vld [vmem:[#allocation19_spill] sm:$0xff] }
 0x199   : > { %7632 = vmatmul.mubr.msk.f32.vlgmr.msra.gmra.mrb[0].mxu0 %vm1111_vm1, %v11364_v35 }
 0x19a   : > { %7634 = vmatprep.mubr.msk.f32.mxu0 %vm1111_vm1, %v11365_v31  ;;  %7680 = vmatpush3.msk.msra.mxu0 %vm1175_vm12, %v765_v14  ;;  %v11372_v14 = vld [vmem:[#allocation12_spill] sm:$0xff] }
 0x19b   : > { %v11380_v31 = vld [vmem:[#allocation20_spill] sm:$0xff] }
 0x19d   : > { %7635 = vmatmul.mubr.msk.f32.gmra.mrb[2].mxu0 %vm1111_vm1, %v11366_v32 }
 0x19e   : > { %7637 = vmatprep.mubr.msk.f32.mxu0 %vm1111_vm1, %v11367_v13  ;;  %v11381_v13 = vld [vmem:[#allocation21_spill] sm:$0xff] }
 0x1a1   : > { %7638 = vmatmul.mubr.msk.f32.gmra.mrb[4].mxu0 %vm1111_vm1, %v11368_v53 }
 0x1a2   : > { %7640 = vmatprep.mubr.msk.f32.mxu0 %vm1111_vm1, %v11369_v28  ;;  %v11382_v28 = vld [vmem:[#allocation22_spill] sm:$0xff] }
 0x1a5   : > { %7641 = vmatmul.mubr.msk.f32.gmra.mrb[6].mxu0 %vm1111_vm1, %v11370_v48 }
 0x1a6   : > { %7643 = vmatprep.mubr.msk.f32.mxu0 %vm1111_vm1, %v11371_v36  ;;  %v11383_v36 = vld [vmem:[#allocation23_spill] sm:$0xff] }
 0x1a8   : > { %v10337_v54 = vpop.f32.mrb[0].mxu1 }
 0x1a9   : > { %7644 = vmatmul.mubr.msk.f32.gmra.mrb[8].mxu0 %vm1111_vm1, %v11372_v14  ;;  %v10341_v47 = vpop.f32.mrb[1].mxu1 }
 0x1aa   : > { %7646 = vmatprep.mubr.msk.f32.mxu0 %vm1111_vm1, %v11373_v20  ;;  %v11384_v20 = vld [vmem:[#allocation24_spill] sm:$0xff] }
 0x1ac   : > { %v10345_v22 = vpop.f32.mrb[2].mxu1 }
 0x1ad   : > { %7647 = vmatmul.mubr.msk.f32.gmra.mrb[10].mxu0 %vm1111_vm1, %v11374_v34  ;;  %v10349_v0 = vpop.f32.mrb[3].mxu1 }
 0x1ae   : > { %7649 = vmatprep.mubr.msk.f32.mxu0 %vm1111_vm1, %v11375_v51  ;;  %v11385_v51 = vld [vmem:[#allocation25_spill] sm:$0xff] }
 0x1b0   : > { %v10353_v61 = vpop.f32.mrb[4].mxu1 }
 0x1b1   : > { %7650 = vmatmul.mubr.msk.f32.gmra.mrb[12].mxu0 %vm1111_vm1, %v11376_v42  ;;  %v10357_v49 = vpop.f32.mrb[5].mxu1 }
 0x1b2   : > { %7652 = vmatprep.mubr.msk.f32.mxu0 %vm1111_vm1, %v11377_v12  ;;  %v11386_v12 = vld [vmem:[#allocation26_spill] sm:$0xff] }
 0x1b4   : > { %v10361_v24 = vpop.f32.mrb[6].mxu1 }
 0x1b5   : > { %7653 = vmatmul.mubr.msk.f32.gmra.mrb[14].mxu0 %vm1111_vm1, %v11378_v7  ;;  %v10365_v26 = vpop.f32.mrb[7].mxu1 }
 0x1b6   : > { %7655 = vmatprep.mubr.msk.f32.mxu0 %vm1111_vm1, %v11379_v21  ;;  %v11387_v21 = vld [vmem:[#allocation27_spill] sm:$0xff] }
 0x1b8   : > { %v10369_v35 = vpop.f32.mrb[8].mxu1 }
 0x1b9   : > { %7656 = vmatmul.mubr.msk.f32.gmra.mrb[16].mxu0 %vm1111_vm1, %v11380_v31  ;;  %v10373_v32 = vpop.f32.mrb[9].mxu1 }
 0x1ba   : > { %7658 = vmatprep.mubr.msk.f32.mxu0 %vm1111_vm1, %v11381_v13  ;;  %v11388_v13 = vld [vmem:[#allocation28_spill] sm:$0xff] }
 0x1bc   : > { %v10377_v53 = vpop.f32.mrb[10].mxu1 }
 0x1bd   : > { %7659 = vmatmul.mubr.msk.f32.gmra.mrb[18].mxu0 %vm1111_vm1, %v11382_v28  ;;  %v10381_v48 = vpop.f32.mrb[11].mxu1 }
 0x1be   : > { %7661 = vmatprep.mubr.msk.f32.mxu0 %vm1111_vm1, %v11383_v36  ;;  %v11389_v36 = vld [vmem:[#allocation29_spill] sm:$0xff] }
 0x1c0   : > { %v10385_v14 = vpop.f32.mrb[12].mxu1 }
 0x1c1   : > { %7662 = vmatmul.mubr.msk.f32.gmra.mrb[20].mxu0 %vm1111_vm1, %v11384_v20  ;;  %v10389_v34 = vpop.f32.mrb[13].mxu1 }
 0x1c2   : > { %7664 = vmatprep.mubr.msk.f32.mxu0 %vm1111_vm1, %v11385_v51  ;;  %v11390_v51 = vld [vmem:[#allocation30_spill] sm:$0xff] }
 0x1c4   : > { %v10393_v42 = vpop.f32.mrb[14].mxu1 }
 0x1c5   : > { %7665 = vmatmul.mubr.msk.f32.gmra.mrb[22].mxu0 %vm1111_vm1, %v11386_v12  ;;  %v10397_v7 = vpop.f32.mrb[15].mxu1 }
 0x1c6   : > { %7667 = vmatprep.mubr.msk.f32.mxu0 %vm1111_vm1, %v11387_v21 }
 0x1c8   : > { %v10401_v31 = vpop.f32.mrb[16].mxu1 }
 0x1c9   : > { %7668 = vmatmul.mubr.msk.f32.gmra.mrb[24].mxu0 %vm1111_vm1, %v11388_v13  ;;  %v10405_v28 = vpop.f32.mrb[17].mxu1 }
 0x1ca   : > { %7670 = vmatprep.mubr.msk.f32.mxu0 %vm1111_vm1, %v11389_v36 }
 0x1cc   : > { %v10409_v20 = vpop.f32.mrb[18].mxu1 }
 0x1cd   : > { %7671 = vmatmul.mubr.msk.f32.gmra.mrb[26].mxu0 %vm1111_vm1, %v11390_v51  ;;  %v10413_v12 = vpop.f32.mrb[19].mxu1  ;;  %v11391_v51 = vld [vmem:[#allocation63_spill] sm:$0xff] }
 0x1ce   : > { %7673 = vmatprep.mubr.msk.f32.mxu0 %vm1111_vm1, %v9295_v55  ;;  %v11392_v55 = vld [vmem:[#allocation62_spill] sm:$0xff] }
 0x1d0   : > { %v10417_v21 = vpop.f32.mrb[20].mxu1 }
 0x1d1   : > { %7674 = vmatmul.mubr.msk.f32.gmra.mrb[28].mxu0 %vm1111_vm1, %v9298_v41  ;;  %v10421_v13 = vpop.f32.mrb[21].mxu1  ;;  %v11393_v41 = vld [vmem:[#allocation65_spill] sm:$0xff] }
 0x1d2   : > { %7676 = vmatprep.mubr.f32.mxu0 %v11362_v38 }
 0x1d4   : > { %v10424_v36 = vpop.f32.mrb[22].mxu1 }
 0x1d5   : > { %7677 = vmatmul.mubr.f32.gmra.mrb[30].mxu0 %v11362_v38  ;;  %v10427_v5 = vpop.f32.mrb[23].mxu1 }
 0x1d6   : > { %7681 = vmatprep.mubr.msk.f32.mxu0 %vm1111_vm1, %v11391_v51 }
 0x1d8   : > { %v10431_v1 = vpop.f32.mrb[24].mxu1 }
 0x1d9   : > { %7682 = vmatmul.mubr.msk.f32.vlgmr.msra.gmra.mrb[0].mxu0 %vm1111_vm1, %v11392_v55  ;;  %v10435_v40 = vpop.f32.mrb[25].mxu1 }
 0x1da   : > { %7684 = vmatprep.mubr.msk.f32.mxu0 %vm1111_vm1, %v11393_v41 }
 0x1dc   : > { %v10439_v18 = vpop.f32.mrb[26].mxu1 }
 0x1dd   : > { %7685 = vmatmul.mubr.msk.f32.gmra.mrb[2].mxu0 %vm1111_vm1, %v11394_v30  ;;  %v10443_v46 = vpop.f32.mrb[27].mxu1 }
 0x1de   : > { %7687 = vmatprep.mubr.msk.f32.mxu0 %vm1111_vm1, %v11395_v9  ;;  %v11400_v9 = vld [vmem:[#allocation70_spill] sm:$0xff] }
 0x1e0   : > { %v10447_v51 = vpop.f32.mrb[28].mxu1 }
 0x1e1   : > { %7688 = vmatmul.mubr.msk.f32.gmra.mrb[4].mxu0 %vm1111_vm1, %v11396_v56  ;;  %v10451_v55 = vpop.f32.mrb[29].mxu1  ;;  %v11402_v56 = vld [vmem:[#allocation72_spill] sm:$0xff] }
 0x1e2   : > { %7690 = vmatprep.mubr.msk.f32.mxu0 %vm1111_vm1, %v11397_v58  ;;  %v11403_v58 = vld [vmem:[#allocation75_spill] sm:$0xff] }
 0x1e4   : > { %v10455_v41 = vpop.f32.mrb[30].mxu1 }
 0x1e5   : > { %7691 = vmatmul.mubr.msk.f32.gmra.mrb[6].mxu0 %vm1111_vm1, %v11398_v11  ;;  %v10459_v30 = vpop.f32.mrb[31].mxu1  ;;  %v11405_v11 = vld [vmem:[#allocation81_spill] sm:$0xff] }
 0x1e6   : > { %7693 = vmatprep.mubr.msk.f32.mxu0 %vm1111_vm1, %v11399_v60  ;;  %v11407_v60 = vld [vmem:[#allocation87_spill] sm:$0xff] }
 0x1e9   : > { %7694 = vmatmul.mubr.msk.f32.gmra.mrb[8].mxu0 %vm1111_vm1, %v11400_v9  ;;  %v11408_v9 = vld [vmem:[#allocation86_spill] sm:$0xff] }
 0x1ea   : > { %7696 = vmatprep.mubr.msk.f32.mxu0 %vm1111_vm1, %v11401_v8  ;;  %v11409_v8 = vld [vmem:[#allocation93_spill] sm:$0xff] }
 0x1ed   : > { %7697 = vmatmul.mubr.msk.f32.gmra.mrb[10].mxu0 %vm1111_vm1, %v11402_v56  ;;  %v11410_v56 = vld [vmem:[#allocation92_spill] sm:$0xff] }
 0x1ee   : > { %7699 = vmatprep.mubr.msk.f32.mxu0 %vm1111_vm1, %v11403_v58  ;;  %v11411_v58 = vld [vmem:[#allocation98_spill] sm:$0xff] }
 0x1f1   : > { %7700 = vmatmul.mubr.msk.f32.gmra.mrb[12].mxu0 %vm1111_vm1, %v11404_v27  ;;  %v11412_v27 = vld [vmem:[#allocation97_spill] sm:$0xff] }
 0x1f2   : > { %7702 = vmatprep.mubr.msk.f32.mxu0 %vm1111_vm1, %v11405_v11  ;;  %v11413_v11 = vld [vmem:[#allocation102_spill] sm:$0xff] }
 0x1f5   : > { %7703 = vmatmul.mubr.msk.f32.gmra.mrb[14].mxu0 %vm1111_vm1, %v11406_v57  ;;  %v11414_v57 = vld [vmem:[#allocation101_spill] sm:$0xff] }
 0x1f6   : > { %7705 = vmatprep.mubr.msk.f32.mxu0 %vm1111_vm1, %v11407_v60  ;;  %v11415_v60 = vld [vmem:[#allocation107_spill] sm:$0xff] }
 0x1f9   : > { %7706 = vmatmul.mubr.msk.f32.gmra.mrb[16].mxu0 %vm1111_vm1, %v11408_v9  ;;  %v11416_v9 = vld [vmem:[#allocation106_spill] sm:$0xff] }
 0x1fa   : > { %7708 = vmatprep.mubr.msk.f32.mxu0 %vm1111_vm1, %v11409_v8  ;;  %v11417_v8 = vld [vmem:[#allocation111_spill] sm:$0xff] }
 0x1fd   : > { %7709 = vmatmul.mubr.msk.f32.gmra.mrb[18].mxu0 %vm1111_vm1, %v11410_v56  ;;  %v11418_v56 = vld [vmem:[#allocation110_spill] sm:$0xff] }
 0x1fe   : > { %7711 = vmatprep.mubr.msk.f32.mxu0 %vm1111_vm1, %v11411_v58  ;;  %v11419_v58 = vld [vmem:[#allocation112_spill] sm:$0xff] }
 0x201   : > { %7712 = vmatmul.mubr.msk.f32.gmra.mrb[20].mxu0 %vm1111_vm1, %v11412_v27  ;;  %v11420_v27 = vld [vmem:[#allocation113_spill] sm:$0xff] }
 0x202   : > { %7714 = vmatprep.mubr.msk.f32.mxu0 %vm1111_vm1, %v11413_v11  ;;  %v4662_v11 = vld [vmem:[%s10976_s4 + $0x8] sm:$0xff] }
 0x203   : > { %4748 = vmatprep.mubr.f32.mxu1 %v4662_v11 }
 0x205   : > { %7715 = vmatmul.mubr.msk.f32.gmra.mrb[22].mxu0 %vm1111_vm1, %v11414_v57 }
 0x206   : > { %7717 = vmatprep.mubr.msk.f32.mxu0 %vm1111_vm1, %v11415_v60 }
 0x209   : > { %7718 = vmatmul.mubr.msk.f32.gmra.mrb[24].mxu0 %vm1111_vm1, %v11416_v9 }
 0x20a   : > { %7720 = vmatprep.mubr.msk.f32.mxu0 %vm1111_vm1, %v11417_v8 }
 0x20d   : > { %7721 = vmatmul.mubr.msk.f32.gmra.mrb[26].mxu0 %vm1111_vm1, %v11418_v56 }
 0x20e   : > { %7723 = vmatprep.mubr.msk.f32.mxu0 %vm1111_vm1, %v11419_v58 }
 0x211   : > { %7724 = vmatmul.mubr.msk.f32.gmra.mrb[28].mxu0 %vm1111_vm1, %v11420_v27 }
 0x212   : > { %7726 = vmatprep.mubr.f32.mxu0 %v11362_v38 }
 0x215   : > { %7727 = vmatmul.mubr.f32.gmra.mrb[30].mxu0 %v11362_v38 }
 0x2ac   : > { %v7683_v57 = vpop.f32.mrb[0].mxu0 }
 0x2ad   : > { %v7887_v60 = vadd.f32 %v7683_v57, %v10337_v54  ;;  %v4278_v9 = vpop.f32.mrb[1].mxu0 }
 0x2ae   : > { %v7888_v8 = vadd.f32 %v4278_v9, %v10341_v47 }
 0x2af   : > { %v4502_v56 = vrot.slane %v7887_v60, 1 }
 0x2b0   : > { %v4501_v58 = vrot.slane %v7888_v8, 1  ;;  %v7686_v15 = vpop.f32.mrb[2].mxu0 }
 0x2b1   : > { %v7889_v27 = vadd.f32 %v7686_v15, %v10345_v22  ;;  %v4288_v52 = vpop.f32.mrb[3].mxu0 }
 0x2b2   : > { %v4503_v17 = vsel %vm11123_vm2, %v4501_v58, %v4502_v56  ;;  %v7890_v63 = vadd.f32 %v4288_v52, %v10349_v0 }
 0x2b3   : > { %v4597_v39 = vmax.f32 %v7888_v8, %v4503_v17  ;;  %v4506_v62 = vrot.slane %v7889_v27, 1 }
 0x2b4   : > { %v4504_v29 = vrot.slane %v7890_v63, 1  ;;  %v7689_v11 = vpop.f32.mrb[4].mxu0 }
 0x2b5   : > { %v7891_v4 = vadd.f32 %v7689_v11, %v10353_v61  ;;  %v4298_v54 = vpop.f32.mrb[5].mxu0 }
 0x2b6   : > { %v4505_v57 = vsel %vm11123_vm2, %v4502_v56, %v4504_v29  ;;  %v4507_v47 = vsel %vm11123_vm2, %v4504_v29, %v4506_v62  ;;  %v7892_v9 = vadd.f32 %v4298_v54, %v10357_v49 }
 0x2b7   : > { %v4598_v45 = vmax.f32 %v7887_v60, %v4505_v57  ;;  %v4599_v15 = vmax.f32 %v7890_v63, %v4507_v47  ;;  %v4510_v22 = vrot.slane %v7891_v4, 1 }
 0x2b8   : > { %v4508_v19 = vrot.slane %v7892_v9, 1  ;;  %v7692_v58 = vpop.f32.mrb[6].mxu0 }
 0x2b9   : > { %v10519_v37 = vmax.f32 %v4597_v39, %v4599_v15  ;;  %v7893_v17 = vadd.f32 %v7692_v58, %v10361_v24  ;;  %v4308_v52 = vpop.f32.mrb[7].mxu0 }
 0x2ba   : > { %v4509_v0 = vsel %vm11123_vm2, %v4506_v62, %v4508_v19  ;;  %v4511_v61 = vsel %vm11123_vm2, %v4508_v19, %v4510_v22  ;;  %v7894_v8 = vadd.f32 %v4308_v52, %v10365_v26 }
 0x2bb   : > { %v4600_v56 = vmax.f32 %v7889_v27, %v4509_v0  ;;  %v4601_v29 = vmax.f32 %v7892_v9, %v4511_v61  ;;  %v4514_v11 = vrot.slane %v7893_v17, 1 }
 0x2bc   : > { %v4512_v49 = vrot.slane %v7894_v8, 1  ;;  %v7695_v60 = vpop.f32.mrb[8].mxu0 }
 0x2bd   : > { %v4631_v63 = vmax.f32 %v4599_v15, %v4601_v29  ;;  %v7895_v54 = vadd.f32 %v7695_v60, %v10369_v35  ;;  %v4318_v57 = vpop.f32.mrb[9].mxu0  ;;  %v10526_v39 = vmax.f32 %v4598_v45, %v4600_v56 }
 0x2be   : > { %v4513_v24 = vsel %vm11123_vm2, %v4510_v22, %v4512_v49  ;;  %v4515_v47 = vsel %vm11123_vm2, %v4512_v49, %v4514_v11  ;;  %v7896_v62 = vadd.f32 %v4318_v57, %v10373_v32 }
 0x2bf   : > { %v4602_v19 = vmax.f32 %v7891_v4, %v4513_v24  ;;  %v4603_v58 = vmax.f32 %v7894_v8, %v4515_v47  ;;  %v4518_v26 = vrot.slane %v7895_v54, 1 }
 0x2c0   : > { %v4516_v9 = vrot.slane %v7896_v62, 1  ;;  %v7698_v52 = vpop.f32.mrb[10].mxu0 }
 0x2c1   : > { %v4633_v15 = vmax.f32 %v4601_v29, %v4603_v58  ;;  %v7897_v35 = vadd.f32 %v7698_v52, %v10377_v53  ;;  %v4328_v0 = vpop.f32.mrb[11].mxu0  ;;  %v4632_v45 = vmax.f32 %v4600_v56, %v4602_v19 }
 0x2c2   : > { %v4517_v61 = vsel %vm11123_vm2, %v4514_v11, %v4516_v9  ;;  %v4519_v22 = vsel %vm11123_vm2, %v4516_v9, %v4518_v26  ;;  %v7898_v49 = vadd.f32 %v4328_v0, %v10381_v48 }
 0x2c3   : > { %v4604_v32 = vmax.f32 %v7893_v17, %v4517_v61  ;;  %v4605_v4 = vmax.f32 %v7896_v62, %v4519_v22  ;;  %v4522_v8 = vrot.slane %v7897_v35, 1  ;;  %v10537_v60 = vpack.c.bf16 %v4632_v45, %v4631_v63 }
 0x2c4   : > { %v4520_v57 = vrot.slane %v7898_v49, 1  ;;  %v7701_v24 = vpop.f32.mrb[12].mxu0 }
 0x2c5   : > { %v4635_v47 = vmax.f32 %v4603_v58, %v4605_v4  ;;  %v7899_v29 = vadd.f32 %v7701_v24, %v10385_v14  ;;  %v4338_v27 = vpop.f32.mrb[13].mxu0  ;;  %v4634_v53 = vmax.f32 %v4602_v19, %v4604_v32 }
 0x2c6   : > { %v4521_v56 = vsel %vm11123_vm2, %v4518_v26, %v4520_v57  ;;  %v4523_v11 = vsel %vm11123_vm2, %v4520_v57, %v4522_v8  ;;  %v7900_v9 = vadd.f32 %v4338_v27, %v10389_v34 }
 0x2c7   : > { %v4606_v52 = vmax.f32 %v7895_v54, %v4521_v56  ;;  %v4607_v48 = vmax.f32 %v7898_v49, %v4523_v11  ;;  %v4526_v17 = vrot.slane %v7899_v29, 1  ;;  %v10543_v62 = vpack.c.bf16 %v4634_v53, %v4633_v15 }
 0x2c8   : > { %v4524_v63 = vrot.slane %v7900_v9, 1  ;;  %v7704_v0 = vpop.f32.mrb[14].mxu0 }
 0x2c9   : > { %v4637_v45 = vmax.f32 %v4605_v4, %v4607_v48  ;;  %v7901_v58 = vadd.f32 %v7704_v0, %v10393_v42  ;;  %v4348_v61 = vpop.f32.mrb[15].mxu0  ;;  %v4636_v14 = vmax.f32 %v4604_v32, %v4606_v52 }
 0x2ca   : > { %v4525_v19 = vsel %vm11123_vm2, %v4522_v8, %v4524_v63  ;;  %v4527_v26 = vsel %vm11123_vm2, %v4524_v63, %v4526_v17  ;;  %v7902_v22 = vadd.f32 %v4348_v61, %v10397_v7 }
 0x2cb   : > { %v4608_v57 = vmax.f32 %v7897_v35, %v4525_v19  ;;  %v4609_v34 = vmax.f32 %v7900_v9, %v4527_v26  ;;  %v4530_v54 = vrot.slane %v7901_v58, 1  ;;  %v10549_v27 = vpack.c.bf16 %v4636_v14, %v4635_v47 }
 0x2cc   : > { %v4528_v15 = vrot.slane %v7902_v22, 1  ;;  %v7707_v49 = vpop.f32.mrb[16].mxu0 }
 0x2cd   : > { %v4639_v24 = vmax.f32 %v4607_v48, %v4609_v34  ;;  %v7903_v4 = vadd.f32 %v7707_v49, %v10401_v31  ;;  %v4358_v53 = vpop.f32.mrb[17].mxu0  ;;  %v4638_v42 = vmax.f32 %v4606_v52, %v4608_v57 }
 0x2ce   : > { %v4529_v32 = vsel %vm11123_vm2, %v4526_v17, %v4528_v15  ;;  %v4531_v8 = vsel %vm11123_vm2, %v4528_v15, %v4530_v54  ;;  %v7904_v56 = vadd.f32 %v4358_v53, %v10405_v28 }
 0x2cf   : > { %v4610_v11 = vmax.f32 %v7899_v29, %v4529_v32  ;;  %v4611_v7 = vmax.f32 %v7902_v22, %v4531_v8  ;;  %v4534_v35 = vrot.slane %v7903_v4, 1  ;;  %v10555_v9 = vpack.c.bf16 %v4638_v42, %v4637_v45 }
 0x2d0   : > { %v4532_v47 = vrot.slane %v7904_v56, 1  ;;  %v7710_v63 = vpop.f32.mrb[18].mxu0 }
 0x2d1   : > { %v4641_v0 = vmax.f32 %v4609_v34, %v4611_v7  ;;  %v7905_v48 = vadd.f32 %v7710_v63, %v10409_v20  ;;  %v4368_v61 = vpop.f32.mrb[19].mxu0  ;;  %v4640_v31 = vmax.f32 %v4608_v57, %v4610_v11 }
 0x2d2   : > { %v4533_v52 = vsel %vm11123_vm2, %v4530_v54, %v4532_v47  ;;  %v4535_v17 = vsel %vm11123_vm2, %v4532_v47, %v4534_v35  ;;  %v7906_v14 = vadd.f32 %v4368_v61, %v10413_v12 }
 0x2d3   : > { %v4612_v19 = vmax.f32 %v7901_v58, %v4533_v52  ;;  %v4613_v28 = vmax.f32 %v7904_v56, %v4535_v17  ;;  %v4538_v29 = vrot.slane %v7905_v48, 1  ;;  %v10561_v26 = vpack.c.bf16 %v4640_v31, %v4639_v24 }
 0x2d4   : > { %v4536_v45 = vrot.slane %v7906_v14, 1  ;;  %v7713_v22 = vpop.f32.mrb[20].mxu0 }
 0x2d5   : > { %v4643_v15 = vmax.f32 %v4611_v7, %v4613_v28  ;;  %v7907_v34 = vadd.f32 %v7713_v22, %v10417_v21  ;;  %v4378_v49 = vpop.f32.mrb[21].mxu0  ;;  %v4642_v20 = vmax.f32 %v4610_v11, %v4612_v19 }
 0x2d6   : > { %v4537_v57 = vsel %vm11123_vm2, %v4534_v35, %v4536_v45  ;;  %v4539_v54 = vsel %vm11123_vm2, %v4536_v45, %v4538_v29  ;;  %v7908_v53 = vadd.f32 %v4378_v49, %v10421_v13 }
 0x2d7   : > { %v4615_v42 = vmax.f32 %v7906_v14, %v4539_v54  ;;  %v4542_v12 = vrot.slane %v7907_v34, 1  ;;  %v4614_v58 = vmax.f32 %v7903_v4, %v4537_v57  ;;  %v10567_v32 = vpack.c.bf16 %v4642_v20, %v4641_v0 }
 0x2d8   : > { %v4540_v24 = vrot.slane %v7908_v53, 1  ;;  %v7716_v8 = vpop.f32.mrb[22].mxu0 }
 0x2d9   : > { %v4645_v56 = vmax.f32 %v4613_v28, %v4615_v42  ;;  %v7909_v7 = vadd.f32 %v7716_v8, %v10424_v36  ;;  %v4388_v47 = vpop.f32.mrb[23].mxu0  ;;  %v4644_v21 = vmax.f32 %v4612_v19, %v4614_v58 }
 0x2da   : > { %v4541_v11 = vsel %vm11123_vm2, %v4538_v29, %v4540_v24  ;;  %v4543_v35 = vsel %vm11123_vm2, %v4540_v24, %v4542_v12  ;;  %v7910_v63 = vadd.f32 %v4388_v47, %v10427_v5 }
 0x2db   : > { %v4617_v61 = vmax.f32 %v7908_v53, %v4543_v35  ;;  %v4546_v13 = vrot.slane %v7909_v7, 1  ;;  %v4616_v31 = vmax.f32 %v7905_v48, %v4541_v11  ;;  %v10573_v52 = vpack.c.bf16 %v4644_v21, %v4643_v15 }
 0x2dc   : > { %v4544_v4 = vrot.slane %v7910_v63, 1  ;;  %v7719_v0 = vpop.f32.mrb[24].mxu0 }
 0x2dd   : > { %v4647_v17 = vmax.f32 %v4615_v42, %v4617_v61  ;;  %v7911_v14 = vadd.f32 %v7719_v0, %v10431_v1  ;;  %v4398_v28 = vpop.f32.mrb[25].mxu0  ;;  %v4646_v36 = vmax.f32 %v4614_v58, %v4616_v31 }
 0x2de   : > { %v4545_v19 = vsel %vm11123_vm2, %v4542_v12, %v4544_v4  ;;  %v4547_v29 = vsel %vm11123_vm2, %v4544_v4, %v4546_v13  ;;  %v7912_v45 = vadd.f32 %v4398_v28, %v10435_v40  ;;  %v11421_v40 = vpack.c.bf16 %v10526_v39, %v10519_v37 }
 0x2df   : > { %v4619_v22 = vmax.f32 %v7910_v63, %v4547_v29  ;;  %v4550_v5 = vrot.slane %v7911_v14, 1  ;;  %v7855_v49 = vpack.c.bf16 %v4646_v36, %v4645_v56  ;;  %v4618_v20 = vmax.f32 %v7907_v34, %v4545_v19 }
 0x2e0   : > { %v4548_v48 = vrot.slane %v7912_v45, 1  ;;  %v7722_v15 = vpop.f32.mrb[26].mxu0 }
 0x2e1   : > { %v4649_v57 = vmax.f32 %v4617_v61, %v4619_v22  ;;  %v7913_v54 = vadd.f32 %v7722_v15, %v10439_v18  ;;  %v4408_v53 = vpop.f32.mrb[27].mxu0  ;;  %7856 = vmatprep.subr.bf16.mxu1 %v7855_v49  ;;  %v4648_v1 = vmax.f32 %v4616_v31, %v4618_v20 }
 0x2e2   : > { %v4549_v42 = vsel %vm11123_vm2, %v4546_v13, %v4548_v48  ;;  %v4551_v12 = vsel %vm11123_vm2, %v4548_v48, %v4550_v5  ;;  %v7914_v58 = vadd.f32 %v4408_v53, %v10443_v46  ;;  %7858 = vmatpush3.bf16.msra.mxu1 %v11421_v40 }
 0x2e3   : > { %v4621_v24 = vmax.f32 %v7912_v45, %v4551_v12  ;;  %v4554_v34 = vrot.slane %v7913_v54, 1  ;;  %v7859_v8 = vpack.c.bf16 %v4648_v1, %v4647_v17  ;;  %v4620_v56 = vmax.f32 %v7909_v7, %v4549_v42 }
 0x2e4   : > { %v4552_v47 = vrot.slane %v7914_v58, 1  ;;  %v7725_v21 = vpop.f32.mrb[28].mxu0 }
 0x2e5   : > { %v4651_v18 = vmax.f32 %v4619_v22, %v4621_v24  ;;  %v7915_v11 = vadd.f32 %v7725_v21, %v10447_v51  ;;  %v4418_v35 = vpop.f32.mrb[29].mxu0  ;;  %7860 = vmatprep.subr.bf16.mxu1 %v7859_v8  ;;  %v4650_v63 = vmax.f32 %v4618_v20, %v4620_v56  ;;  %v4667_v21 = vld [vmem:[%s10976_s4 + $0x30] sm:$0xff] }
 0x2e6   : > { %v4553_v61 = vsel %vm11123_vm2, %v4550_v5, %v4552_v47  ;;  %v4555_v46 = vsel %vm11123_vm2, %v4552_v47, %v4554_v34  ;;  %v7916_v13 = vadd.f32 %v4418_v35, %v10451_v55  ;;  %7862 = vmatpush3.bf16.msra.mxu1 %v10537_v60  ;;  %v4668_v47 = vld [vmem:[%s10976_s4 + $0x38] sm:$0xff] }
 0x2e7   : > { %v4623_v37 = vmax.f32 %v7914_v58, %v4555_v46  ;;  %v4558_v39 = vrot.slane %v7915_v11, 1  ;;  %v7863_v31 = vpack.c.bf16 %v4650_v63, %v4649_v57  ;;  %v4622_v7 = vmax.f32 %v7911_v14, %v4553_v61  ;;  %v4672_v35 = vld [vmem:[%s10976_s4 + $0x58] sm:$0xff]  ;;  %v4671_v63 = vld [vmem:[%s10976_s4 + $0x50] sm:$0xff]  ;;  %v4674_v61 = vld [vmem:[%s10976_s4 + $0x68] sm:$0xff] }
 0x2e8   : > { %v4556_v4 = vrot.slane %v7916_v13, 1  ;;  %v7728_v0 = vpop.f32.mrb[30].mxu0  ;;  %v10647_v46 = vld [vmem:[%s9734_s18] sm:$0xff] }
 0x2e9   : > { %v4653_v17 = vmax.f32 %v4621_v24, %v4623_v37  ;;  %v7917_v51 = vadd.f32 %v7728_v0, %v10455_v41  ;;  %v4428_v28 = vpop.f32.mrb[31].mxu0  ;;  %7864 = vmatprep.subr.bf16.mxu1 %v7863_v31  ;;  %v4652_v36 = vmax.f32 %v4620_v56, %v4622_v7  ;;  %v4664_v56 = vld [vmem:[%s10976_s4 + $0x18] sm:$0xff] }
 0x2ea   : > { %v4557_v19 = vsel %vm11123_vm2, %v4554_v34, %v4556_v4  ;;  %v4559_v29 = vsel %vm11123_vm2, %v4556_v4, %v4558_v39  ;;  %v7918_v55 = vadd.f32 %v4428_v28, %v10459_v30  ;;  %7866 = vmatpush3.bf16.msra.mxu1 %v10543_v62  ;;  %v4676_v31 = vld [vmem:[%s10976_s4 + $0x78] sm:$0xff]  ;;  %v8220_v4 = vld [vmem:[%s10982_s10] ss:$0 sm:$0xff] }
 0x2eb   : > { %v4625_v60 = vmax.f32 %v7916_v13, %v4559_v29  ;;  %v4562_v45 = vrot.slane %v7917_v51, 1  ;;  %v7867_v22 = vpack.c.bf16 %v4652_v36, %v4651_v18  ;;  %v4624_v14 = vmax.f32 %v7913_v54, %v4557_v19  ;;  %v4670_v18 = vld [vmem:[%s10976_s4 + $0x48] sm:$0xff]  ;;  %v4673_v13 = vld [vmem:[%s10976_s4 + $0x60] sm:$0xff] }
 0x2ec   : > { %v4560_v5 = vrot.slane %v7918_v55, 1  ;;  %v11422_v19 = vrot.slane %v9915_v16, 7 }
 0x2ed   : > { %v4655_v49 = vmax.f32 %v4623_v37, %v4625_v60  ;;  %v4596_v20 = vsel %vm11123_vm2, %v4562_v45, 0.0  ;;  %7868 = vmatprep.subr.bf16.mxu1 %v7867_v22  ;;  %v4654_v41 = vmax.f32 %v4622_v7, %v4624_v14  ;;  %v8219_v37 = vld [vmem:[%s10981_s9] ss:$0 sm:$0xff]  ;;  %v4675_v7 = vld [vmem:[%s10976_s4 + $0x70] sm:$0xff]  ;;  %v4910_v22 = vsel %vm4903_vm15, %v9971_v10, 0.0 }
 0x2ee   : > { %v4628_v48 = vmax.f32 %v7917_v51, %v4596_v20  ;;  %v4561_v15 = vsel %vm11123_vm2, %v4558_v39, %v4560_v5  ;;  %v4563_v57 = vsel %vm11123_vm2, %v4560_v5, %v4562_v45  ;;  %7870 = vmatpush3.bf16.msra.mxu1 %v10549_v27  ;;  %v4827_v27 = vld [vmem:[%s10983_s11] sm:$0xff]  ;;  %v4796_v39 = vmul.f32 %v8219_v37, %v10647_v46  ;;  %v4828_v51 = vld [vmem:[%s10983_s11 + $0x8] sm:$0xff] }
 0x2ef   : > { %v4627_v30 = vmax.f32 %v7918_v55, %v4563_v57  ;;  %v7871_v53 = vpack.c.bf16 %v4654_v41, %v4653_v17  ;;  %v4626_v62 = vmax.f32 %v7915_v11, %v4561_v15  ;;  %v4916_v8 = vrot.slane %v4827_v27, 4  ;;  %v4669_v11 = vld [vmem:[%s10976_s4 + $0x40] sm:$0xff]  ;;  %v11427_v15 = vld [vmem:[#allocation117_spill] sm:$0xff] }
 0x2f0   : > { %v4660_v1 = vmax.f32 %v4628_v48, 0.0  ;;  %v4811_v0 = vadd.f32 %v8220_v4, %v4796_v39  ;;  %v5398_v55 = vrot.slane %v4828_v51, 4  ;;  %v11425_v20 = vld [vmem:[#allocation118_spill] sm:$0xff]  ;;  %v4913_v57 = vsel %vm4906_vm0, %v11427_v15, 0.0  ;;  %v11444_v37 = vld [vmem:[#allocation135_spill] sm:$0xff] }
 0x2f1   : > { %v4657_v42 = vmax.f32 %v4625_v60, %v4627_v30  ;;  %v4659_v12 = vmax.f32 %v4627_v30, 0.0  ;;  %7872 = vmatprep.subr.bf16.mxu1 %v7871_v53  ;;  %v4656_v54 = vmax.f32 %v4624_v14, %v4626_v62  ;;  %v4658_v58 = vmax.f32 %v4626_v62, %v4628_v48  ;;  %v11424_v14 = vld [vmem:[#allocation114_spill] sm:$0xff]  ;;  %v11429_v62 = vld [vmem:[#allocation121_spill] sm:$0xff] }
 0x2f2   : > { %7874 = vmatpush3.bf16.msra.mxu1 %v10555_v9  ;;  %v4661_v9 = vld [vmem:[%s10976_s4] sm:$0xff]  ;;  %v10666_v17 = vmax.f32 %v4811_v0, 0.0  ;;  %v4911_v5 = vsel %vm4904_vm6, %v11424_v14, 0.0  ;;  %v4912_v48 = vsel %vm4905_vm5, %v11425_v20, 0.0  ;;  %v5394_v44 = vsel %vm4904_vm6, %v11425_v20, 0.0 }
 0x2f3   : > { %v7875_v40 = vpack.c.bf16 %v4656_v54, %v4655_v49  ;;  %v7879_v24 = vpack.c.bf16 %v4658_v58, %v4657_v42  ;;  %v7883_v34 = vpack.c.bf16 %v4660_v1, %v4659_v12  ;;  %v11428_v30 = vld [vmem:[#allocation126_spill] sm:$0xff]  ;;  %v11431_v54 = vrot.slane %v9915_v16, 1  ;;  %v11454_v42 = vld [vmem:[#allocation116_spill] sm:$0xff] }
 0x2f4   : > { %v4839_v28 = vrot.slane %v10666_v17, 7  ;;  %v5167_v49 = vrot.slane %v10666_v17, 1  ;;  %vm4907_vm11 = vcmp.eq.s32.totalorder %v11428_v30, 1 }
 0x2f5   : > { %7876 = vmatprep.subr.bf16.mxu1 %v7875_v40  ;;  %v4914_v1 = vsel %vm4907_vm11, %v11429_v62, 0.0 }
 0x2f6   : > { %7878 = vmatpush3.bf16.msra.mxu1 %v10561_v26  ;;  %v4663_v26 = vld [vmem:[%s10976_s4 + $0x10] sm:$0xff]  ;;  %v4859_v36 = vsel %vm796_vm10, 0.0, %v4839_v28  ;;  %v10692_v29 = vsel %vm796_vm10, %v4839_v28, %v11422_v19  ;;  %v5190_v53 = vsel %vm11123_vm2, 0.0, %v5167_v49  ;;  %v5169_v58 = vsel %vm11123_vm2, %v5167_v49, %v11431_v54 }
 0x2f7   : > { %7880 = vmatprep.subr.bf16.mxu1 %v7879_v24  ;;  %v4908_v60 = vsel %vm4901_vm4, %v4859_v36, 0.0  ;;  %v4909_v45 = vsel %vm11423_vm3, %v10692_v29, 0.0  ;;  %v5239_v12 = vsel %vm5231_vm7, %v5190_v53, 0.0  ;;  %v5240_v24 = vsel %vm5232_vm9, %v5169_v58, 0.0  ;;  %v11456_v54 = vld [vmem:[#allocation120_spill] sm:$0xff] }
 0x2f8   : > { %v5395_v19 = vsel %vm4905_vm5, %v11427_v15, 0.0  ;;  %vm11453_vm5 = vcmask 1046528  }
 0x2fa   : > { %7882 = vmatpush3.bf16.msra.mxu1 %v10567_v32  ;;  %v4666_v32 = vld [vmem:[%s10976_s4 + $0x28] sm:$0xff] }
 0x2fb   : > { %7884 = vmatprep.subr.bf16.mxu1 %v7883_v34  ;;  %v4829_v34 = vld [vmem:[%s10983_s11 + $0x10] sm:$0xff] }
 0x2fc   : > { %v5666_v0 = vrot.slane %v4829_v34, 4 }
 0x2fe   : > { %7886 = vmatpush3.bf16.msra.mxu1 %v10573_v52  ;;  %v4665_v52 = vld [vmem:[%s10976_s4 + $0x20] sm:$0xff] }
 0x2ff   : > { %7729 = vmatprep.subr.msk.mxu1 %vm1175_vm12, %v4916_v8 }
 0x301   : > { %4749 = vmatmul.mubr.f32.vlgmr.msra.gmra.mrb[32].mxu1 %v4661_v9 }
 0x302   : > { %4753 = vmatprep.mubr.f32.mxu1 %v4664_v56  ;;  %7730 = vmatpush3.msk.msra.mxu1 %vm1175_vm12, %v4916_v8  ;;  %v10742_v56 = vpop.permute.xlu1 %5226 }
 0x303   : > { %7743 = vmatprep.subr.msk.mxu1 %vm1175_vm12, %v4827_v27  ;;  %vm5237_vm3 = vcmp.eq.s32.totalorder %v10742_v56, 1 }
 0x304   : > { %v5245_v39 = vsel %vm5237_vm3, %v11444_v37, 0.0 }
 0x305   : > { %4754 = vmatmul.mubr.f32.gmra.mrb[34].mxu1 %v4663_v26  ;;  %v11435_v26 = vld [vmem:[#allocation130_spill] sm:$0xff] }
 0x306   : > { %4758 = vmatprep.mubr.f32.mxu1 %v4666_v32  ;;  %v11436_v32 = vld [vmem:[#allocation138_spill] sm:$0xff] }
 0x307   : > { %vm11437_vm14 = vcmp.eq.s32.totalorder %v11436_v32, 1 }
 0x309   : > { %4759 = vmatmul.mubr.f32.gmra.mrb[36].mxu1 %v4665_v52  ;;  %v5242_v52 = vsel %vm11437_vm14, %v11435_v26, 0.0 }
 0x30a   : > { %4763 = vmatprep.mubr.f32.mxu1 %v4668_v47  ;;  %v11438_v47 = vld [vmem:[#allocation128_spill] sm:$0xff] }
 0x30d   : > { %4764 = vmatmul.mubr.f32.gmra.mrb[38].mxu1 %v4667_v21  ;;  %v11439_v21 = vld [vmem:[#allocation136_spill] sm:$0xff] }
 0x30e   : > { %4768 = vmatprep.mubr.f32.mxu1 %v4670_v18  ;;  %vm11440_vm13 = vcmp.eq.s32.totalorder %v11439_v21, 1 }
 0x30f   : > { %v5243_v18 = vsel %vm11440_vm13, %v11438_v47, 0.0 }
 0x311   : > { %4769 = vmatmul.mubr.f32.gmra.mrb[40].mxu1 %v4669_v11  ;;  %v5230_v11 = vpop.permute.xlu0 %5229 }
 0x312   : > { %4773 = vmatprep.mubr.f32.mxu1 %v4672_v35  ;;  %v4878_v35 = vpop.permute.xlu1 %4877  ;;  %vm5238_vm14 = vcmp.eq.s32.totalorder %v5230_v11, 1 }
 0x313   : > { %vm4900_vm13 = vcmp.eq.s32.totalorder %v4878_v35, 1 }
 0x314   : > { %v5390_v4 = vsel %vm4900_vm13, %v4859_v36, 0.0  ;;  %v5393_v36 = vsel %vm4903_vm15, %v11424_v14, 0.0  ;;  %vm11450_vm15 = vcmp.eq.s32.totalorder %v11439_v21, 1 }
 0x315   : > { %4774 = vmatmul.mubr.f32.gmra.mrb[42].mxu1 %v4671_v63  ;;  %v11441_v63 = vld [vmem:[#allocation137_spill] sm:$0xff] }
 0x316   : > { %4778 = vmatprep.mubr.f32.mxu1 %v4674_v61  ;;  %v11442_v61 = vld [vmem:[#allocation142_spill] sm:$0xff]  ;;  %v5662_v20 = vsel %vm11450_vm15, %v11441_v63, 0.0 }
 0x317   : > { %vm11443_vm2 = vcmp.eq.s32.totalorder %v11442_v61, 1  ;;  %vm11451_vm6 = vcmp.eq.s32.totalorder %v11442_v61, 1 }
 0x318   : > { %v5663_v41 = vsel %vm11451_vm6, %v11444_v37, 0.0 }
 0x319   : > { %4779 = vmatmul.mubr.f32.gmra.mrb[44].mxu1 %v4673_v13  ;;  %v5244_v13 = vsel %vm11443_vm2, %v11441_v63, 0.0  ;;  %vm11446_vm2 = vcmp.eq.s32.totalorder %v9966_v3, 1 }
 0x31a   : > { %4783 = vmatprep.mubr.f32.mxu1 %v4676_v31  ;;  %v11445_v31 = vld [vmem:[#allocation141_spill] sm:$0xff]  ;;  %v5392_v28 = vsel %vm11446_vm2, %v9971_v10, 0.0  ;;  %v11447_v10 = vld [vmem:[#allocation132_spill] sm:$0xff] }
 0x31b   : > { %v5387_v3 = vrot.slane %v11447_v10, 7  ;;  %v11452_v15 = vrot.slane %v11447_v10, 1 }
 0x31d   : > { %4784 = vmatmul.mubr.f32.gmra.mrb[46].mxu1 %v4675_v7  ;;  %v5246_v7 = vsel %vm5238_vm14, %v11445_v31, 0.0  ;;  %v5388_v23 = vsel %vm796_vm10, %v11448_v6, %v5387_v3  ;;  %v5807_v40 = vsel %vm796_vm10, %v5387_v3, 0.0  ;;  %v6836_v6 = vld [vmem:[%s10985_s13] ss:$0 sm:$0xff] }
 0x31e   : > { %7731 = vmatprep.mubr.f32.mxu1 %v11362_v38 }
 0x321   : > { %7732 = vmatmul.mubr.msk.f32.vlgmr.msra.gmra.mrb[48].mxu1 %vm1111_vm1, %v10666_v17 }
 0x322   : > { %7734 = vmatprep.mubr.msk.f32.mxu1 %vm1111_vm1, %v9915_v16  ;;  %7744 = vmatpush3.msk.msra.mxu1 %vm1175_vm12, %v4827_v27  ;;  %v11433_v27 = vld [vmem:[#allocation123_spill] sm:$0xff] }
 0x323   : > { %7757 = vmatprep.subr.msk.mxu1 %vm1175_vm12, %v4828_v51  ;;  %v5241_v9 = vsel %vm5233_vm8, %v11433_v27, 0.0  ;;  %v5659_v14 = vsel %vm5232_vm9, %v11433_v27, 0.0 }
 0x325   : > { %7735 = vmatmul.mubr.msk.f32.gmra.mrb[50].mxu1 %vm1111_vm1, %v9878_v25 }
 0x326   : > { %7737 = vmatprep.mubr.msk.f32.mxu1 %vm1111_vm1, %v9892_v59 }
 0x329   : > { %7738 = vmatmul.mubr.msk.f32.gmra.mrb[52].mxu1 %vm1111_vm1, %v9931_v2 }
 0x32a   : > { %7740 = vmatprep.mubr.msk.f32.mxu1 %vm1111_vm1, %v9933_v50 }
 0x32d   : > { %7741 = vmatmul.mubr.msk.f32.gmra.mrb[54].mxu1 %vm1111_vm1, %v9978_v43 }
 0x32e   : > { %7745 = vmatprep.mubr.f32.mxu1 %v11362_v38 }
 0x331   : > { %7746 = vmatmul.mubr.msk.f32.vlgmr.msra.gmra.mrb[48].mxu1 %vm1111_vm1, %v4908_v60  ;;  %v5397_v60 = vsel %vm4907_vm11, %v5388_v23, 0.0 }
 0x332   : > { %7748 = vmatprep.mubr.msk.f32.mxu1 %vm1111_vm1, %v4909_v45  ;;  %7758 = vmatpush3.msk.msra.mxu1 %vm1175_vm12, %v4828_v51  ;;  %v5391_v51 = vsel %vm4901_vm4, %v10692_v29, 0.0  ;;  %v4830_v45 = vld [vmem:[%s10983_s11 + $0x18] sm:$0xff]  ;;  %vm11449_vm4 = vcmp.eq.s32.totalorder %v11436_v32, 1 }
 0x333   : > { %7771 = vmatprep.subr.msk.mxu1 %vm1175_vm12, %v5398_v55  ;;  %v5661_v49 = vsel %vm11449_vm4, %v11438_v47, 0.0 }
 0x335   : > { %7749 = vmatmul.mubr.msk.f32.gmra.mrb[50].mxu1 %vm1111_vm1, %v4910_v22  ;;  %v5956_v22 = vrot.slane %v4830_v45, 4 }
 0x336   : > { %7751 = vmatprep.mubr.msk.f32.mxu1 %vm1111_vm1, %v4911_v5  ;;  %v5660_v5 = vsel %vm5233_vm8, %v11435_v26, 0.0 }
 0x339   : > { %7752 = vmatmul.mubr.msk.f32.gmra.mrb[52].mxu1 %vm1111_vm1, %v4912_v48  ;;  %v5664_v48 = vsel %vm5237_vm3, %v11445_v31, 0.0 }
 0x33a   : > { %7754 = vmatprep.mubr.msk.f32.mxu1 %vm1111_vm1, %v4913_v57  ;;  %v5657_v57 = vsel %vm11453_vm5, %v11452_v15, 0.0 }
 0x33b   : > { %v5665_v53 = vsel %vm5238_vm14, %v5657_v57, 0.0  ;;  %v6078_v33 = vsel %vm5237_vm3, %v5657_v57, 0.0 }
 0x33d   : > { %7755 = vmatmul.mubr.msk.f32.gmra.mrb[54].mxu1 %vm1111_vm1, %v4914_v1  ;;  %v4831_v1 = vld [vmem:[%s10983_s11 + $0x20] sm:$0xf] }
 0x33e   : > { %7759 = vmatprep.mubr.msk.f32.mxu1 %vm1111_vm1, %v5239_v12  ;;  %v11455_v12 = vld [vmem:[#allocation115_spill] sm:$0xff] }
 0x341   : > { %7760 = vmatmul.mubr.msk.f32.vlgmr.msra.gmra.mrb[48].mxu1 %vm1111_vm1, %v5240_v24  ;;  %v11458_v24 = vld [vmem:[#allocation124_spill] sm:$0xff] }
 0x342   : > { %7762 = vmatprep.mubr.msk.f32.mxu1 %vm1111_vm1, %v5241_v9  ;;  %7772 = vmatpush3.msk.msra.mxu1 %vm1175_vm12, %v5398_v55  ;;  %v5396_v55 = vsel %vm4906_vm0, %v11429_v62, 0.0  ;;  %v5808_v62 = vsel %vm4900_vm13, %v10692_v29, 0.0  ;;  %v11457_v29 = vld [vmem:[#allocation119_spill] sm:$0xff] }
 0x343   : > { %7785 = vmatprep.subr.msk.mxu1 %vm1175_vm12, %v4829_v34 }
 0x345   : > { %7763 = vmatmul.mubr.msk.f32.gmra.mrb[50].mxu1 %vm1111_vm1, %v5242_v52 }
 0x346   : > { %7765 = vmatprep.mubr.msk.f32.mxu1 %vm1111_vm1, %v5243_v18 }
 0x349   : > { %7766 = vmatmul.mubr.msk.f32.gmra.mrb[52].mxu1 %vm1111_vm1, %v5244_v13 }
 0x34a   : > { %7768 = vmatprep.mubr.msk.f32.mxu1 %vm1111_vm1, %v5245_v39 }
 0x34d   : > { %7769 = vmatmul.mubr.msk.f32.gmra.mrb[54].mxu1 %vm1111_vm1, %v5246_v7 }
 0x34e   : > { %7773 = vmatprep.mubr.msk.f32.mxu1 %vm1111_vm1, %v5390_v4 }
 0x351   : > { %7774 = vmatmul.mubr.msk.f32.vlgmr.msra.gmra.mrb[48].mxu1 %vm1111_vm1, %v5391_v51 }
 0x352   : > { %7776 = vmatprep.mubr.msk.f32.mxu1 %vm1111_vm1, %v5392_v28  ;;  %7786 = vmatpush3.msk.msra.mxu1 %vm1175_vm12, %v4829_v34  ;;  %v5815_v34 = vsel %vm4907_vm11, %v5807_v40, 0.0  ;;  %v6835_v28 = vld [vmem:[%s10984_s12] ss:$0 sm:$0xff] }
 0x353   : > { %7799 = vmatprep.subr.msk.mxu1 %vm1175_vm12, %v5666_v0 }
 0x355   : > { %7777 = vmatmul.mubr.msk.f32.gmra.mrb[50].mxu1 %vm1111_vm1, %v5393_v36  ;;  %v6755_v36 = vld [vmem:[%s10980_s8] ss:$0 sm:$0xff] }
 0x356   : > { %7779 = vmatprep.mubr.msk.f32.mxu1 %vm1111_vm1, %v5394_v44 }
 0x359   : > { %7780 = vmatmul.mubr.msk.f32.gmra.mrb[52].mxu1 %vm1111_vm1, %v5395_v19 }
 0x35a   : > { %7782 = vmatprep.mubr.msk.f32.mxu1 %vm1111_vm1, %v5396_v55 }
 0x35d   : > { %7783 = vmatmul.mubr.msk.f32.gmra.mrb[54].mxu1 %vm1111_vm1, %v5397_v60 }
 0x35e   : > { %7787 = vmatprep.mubr.msk.f32.mxu1 %vm1111_vm1, %v10666_v17  ;;  %v5658_v17 = vsel %vm5231_vm7, %v5169_v58, 0.0  ;;  %v5814_v58 = vsel %vm4906_vm0, %v5388_v23, 0.0 }
 0x361   : > { %7788 = vmatmul.mubr.msk.f32.vlgmr.msra.gmra.mrb[48].mxu1 %vm1111_vm1, %v9915_v16 }
 0x362   : > { %7790 = vmatprep.mubr.msk.f32.mxu1 %vm1111_vm1, %v9878_v25  ;;  %7800 = vmatpush3.msk.msra.mxu1 %vm1175_vm12, %v5666_v0 }
 0x363   : > { %7813 = vmatprep.subr.msk.mxu1 %vm1175_vm12, %v4830_v45 }
 0x365   : > { %7791 = vmatmul.mubr.msk.f32.gmra.mrb[50].mxu1 %vm1111_vm1, %v9892_v59 }
 0x366   : > { %7793 = vmatprep.mubr.msk.f32.mxu1 %vm1111_vm1, %v9931_v2 }
 0x369   : > { %7794 = vmatmul.mubr.msk.f32.gmra.mrb[52].mxu1 %vm1111_vm1, %v9933_v50 }
 0x36a   : > { %7796 = vmatprep.mubr.msk.f32.mxu1 %vm1111_vm1, %v9978_v43 }
 0x36d   : > { %7797 = vmatmul.mubr.msk.f32.gmra.mrb[54].mxu1 %vm1111_vm1, %v11447_v10 }
 0x36e   : > { %7801 = vmatprep.mubr.msk.f32.mxu1 %vm1111_vm1, %v5658_v17 }
 0x371   : > { %7802 = vmatmul.mubr.msk.f32.vlgmr.msra.gmra.mrb[48].mxu1 %vm1111_vm1, %v5659_v14 }
 0x372   : > { %7804 = vmatprep.mubr.msk.f32.mxu1 %vm1111_vm1, %v5660_v5  ;;  %7814 = vmatpush3.msk.msra.mxu1 %vm1175_vm12, %v4830_v45 }
 0x373   : > { %7827 = vmatprep.subr.msk.mxu1 %vm1175_vm12, %v5956_v22 }
 0x375   : > { %7805 = vmatmul.mubr.msk.f32.gmra.mrb[50].mxu1 %vm1111_vm1, %v5661_v49 }
 0x376   : > { %7807 = vmatprep.mubr.msk.f32.mxu1 %vm1111_vm1, %v5662_v20 }
 0x379   : > { %7808 = vmatmul.mubr.msk.f32.gmra.mrb[52].mxu1 %vm1111_vm1, %v5663_v41 }
 0x37a   : > { %7810 = vmatprep.mubr.msk.f32.mxu1 %vm1111_vm1, %v5664_v48 }
 0x37d   : > { %7811 = vmatmul.mubr.msk.f32.gmra.mrb[54].mxu1 %vm1111_vm1, %v5665_v53 }
 0x37e   : > { %7815 = vmatprep.mubr.msk.f32.mxu1 %vm1111_vm1, %v5808_v62 }
 0x381   : > { %7816 = vmatmul.mubr.msk.f32.vlgmr.msra.gmra.mrb[48].mxu1 %vm1111_vm1, %v11454_v42 }
 0x382   : > { %7818 = vmatprep.mubr.msk.f32.mxu1 %vm1111_vm1, %v11455_v12  ;;  %7828 = vmatpush3.msk.msra.mxu1 %vm1175_vm12, %v5956_v22  ;;  %v6837_v22 = vld [vmem:[%s10986_s14] ss:$0 sm:$0xff] }
 0x383   : > { %7841 = vmatprep.subr.msk.mxu1 %vm1175_vm12, %v4831_v1  ;;  %v6838_v12 = vld [vmem:[%s10987_s15] ss:$0 sm:$0xff] }
 0x385   : > { %7819 = vmatmul.mubr.msk.f32.gmra.mrb[50].mxu1 %vm1111_vm1, %v11456_v54 }
 0x386   : > { %7821 = vmatprep.mubr.msk.f32.mxu1 %vm1111_vm1, %v11457_v29 }
 0x389   : > { %7822 = vmatmul.mubr.msk.f32.gmra.mrb[52].mxu1 %vm1111_vm1, %v11458_v24 }
 0x38a   : > { %7824 = vmatprep.mubr.msk.f32.mxu1 %vm1111_vm1, %v5814_v58 }
 0x38d   : > { %7825 = vmatmul.mubr.msk.f32.gmra.mrb[54].mxu1 %vm1111_vm1, %v5815_v34 }
 0x38e   : > { %7829 = vmatprep.mubr.msk.f32.mxu1 %vm1111_vm1, %v9915_v16  ;;  %v11461_v16 = vld [vmem:[#allocation133_spill] sm:$0xff] }
 0x391   : > { %7830 = vmatmul.mubr.msk.f32.vlgmr.msra.gmra.mrb[48].mxu1 %vm1111_vm1, %v9878_v25  ;;  %v11459_v25 = vld [vmem:[#allocation127_spill] sm:$0xff] }
 0x392   : > { %7832 = vmatprep.mubr.msk.f32.mxu1 %vm1111_vm1, %v9892_v59  ;;  %7842 = vmatpush3.msk.msra.mxu1 %vm1175_vm12, %v4831_v1  ;;  %v11460_v59 = vld [vmem:[#allocation134_spill] sm:$0xff]  ;;  %vm6292_vm12 = vcmask 64512  }
 0x395   : > { %7833 = vmatmul.mubr.msk.f32.gmra.mrb[50].mxu1 %vm1111_vm1, %v9931_v2  ;;  %v11462_v2 = vld [vmem:[#allocation140_spill] sm:$0xff] }
 0x396   : > { %7835 = vmatprep.mubr.msk.f32.mxu1 %vm1111_vm1, %v9933_v50  ;;  %v11463_v50 = vld [vmem:[#allocation139_spill] sm:$0xff] }
 0x399   : > { %7836 = vmatmul.mubr.msk.f32.gmra.mrb[52].mxu1 %vm1111_vm1, %v9978_v43  ;;  %v11464_v43 = vld [vmem:[#allocation143_spill] sm:$0xff] }
 0x39a   : > { %7838 = vmatprep.mubr.msk.f32.mxu1 %vm1111_vm1, %v11447_v10 }
 0x39d   : > { %7839 = vmatmul.mubr.f32.gmra.mrb[54].mxu1 %v11362_v38 }
 0x39e   : > { %7843 = vmatprep.mubr.msk.f32.mxu1 %vm1111_vm1, %v11459_v25 }
 0x3a1   : > { %7844 = vmatmul.mubr.msk.f32.vlgmr.msra.gmra.mrb[48].mxu1 %vm1111_vm1, %v11460_v59 }
 0x3a2   : > { %7846 = vmatprep.mubr.msk.f32.mxu1 %vm1111_vm1, %v11461_v16 }
 0x3a5   : > { %7847 = vmatmul.mubr.msk.f32.gmra.mrb[50].mxu1 %vm1111_vm1, %v11462_v2 }
 0x3a6   : > { %7849 = vmatprep.mubr.msk.f32.mxu1 %vm1111_vm1, %v11463_v50 }
 0x3a9   : > { %7850 = vmatmul.mubr.msk.f32.gmra.mrb[52].mxu1 %vm1111_vm1, %v11464_v43 }
 0x3aa   : > { %7852 = vmatprep.mubr.msk.f32.mxu1 %vm1111_vm1, %v6078_v33 }
 0x3ad   : > { %7853 = vmatmul.mubr.f32.gmra.mrb[54].mxu1 %v11362_v38 }
 0x3d4   : > { %v7174_v30 = vpop.f32.mrb[32].mxu1 }
 0x3d5   : > { %v7175_v27 = vpop.f32.mrb[33].mxu1 }
 0x3d6   : > { %v7176_v8 = vadd.f32 %v7175_v27, %v7174_v30 }
 0x3d8   : > { %v7177_v9 = vpop.f32.mrb[34].mxu1  ;;  %v4751_v55 = vadd.f32 %v7176_v8, %v6755_v36 }
 0x3d9   : > { %v7178_v26 = vpop.f32.mrb[35].mxu1 }
 0x3da   : > { %v7179_v32 = vadd.f32 %v7178_v26, %v7177_v9 }
 0x3dc   : > { %v7180_v52 = vpop.f32.mrb[36].mxu1  ;;  %v4756_v10 = vadd.f32 %v7179_v32, %v6755_v36 }
 0x3dd   : > { %v7181_v47 = vpop.f32.mrb[37].mxu1 }
 0x3de   : > { %v7182_v21 = vadd.f32 %v7181_v47, %v7180_v52 }
 0x3e0   : > { %v7183_v18 = vpop.f32.mrb[38].mxu1  ;;  %v4761_v41 = vadd.f32 %v7182_v21, %v6755_v36 }
 0x3e1   : > { %v7184_v11 = vpop.f32.mrb[39].mxu1 }
 0x3e2   : > { %v7185_v35 = vadd.f32 %v7184_v11, %v7183_v18 }
 0x3e4   : > { %v7186_v63 = vpop.f32.mrb[40].mxu1  ;;  %v4766_v14 = vadd.f32 %v7185_v35, %v6755_v36 }
 0x3e5   : > { %v7187_v61 = vpop.f32.mrb[41].mxu1 }
 0x3e6   : > { %v7188_v56 = vadd.f32 %v7187_v61, %v7186_v63 }
 0x3e8   : > { %v7189_v13 = vpop.f32.mrb[42].mxu1  ;;  %v4771_v62 = vadd.f32 %v7188_v56, %v6755_v36 }
 0x3e9   : > { %v7190_v37 = vpop.f32.mrb[43].mxu1 }
 0x3ea   : > { %v7191_v39 = vadd.f32 %v7190_v37, %v7189_v13 }
 0x3ec   : > { %v7192_v31 = vpop.f32.mrb[44].mxu1  ;;  %v4776_v29 = vadd.f32 %v7191_v39, %v6755_v36 }
 0x3ed   : > { %v7193_v38 = vpop.f32.mrb[45].mxu1 }
 0x3ee   : > { %v7194_v7 = vadd.f32 %v7193_v38, %v7192_v31 }
 0x3f0   : > { %v7195_v4 = vpop.f32.mrb[46].mxu1  ;;  %v4781_v2 = vadd.f32 %v7194_v7, %v6755_v36 }
 0x3f1   : > { %v7196_v0 = vpop.f32.mrb[47].mxu1 }
 0x3f2   : > { %v7197_v51 = vadd.f32 %v7196_v0, %v7195_v4 }
 0x3f4   : > { %v4786_v30 = vadd.f32 %v7197_v51, %v6755_v36 }
 0x474   : > { %v7845_v44 = vpop.f32.mrb[48].mxu1 }
 0x475   : > { %v6224_v3 = vadd.f32 %v7845_v44, %v6835_v28  ;;  %v6169_v19 = vpop.f32.mrb[49].mxu1 }
 0x476   : > { %v6223_v23 = vadd.f32 %v6835_v28, %v6169_v19 }
 0x477   : > { %v6232_v60 = vadd.f32 %v6224_v3, %v4756_v10 }
 0x478   : > { %v6231_v45 = vadd.f32 %v6223_v23, %v4751_v55  ;;  %v7848_v17 = vpop.f32.mrb[50].mxu1 }
 0x479   : > { %v6247_v5 = vmul.f32 %v6836_v6, %v6232_v60  ;;  %v6226_v49 = vadd.f32 %v7848_v17, %v6835_v28  ;;  %v6179_v20 = vpop.f32.mrb[51].mxu1 }
 0x47a   : > { %v6246_v48 = vmul.f32 %v6836_v6, %v6231_v45  ;;  %v6225_v15 = vadd.f32 %v6835_v28, %v6179_v20 }
 0x47b   : > { %v6234_v57 = vadd.f32 %v6226_v49, %v4766_v14  ;;  %v6262_v53 = vadd.f32 %v6837_v22, %v6247_v5 }
 0x47c   : > { %v6233_v1 = vadd.f32 %v6225_v15, %v4761_v41  ;;  %v7851_v42 = vpop.f32.mrb[52].mxu1  ;;  %v6261_v54 = vadd.f32 %v6837_v22, %v6246_v48 }
 0x47d   : > { %v6249_v58 = vmul.f32 %v6836_v6, %v6234_v57  ;;  %v6228_v40 = vadd.f32 %v7851_v42, %v6835_v28  ;;  %v6189_v24 = vpop.f32.mrb[53].mxu1  ;;  %v6270_v34 = vmax.f32 %v6262_v53, 0.0 }
 0x47e   : > { %v6248_v25 = vmul.f32 %v6836_v6, %v6233_v1  ;;  %v6227_v59 = vadd.f32 %v6835_v28, %v6189_v24  ;;  %v6269_v16 = vmax.f32 %v6261_v54, 0.0 }
 0x47f   : > { %v6236_v50 = vadd.f32 %v6228_v40, %v4776_v29  ;;  %v6285_v43 = vmul.f32 %v6838_v12, %v6270_v34  ;;  %v6264_v33 = vadd.f32 %v6837_v22, %v6249_v58 }
 0x480   : > { %v6235_v27 = vadd.f32 %v6227_v59, %v4771_v62  ;;  %v7854_v8 = vpop.f32.mrb[54].mxu1  ;;  %v6284_v9 = vmul.f32 %v6838_v12, %v6269_v16  ;;  %v6263_v26 = vadd.f32 %v6837_v22, %v6248_v25  ;;  %v8221_v25 = vld [vmem:[%s9734_s18 + $0x8] sm:$0xff] }
 0x481   : > { %v6251_v32 = vmul.f32 %v6836_v6, %v6236_v50  ;;  %v6230_v52 = vadd.f32 %v7854_v8, %v6835_v28  ;;  %v6199_v47 = vpop.f32.mrb[55].mxu1  ;;  %v6296_v21 = vsel %vm6292_vm12, %v6285_v43, 0.0  ;;  %v6272_v18 = vmax.f32 %v6264_v33, 0.0  ;;  %v8222_v43 = vld [vmem:[%s9734_s18 + $0x18] sm:$0xff]  ;;  %v8223_v8 = vld [vmem:[%s9734_s18 + $0x10] sm:$0xff] }
 0x482   : > { %v6250_v11 = vmul.f32 %v6836_v6, %v6235_v27  ;;  %v6229_v35 = vadd.f32 %v6835_v28, %v6199_v47  ;;  %6297 = vadd.xlane.f32.xlu1 %v6296_v21  ;;  %v6293_v63 = vsel %vm6292_vm12, %v6284_v9, 0.0  ;;  %v6271_v61 = vmax.f32 %v6263_v26, 0.0  ;;  %v8225_v47 = vld [vmem:[%s9734_s18 + $0x28] sm:$0xff] }
 0x483   : > { %v6238_v56 = vadd.f32 %v6230_v52, %v4786_v30  ;;  %6294 = vadd.xlane.f32.xlu0 %v6293_v63  ;;  %v6287_v13 = vmul.f32 %v6838_v12, %v6272_v18  ;;  %v6266_v37 = vadd.f32 %v6837_v22, %v6251_v32  ;;  %v8226_v18 = vld [vmem:[%s9734_s18 + $0x30] sm:$0xff]  ;;  %v8227_v63 = vld [vmem:[%s9734_s18 + $0x38] sm:$0xff] }
 0x484   : > { %v6237_v39 = vadd.f32 %v6229_v35, %v4781_v2  ;;  %v6265_v31 = vadd.f32 %v6837_v22, %v6250_v11  ;;  %v6286_v4 = vmul.f32 %v6838_v12, %v6271_v61 }
 0x485   : > { %v6253_v38 = vmul.f32 %v6836_v6, %v6238_v56  ;;  %v6302_v7 = vsel %vm6292_vm12, %v6287_v13, 0.0  ;;  %v6274_v36 = vmax.f32 %v6266_v37, 0.0 }
 0x486   : > { %v6252_v0 = vmul.f32 %v6836_v6, %v6237_v39  ;;  %v6273_v51 = vmax.f32 %v6265_v31, 0.0  ;;  %v6299_v3 = vsel %vm6292_vm12, %v6286_v4, 0.0 }
 0x487   : > { %6303 = vadd.xlane.f32.xlu0 %v6302_v7  ;;  %v6268_v44 = vadd.f32 %v6837_v22, %v6253_v38  ;;  %v6289_v23 = vmul.f32 %v6838_v12, %v6274_v36 }
 0x488   : > { %v6288_v28 = vmul.f32 %v6838_v12, %v6273_v51  ;;  %v6267_v10 = vadd.f32 %v6837_v22, %v6252_v0  ;;  %v6839_v22 = vld [vmem:[#allocation2] ss:$0 sm:$0xff] }
 0x489   : > { %v6276_v60 = vmax.f32 %v6268_v44, 0.0  ;;  %v6308_v6 = vsel %vm6292_vm12, %v6289_v23, 0.0 }
 0x48a   : > { %v6305_v19 = vsel %vm6292_vm12, %v6288_v28, 0.0  ;;  %v6275_v55 = vmax.f32 %v6267_v10, 0.0 }
 0x48b   : > { %6306 = vadd.xlane.f32.xlu1 %v6305_v19  ;;  %6300 = vadd.xlane.f32.xlu0 %v6299_v3  ;;  %v6291_v14 = vmul.f32 %v6838_v12, %v6276_v60 }
 0x48c   : > { %v6290_v45 = vmul.f32 %v6838_v12, %v6275_v55 }
 0x48d   : > { %v6314_v5 = vsel %vm6292_vm12, %v6291_v14, 0.0 }
 0x48e   : > { %v6311_v17 = vsel %vm6292_vm12, %v6290_v45, 0.0 }
 0x48f   : > { %6312 = vadd.xlane.f32.xlu1 %v6311_v17  ;;  %6309 = vadd.xlane.f32.xlu0 %v6308_v6 }
 0x493   : > { %6315 = vadd.xlane.f32.xlu0 %v6314_v5 }
 0x50f   : > { %v6298_v49 = vpop.xlane.xlu1 %6297 }
 0x510   : > { %v6325_v20 = vadd.f32 %v6839_v22, %v6298_v49  ;;  %v6295_v41 = vpop.xlane.xlu0 %6294 }
 0x511   : > { %v6324_v48 = vadd.f32 %v6839_v22, %v6295_v41 }
 0x512   : > { %6339 = vperm.xlu0 %8217, %v6325_v20  }
 0x513   : > { %6334 = vperm.xlu1 %8218, %v6324_v48  }
 0x514   : > { %v6304_v15 = vpop.xlane.xlu0 %6303 }
 0x515   : > { %v6327_v57 = vadd.f32 %v6839_v22, %v6304_v15 }
 0x517   : > { %6349 = vperm.xlu1 %8218, %v6327_v57  }
 0x518   : > { %v6307_v53 = vpop.xlane.xlu1 %6306  ;;  %v6301_v62 = vpop.xlane.xlu0 %6300 }
 0x519   : > { %v6328_v1 = vadd.f32 %v6839_v22, %v6307_v53  ;;  %v6326_v42 = vadd.f32 %v6839_v22, %v6301_v62 }
 0x51b   : > { %6354 = vperm.xlu0 %8217, %v6328_v1   ;;  %6344 = vperm.xlu1 %8218, %v6326_v42  }
 0x51c   : > { %v6313_v12 = vpop.xlane.xlu1 %6312  ;;  %v6310_v54 = vpop.xlane.xlu0 %6309 }
 0x51d   : > { %v6330_v29 = vadd.f32 %v6839_v22, %v6313_v12  ;;  %v6329_v58 = vadd.f32 %v6839_v22, %v6310_v54 }
 0x51f   : > { %6364 = vperm.xlu0 %8217, %v6330_v29   ;;  %6359 = vperm.xlu1 %8218, %v6329_v58  }
 0x520   : > { %v6316_v40 = vpop.xlane.xlu0 %6315 }
 0x521   : > { %v6331_v24 = vadd.f32 %v6839_v22, %v6316_v40 }
 0x523   : > { %6369 = vperm.xlu1 %8218, %v6331_v24  }
 0x591   : > { %v6340_v34 = vpop.permute.xlu0 %6339 }
 0x592   : > { %v6373_v59 = vmul.f32 %v8221_v25, %v6340_v34  ;;  %v6335_v16 = vpop.permute.xlu1 %6334 }
 0x593   : > { %v6372_v2 = vmul.f32 %v6335_v16, %v10647_v46  ;;  %v8224_v46 = vld [vmem:[%s9734_s18 + $0x20] sm:$0xff] }
 0x594   : > { %6381 = vst.msk [vmem:[%s10943_s22 + $0x8] sm:$0xff] %vm1111_vm1, %v6373_v59 }
 0x595   : > { %6380 = vst.msk [vmem:[%s10943_s22] sm:$0xff] %vm1111_vm1, %v6372_v2 }
 0x596   : > { %v6350_v50 = vpop.permute.xlu1 %6349 }
 0x597   : > { %v6375_v33 = vmul.f32 %v8222_v43, %v6350_v50 }
 0x599   : > { %6383 = vst.msk [vmem:[%s10943_s22 + $0x18] sm:$0xff] %vm1111_vm1, %v6375_v33 }
 0x59a   : > { %v6345_v30 = vpop.permute.xlu1 %6344  ;;  %v6355_v27 = vpop.permute.xlu0 %6354 }
 0x59b   : > { %v6374_v9 = vmul.f32 %v8223_v8, %v6345_v30  ;;  %v6376_v26 = vmul.f32 %v8224_v46, %v6355_v27 }
 0x59d   : > { %6382 = vst.msk [vmem:[%s10943_s22 + $0x10] sm:$0xff] %vm1111_vm1, %v6374_v9  ;;  %6384 = vst.msk [vmem:[%s10943_s22 + $0x20] sm:$0xff] %vm1111_vm1, %v6376_v26 }
 0x59e   : > { %v6360_v32 = vpop.permute.xlu1 %6359  ;;  %v6365_v52 = vpop.permute.xlu0 %6364 }
 0x59f   : > { %v6377_v21 = vmul.f32 %v8225_v47, %v6360_v32  ;;  %v6378_v11 = vmul.f32 %v8226_v18, %v6365_v52 }
 0x5a1   : > { %6385 = vst.msk [vmem:[%s10943_s22 + $0x28] sm:$0xff] %vm1111_vm1, %v6377_v21  ;;  %6386 = vst.msk [vmem:[%s10943_s22 + $0x30] sm:$0xff] %vm1111_vm1, %v6378_v11 }
 0x5a2   : > { %v6370_v35 = vpop.permute.xlu1 %6369 }
 0x5a3   : > { %v6379_v61 = vmul.f32 %v8227_v63, %v6370_v35 }
 0x5a5   : > { %6387 = vst.msk [vmem:[%s10943_s22 + $0x38] sm:$0xff] %vm1111_vm1, %v6379_v61 }
 0x5a6 PF: > { %s29_s26 = sadd.s32 1, %s8234_s26  }
 0x5a7   : > { %p26_p4 = scmp.ge.s32.totalorder %s29_s26, 4  }
 0x5a9   :  { %28 = sbr.rel (!%p26_p4) target bundleno = 3 (0x3), region = 121 }

</bundles_post_ra>
